<compile_context>
chip_gen: v5e
topology: v5e:2x2
jax: 0.10.0
libtpu: 0.0.40
codegen_flags: <defaults>
</compile_context>

<pallas_src>
import jax
import jax.numpy as jnp
from jax.experimental import pallas as pl
from jax.experimental.pallas import tpu as pltpu


# ----------------------------- Pallas kernel -------------------------------

def _lenet_fused_kernel(cols1_ref, w1c_ref, b1c_ref, w2p_ref, b2c_ref,
                        fw1_ref, fb1_ref, fw2_ref, fb2_ref, fw3_ref, fb3_ref,
                        o_ref,
                        h1_ref, cols2_ref, y2_ref, p_ref, a_ref):
    """Whole LeNet forward in one kernel.

    cols1: (4, 25, 4*N*49) conv1 im2col, one slab per 2x2-pool quadrant;
           lane = (2a+b)*N*49 + n*49 + u*7 + v  with pooled pos (2u+a, 2v+b).
    w1c:   (6, 25)    conv1 weight,  b1c: (6, 1)
    w2p:   (16, 200)  conv2 weight in (ki, kj, ci[pad to 8]) column order
    fw1:   (528, 120) fc1 weight in (ci, ph*7+pw [33-block]) row order
    out:   (N, 10)
    """
    N = o_ref.shape[0]
    Mq = (N - 1) * 49 + 33          # lane width of one conv2 pool-quadrant slab

    # ---- conv1 + bias + ReLU + 2x2 maxpool (max over 4 quadrant matmuls) ----
    w1 = w1c_ref[...]
    y = jnp.dot(w1, cols1_ref[0], preferred_element_type=jnp.float32)
    for q in range(1, 4):
        y = jnp.maximum(
            y, jnp.dot(w1, cols1_ref[q], preferred_element_type=jnp.float32))
    # relu(maxpool(conv + b)) == maxpool(relu(conv)) + monotone bias fold.
    h1_ref[...] = jnp.maximum(y + b1c_ref[...], 0.0)        # (6, 4*N*49)

    # ---- conv2 im2col: every patch is a CONTIGUOUS lane slice of h1 --------
    cols2_ref[...] = jnp.zeros_like(cols2_ref)              # pad rows stay 0
    for dh in range(2):                                      # pool quadrant row
        for dw in range(2):                                  # pool quadrant col
            q = dh * 2 + dw
            for i in range(5):                               # conv kernel row
                for j in range(5):                           # conv kernel col
                    pa, oi = (dh + i) % 2, (dh + i) // 2     # parity / offset
                    pb, oj = (dw + j) % 2, (dw + j) // 2
                    start = (pa * 2 + pb) * N * 49 + oi * 7 + oj
                    r0 = (i * 5 + j) * 8                     # 8-aligned row blk
                    cols2_ref[r0:r0 + 6, q * Mq:(q + 1) * Mq] = (
                        h1_ref[:, start:start + Mq])

    # ---- conv2: ONE lane-dense weight-stationary matmul for all quadrants --
    y2_ref[...] = jnp.dot(w2p_ref[...], cols2_ref[...],
                          preferred_element_type=jnp.float32)   # (16, 4*Mq)

    # ---- 2x2 maxpool over quadrant lane-blocks + bias + ReLU ---------------
    p = y2_ref[:, 0:Mq]
    for q in range(1, 4):
        p = jnp.maximum(p, y2_ref[:, q * Mq:(q + 1) * Mq])
    p_ref[...] = jnp.maximum(p + b2c_ref[...], 0.0)             # (16, Mq)

    # ---- flatten (N,16,5,5)->(N,400) folded into fc1's block layout --------
    # a[n, c*33 + t] = p[c, n*49 + t]; garbage t (pw in {5,6}) hit zero weights.
    for n in range(N):
        for c in range(16):
            a_ref[n:n + 1, c * 33:c * 33 + 33] = (
                p_ref[c:c + 1, n * 49:n * 49 + 33])

    # ---- fc1 -> ReLU -> fc2 -> ReLU -> fc3 ---------------------------------
    h = jnp.dot(a_ref[...], fw1_ref[...], preferred_element_type=jnp.float32)
    h = jnp.maximum(h + fb1_ref[...], 0.0)
    h = jnp.dot(h, fw2_ref[...], preferred_element_type=jnp.float32)
    h = jnp.maximum(h + fb2_ref[...], 0.0)
    h = jnp.dot(h, fw3_ref[...], preferred_element_type=jnp.float32)
    o_ref[...] = (h + fb3_ref[...]).astype(o_ref.dtype)


def lenet_forward_fused(pp, x):
    """x: (N, 1, 32, 32) -> logits (N, 10). One pallas_call, no grid."""
    N = x.shape[0]
    Mq = (N - 1) * 49 + 33
    cols1 = build_cols1(x)                                   # (4, 25, 4*N*49)
    vmem = pl.BlockSpec(memory_space=pltpu.MemorySpace.VMEM)
    return pl.pallas_call(
        _lenet_fused_kernel,
        out_shape=jax.ShapeDtypeStruct((N, 10), jnp.float32),
        in_specs=[vmem] * 11,
        out_specs=vmem,
        scratch_shapes=[
            pltpu.VMEM((6, 4 * N * 49), jnp.float32),        # h1 (conv1 pooled)
            pltpu.VMEM((200, 4 * Mq), jnp.float32),          # conv2 im2col
            pltpu.VMEM((16, 4 * Mq), jnp.float32),           # conv2 pre-pool
            pltpu.VMEM((16, Mq), jnp.float32),               # conv2 pooled
            pltpu.VMEM((N, 16 * 33), jnp.float32),           # fc1 input
        ],
    )(cols1, pp["w1c"], pp["b1c"], pp["w2p"], pp["b2c"],
      pp["fw1"], pp["fb1"], pp["fw2"], pp["fb2"], pp["fw3"], pp["fb3"])


# ------------------------------- JAX glue ----------------------------------

def build_cols1(x):
    """conv1 im2col with the parity-split pooled-output lane layout.

    x: (N, 1, 32, 32) -> (4, 25, 4*N*49).  Quadrant q1=(e*2+f) covers conv1
    output (2*ph1+e, 2*pw1+f); with ph1=2u+a, pw1=2v+b the input pixel needed
    for kernel offset (ki,kj) is x[n, 4u + 2a+e+ki, 4v + 2b+f+kj] (max idx 31).
    """
    N = x.shape[0]
    xs = x[:, 0]                                             # (N, 32, 32)
    # Xb[h0, w0, n, u, v] = xs[n, 4u+h0, 4v+w0], h0,w0 in [0,8), u,v in [0,7)
    xb = jnp.stack([jnp.stack([xs[:, h0:h0 + 25:4, w0:w0 + 25:4]
                               for w0 in range(8)], 0)
                    for h0 in range(8)], 0)                  # (8,8,N,7,7)
    ki, kj, e, f, a, b = jnp.meshgrid(
        *(jnp.arange(s) for s in (5, 5, 2, 2, 2, 2)), indexing="ij")
    ih = (2 * a + e + ki).reshape(25, 16)
    iw = (2 * b + f + kj).reshape(25, 16)
    g = xb[ih, iw]                                           # (25,16,N,7,7)
    g = g.reshape(25, 4, 4 * N * 49)                         # (ki,kj)|(e,f)|rest
    return jnp.transpose(g, (1, 0, 2))                       # (4, 25, 4*N*49)


def init_params(key):
    """Deterministic PyTorch-style uniform(-1/sqrt(fan_in), 1/sqrt(fan_in))."""
    def uniform(k, shape, fan_in):
        bound = 1.0 / jnp.sqrt(jnp.float32(fan_in))
        return jax.random.uniform(k, shape, jnp.float32, -bound, bound)

    keys = jax.random.split(key, 10)
    return {
        "conv1_w": uniform(keys[0], (6, 1, 5, 5), 1 * 5 * 5),
        "conv1_b": uniform(keys[1], (6,), 1 * 5 * 5),
        "conv2_w": uniform(keys[2], (16, 6, 5, 5), 6 * 5 * 5),
        "conv2_b": uniform(keys[3], (16,), 6 * 5 * 5),
        "fc1_w": uniform(keys[4], (120, 400), 400),
        "fc1_b": uniform(keys[5], (120,), 400),
        "fc2_w": uniform(keys[6], (84, 120), 120),
        "fc2_b": uniform(keys[7], (84,), 120),
        "fc3_w": uniform(keys[8], (10, 84), 84),
        "fc3_b": uniform(keys[9], (10,), 84),
    }


def prep_params(p):
    """One-time repack of PyTorch-layout params into kernel-friendly layouts."""
    # conv2 weight, column order (ki, kj, ci padded 6->8) to match cols2 rows.
    w2perm = jnp.transpose(p["conv2_w"], (2, 3, 1, 0))       # (ki,kj,ci,co)
    w2pad = jnp.pad(w2perm, ((0, 0), (0, 0), (0, 2), (0, 0)))
    w2p = w2pad.reshape(25 * 8, 16).T                        # (16, 200)

    # fc1 weight repacked so it consumes the (ci, ph*7+pw) pooled conv2 layout
    # directly (folds the flatten/transpose); pad pw 5->7, keep first 33 rows.
    fc1r = p["fc1_w"].reshape(120, 16, 5, 5)                 # (f, ci, ph, pw)
    fc1pad = jnp.pad(fc1r, ((0, 0), (0, 0), (0, 0), (0, 2)))  # (f, ci, 5, 7)
    fw1 = fc1pad.reshape(120, 16, 35)[:, :, :33].reshape(120, 16 * 33).T

    return {
        "w1c": p["conv1_w"].reshape(6, 25),
        "b1c": p["conv1_b"].reshape(6, 1),
        "w2p": w2p,
        "b2c": p["conv2_b"].reshape(16, 1),
        "fw1": fw1, "fb1": p["fc1_b"].reshape(1, 120),
        "fw2": p["fc2_w"].T, "fb2": p["fc2_b"].reshape(1, 84),
        "fw3": p["fc3_w"].T, "fb3": p["fc3_b"].reshape(1, 10),
    }


def reference_forward(p, x):
    """Pure-JAX reference of the PyTorch Net forward (for validation)."""
    dn = ("NCHW", "OIHW", "NCHW")
    y = jax.lax.conv_general_dilated(x, p["conv1_w"], (1, 1), "VALID",
                                     dimension_numbers=dn)
    y = jnp.maximum(y + p["conv1_b"].reshape(1, -1, 1, 1), 0.0)
    y = jax.lax.reduce_window(y, -jnp.inf, jax.lax.max,
                              (1, 1, 2, 2), (1, 1, 2, 2), "VALID")
    y = jax.lax.conv_general_dilated(y, p["conv2_w"], (1, 1), "VALID",
                                     dimension_numbers=dn)
    y = jnp.maximum(y + p["conv2_b"].reshape(1, -1, 1, 1), 0.0)
    y = jax.lax.reduce_window(y, -jnp.inf, jax.lax.max,
                              (1, 1, 2, 2), (1, 1, 2, 2), "VALID")
    y = y.reshape(y.shape[0], -1)                            # (N, 400)
    y = jnp.maximum(y @ p["fc1_w"].T + p["fc1_b"], 0.0)
    y = jnp.maximum(y @ p["fc2_w"].T + p["fc2_b"], 0.0)
    return y @ p["fc3_w"].T + p["fc3_b"]


if __name__ == "__main__":
    key = jax.random.PRNGKey(0)
    pkey, xkey = jax.random.split(key)
    params = init_params(pkey)
    pp = prep_params(params)

    # Net requires 1x32x32 input so the flatten is exactly 16*5*5. Batch = 2.
    x = jax.random.normal(xkey, (2, 1, 32, 32), jnp.float32)

    fwd = jax.jit(lenet_forward_fused)
    out = jax.block_until_ready(fwd(pp, x))
    assert out.shape == (2, 10) and out.dtype == jnp.float32

    ref = reference_forward(params, x)
    max_err = jnp.max(jnp.abs(out - ref))
    assert jnp.allclose(out, ref, rtol=2e-2, atol=2e-2), f"max abs err {max_err}"

    print("KERNEL_OK")
</pallas_src>

<mosaic_0001>
module attributes {stable_mosaic.version = 11 : i64} {
  func.func @_lenet_fused_kernel(%arg0: memref<4x25x392xf32, #tpu.memory_space<vmem>>, %arg1: memref<6x25xf32, #tpu.memory_space<vmem>>, %arg2: memref<6x1xf32, #tpu.memory_space<vmem>>, %arg3: memref<16x200xf32, #tpu.memory_space<vmem>>, %arg4: memref<16x1xf32, #tpu.memory_space<vmem>>, %arg5: memref<528x120xf32, #tpu.memory_space<vmem>>, %arg6: memref<1x120xf32, #tpu.memory_space<vmem>>, %arg7: memref<120x84xf32, #tpu.memory_space<vmem>>, %arg8: memref<1x84xf32, #tpu.memory_space<vmem>>, %arg9: memref<84x10xf32, #tpu.memory_space<vmem>>, %arg10: memref<1x10xf32, #tpu.memory_space<vmem>>, %arg11: memref<2x10xf32, #tpu.memory_space<vmem>>, %arg12: memref<6x392xf32, #tpu.memory_space<vmem>>, %arg13: memref<200x328xf32, #tpu.memory_space<vmem>>, %arg14: memref<16x328xf32, #tpu.memory_space<vmem>>, %arg15: memref<16x82xf32, #tpu.memory_space<vmem>>, %arg16: memref<2x528xf32, #tpu.memory_space<vmem>>) attributes {dimension_semantics = [], scalar_prefetch = 0 : i64, scratch_operands = 5 : i64, tpu.core_type = #tpu.core_type<tc>} {
    %c0 = arith.constant 0 : index
    %c0_0 = arith.constant 0 : index
    %0 = vector.load %arg1[%c0, %c0_0] : memref<6x25xf32, #tpu.memory_space<vmem>>, vector<6x25xf32>
    %c0_1 = arith.constant 0 : index
    %c0_2 = arith.constant 0 : index
    %c0_3 = arith.constant 0 : index
    %1 = vector.load %arg0[%c0_1, %c0_2, %c0_3] : memref<4x25x392xf32, #tpu.memory_space<vmem>>, vector<1x25x392xf32>
    %2 = vector.shape_cast %1 : vector<1x25x392xf32> to vector<25x392xf32>
    %cst = arith.constant dense<0.000000e+00> : vector<6x392xf32>
    %3 = tpu.matmul %0, %2, %cst {dimension_numbers = #tpu.dot_dimension_numbers<[1], [0], [0], [1], [0, 0, 1, 1], [], []>} : vector<6x25xf32>, vector<25x392xf32>, vector<6x392xf32> -> vector<6x392xf32>
    %c1 = arith.constant 1 : index
    %c0_4 = arith.constant 0 : index
    %c0_5 = arith.constant 0 : index
    %4 = vector.load %arg0[%c1, %c0_4, %c0_5] : memref<4x25x392xf32, #tpu.memory_space<vmem>>, vector<1x25x392xf32>
    %5 = vector.shape_cast %4 : vector<1x25x392xf32> to vector<25x392xf32>
    %cst_6 = arith.constant dense<0.000000e+00> : vector<6x392xf32>
    %6 = tpu.matmul %0, %5, %cst_6 {dimension_numbers = #tpu.dot_dimension_numbers<[1], [0], [0], [1], [0, 0, 1, 1], [], []>} : vector<6x25xf32>, vector<25x392xf32>, vector<6x392xf32> -> vector<6x392xf32>
    %7 = arith.maximumf %3, %6 : vector<6x392xf32>
    %c2 = arith.constant 2 : index
    %c0_7 = arith.constant 0 : index
    %c0_8 = arith.constant 0 : index
    %8 = vector.load %arg0[%c2, %c0_7, %c0_8] : memref<4x25x392xf32, #tpu.memory_space<vmem>>, vector<1x25x392xf32>
    %9 = vector.shape_cast %8 : vector<1x25x392xf32> to vector<25x392xf32>
    %cst_9 = arith.constant dense<0.000000e+00> : vector<6x392xf32>
    %10 = tpu.matmul %0, %9, %cst_9 {dimension_numbers = #tpu.dot_dimension_numbers<[1], [0], [0], [1], [0, 0, 1, 1], [], []>} : vector<6x25xf32>, vector<25x392xf32>, vector<6x392xf32> -> vector<6x392xf32>
    %11 = arith.maximumf %7, %10 : vector<6x392xf32>
    %c3 = arith.constant 3 : index
    %c0_10 = arith.constant 0 : index
    %c0_11 = arith.constant 0 : index
    %12 = vector.load %arg0[%c3, %c0_10, %c0_11] : memref<4x25x392xf32, #tpu.memory_space<vmem>>, vector<1x25x392xf32>
    %13 = vector.shape_cast %12 : vector<1x25x392xf32> to vector<25x392xf32>
    %cst_12 = arith.constant dense<0.000000e+00> : vector<6x392xf32>
    %14 = tpu.matmul %0, %13, %cst_12 {dimension_numbers = #tpu.dot_dimension_numbers<[1], [0], [0], [1], [0, 0, 1, 1], [], []>} : vector<6x25xf32>, vector<25x392xf32>, vector<6x392xf32> -> vector<6x392xf32>
    %15 = arith.maximumf %11, %14 : vector<6x392xf32>
    %c0_13 = arith.constant 0 : index
    %c0_14 = arith.constant 0 : index
    %16 = vector.load %arg2[%c0_13, %c0_14] : memref<6x1xf32, #tpu.memory_space<vmem>>, vector<6x1xf32>
    %17 = vector.broadcast %16 : vector<6x1xf32> to vector<6x392xf32>
    %18 = arith.addf %15, %17 : vector<6x392xf32>
    %cst_15 = arith.constant 0.000000e+00 : f32
    %19 = vector.broadcast %cst_15 : f32 to vector<6x392xf32>
    %20 = arith.maximumf %18, %19 : vector<6x392xf32>
    %c0_16 = arith.constant 0 : index
    %c0_17 = arith.constant 0 : index
    %21 = vector.load %arg12[%c0_16, %c0_17] : memref<6x392xf32, #tpu.memory_space<vmem>>, vector<6x392xf32>
    tpu.vector_store %arg12[%c0_16, %c0_17], %20 {strides = array<i32>} : memref<6x392xf32, #tpu.memory_space<vmem>>, vector<6x392xf32>,
    %cst_18 = arith.constant 0.000000e+00 : f32
    %22 = vector.broadcast %cst_18 : f32 to vector<200x328xf32>
    %c0_19 = arith.constant 0 : index
    %c0_20 = arith.constant 0 : index
    %23 = vector.load %arg13[%c0_19, %c0_20] : memref<200x328xf32, #tpu.memory_space<vmem>>, vector<200x328xf32>
    tpu.vector_store %arg13[%c0_19, %c0_20], %22 {strides = array<i32>} : memref<200x328xf32, #tpu.memory_space<vmem>>, vector<200x328xf32>,
    %c0_21 = arith.constant 0 : index
    %c0_22 = arith.constant 0 : index
    %24 = vector.load %arg12[%c0_21, %c0_22] : memref<6x392xf32, #tpu.memory_space<vmem>>, vector<6x82xf32>
    %c0_23 = arith.constant 0 : index
    %c0_24 = arith.constant 0 : index
    %25 = vector.load %arg13[%c0_23, %c0_24] : memref<200x328xf32, #tpu.memory_space<vmem>>, vector<6x82xf32>
    tpu.vector_store %arg13[%c0_23, %c0_24], %24 {strides = array<i32>} : memref<200x328xf32, #tpu.memory_space<vmem>>, vector<6x82xf32>,
    %c0_25 = arith.constant 0 : index
    %c98 = arith.constant 98 : index
    %26 = vector.load %arg12[%c0_25, %c98] : memref<6x392xf32, #tpu.memory_space<vmem>>, vector<6x82xf32>
    %c8 = arith.constant 8 : index
    %c0_26 = arith.constant 0 : index
    %27 = vector.load %arg13[%c8, %c0_26] : memref<200x328xf32, #tpu.memory_space<vmem>>, vector<6x82xf32>
    tpu.vector_store %arg13[%c8, %c0_26], %26 {strides = array<i32>} : memref<200x328xf32, #tpu.memory_space<vmem>>, vector<6x82xf32>,
    %c0_27 = arith.constant 0 : index
    %c1_28 = arith.constant 1 : index
    %28 = vector.load %arg12[%c0_27, %c1_28] : memref<6x392xf32, #tpu.memory_space<vmem>>, vector<6x82xf32>
    %c16 = arith.constant 16 : index
    %c0_29 = arith.constant 0 : index
    %29 = vector.load %arg13[%c16, %c0_29] : memref<200x328xf32, #tpu.memory_space<vmem>>, vector<6x82xf32>
    tpu.vector_store %arg13[%c16, %c0_29], %28 {strides = array<i32>} : memref<200x328xf32, #tpu.memory_space<vmem>>, vector<6x82xf32>,
    %c0_30 = arith.constant 0 : index
    %c99 = arith.constant 99 : index
    %30 = vector.load %arg12[%c0_30, %c99] : memref<6x392xf32, #tpu.memory_space<vmem>>, vector<6x82xf32>
    %c24 = arith.constant 24 : index
    %c0_31 = arith.constant 0 : index
    %31 = vector.load %arg13[%c24, %c0_31] : memref<200x328xf32, #tpu.memory_space<vmem>>, vector<6x82xf32>
    tpu.vector_store %arg13[%c24, %c0_31], %30 {strides = array<i32>} : memref<200x328xf32, #tpu.memory_space<vmem>>, vector<6x82xf32>,
    %c0_32 = arith.constant 0 : index
    %c2_33 = arith.constant 2 : index
    %32 = vector.load %arg12[%c0_32, %c2_33] : memref<6x392xf32, #tpu.memory_space<vmem>>, vector<6x82xf32>
    %c32 = arith.constant 32 : index
    %c0_34 = arith.constant 0 : index
    %33 = vector.load %arg13[%c32, %c0_34] : memref<200x328xf32, #tpu.memory_space<vmem>>, vector<6x82xf32>
    tpu.vector_store %arg13[%c32, %c0_34], %32 {strides = array<i32>} : memref<200x328xf32, #tpu.memory_space<vmem>>, vector<6x82xf32>,
    %c0_35 = arith.constant 0 : index
    %c196 = arith.constant 196 : index
    %34 = vector.load %arg12[%c0_35, %c196] : memref<6x392xf32, #tpu.memory_space<vmem>>, vector<6x82xf32>
    %c40 = arith.constant 40 : index
    %c0_36 = arith.constant 0 : index
    %35 = vector.load %arg13[%c40, %c0_36] : memref<200x328xf32, #tpu.memory_space<vmem>>, vector<6x82xf32>
    tpu.vector_store %arg13[%c40, %c0_36], %34 {strides = array<i32>} : memref<200x328xf32, #tpu.memory_space<vmem>>, vector<6x82xf32>,
    %c0_37 = arith.constant 0 : index
    %c294 = arith.constant 294 : index
    %36 = vector.load %arg12[%c0_37, %c294] : memref<6x392xf32, #tpu.memory_space<vmem>>, vector<6x82xf32>
    %c48 = arith.constant 48 : index
    %c0_38 = arith.constant 0 : index
    %37 = vector.load %arg13[%c48, %c0_38] : memref<200x328xf32, #tpu.memory_space<vmem>>, vector<6x82xf32>
    tpu.vector_store %arg13[%c48, %c0_38], %36 {strides = array<i32>} : memref<200x328xf32, #tpu.memory_space<vmem>>, vector<6x82xf32>,
    %c0_39 = arith.constant 0 : index
    %c197 = arith.constant 197 : index
    %38 = vector.load %arg12[%c0_39, %c197] : memref<6x392xf32, #tpu.memory_space<vmem>>, vector<6x82xf32>
    %c56 = arith.constant 56 : index
    %c0_40 = arith.constant 0 : index
    %39 = vector.load %arg13[%c56, %c0_40] : memref<200x328xf32, #tpu.memory_space<vmem>>, vector<6x82xf32>
    tpu.vector_store %arg13[%c56, %c0_40], %38 {strides = array<i32>} : memref<200x328xf32, #tpu.memory_space<vmem>>, vector<6x82xf32>,
    %c0_41 = arith.constant 0 : index
    %c295 = arith.constant 295 : index
    %40 = vector.load %arg12[%c0_41, %c295] : memref<6x392xf32, #tpu.memory_space<vmem>>, vector<6x82xf32>
    %c64 = arith.constant 64 : index
    %c0_42 = arith.constant 0 : index
    %41 = vector.load %arg13[%c64, %c0_42] : memref<200x328xf32, #tpu.memory_space<vmem>>, vector<6x82xf32>
    tpu.vector_store %arg13[%c64, %c0_42], %40 {strides = array<i32>} : memref<200x328xf32, #tpu.memory_space<vmem>>, vector<6x82xf32>,
    %c0_43 = arith.constant 0 : index
    %c198 = arith.constant 198 : index
    %42 = vector.load %arg12[%c0_43, %c198] : memref<6x392xf32, #tpu.memory_space<vmem>>, vector<6x82xf32>
    %c72 = arith.constant 72 : index
    %c0_44 = arith.constant 0 : index
    %43 = vector.load %arg13[%c72, %c0_44] : memref<200x328xf32, #tpu.memory_space<vmem>>, vector<6x82xf32>
    tpu.vector_store %arg13[%c72, %c0_44], %42 {strides = array<i32>} : memref<200x328xf32, #tpu.memory_space<vmem>>, vector<6x82xf32>,
    %c0_45 = arith.constant 0 : index
    %c7 = arith.constant 7 : index
    %44 = vector.load %arg12[%c0_45, %c7] : memref<6x392xf32, #tpu.memory_space<vmem>>, vector<6x82xf32>
    %c80 = arith.constant 80 : index
    %c0_46 = arith.constant 0 : index
    %45 = vector.load %arg13[%c80, %c0_46] : memref<200x328xf32, #tpu.memory_space<vmem>>, vector<6x82xf32>
    tpu.vector_store %arg13[%c80, %c0_46], %44 {strides = array<i32>} : memref<200x328xf32, #tpu.memory_space<vmem>>, vector<6x82xf32>,
    %c0_47 = arith.constant 0 : index
    %c105 = arith.constant 105 : index
    %46 = vector.load %arg12[%c0_47, %c105] : memref<6x392xf32, #tpu.memory_space<vmem>>, vector<6x82xf32>
    %c88 = arith.constant 88 : index
    %c0_48 = arith.constant 0 : index
    %47 = vector.load %arg13[%c88, %c0_48] : memref<200x328xf32, #tpu.memory_space<vmem>>, vector<6x82xf32>
    tpu.vector_store %arg13[%c88, %c0_48], %46 {strides = array<i32>} : memref<200x328xf32, #tpu.memory_space<vmem>>, vector<6x82xf32>,
    %c0_49 = arith.constant 0 : index
    %c8_50 = arith.constant 8 : index
    %48 = vector.load %arg12[%c0_49, %c8_50] : memref<6x392xf32, #tpu.memory_space<vmem>>, vector<6x82xf32>
    %c96 = arith.constant 96 : index
    %c0_51 = arith.constant 0 : index
    %49 = vector.load %arg13[%c96, %c0_51] : memref<200x328xf32, #tpu.memory_space<vmem>>, vector<6x82xf32>
    tpu.vector_store %arg13[%c96, %c0_51], %48 {strides = array<i32>} : memref<200x328xf32, #tpu.memory_space<vmem>>, vector<6x82xf32>,
    %c0_52 = arith.constant 0 : index
    %c106 = arith.constant 106 : index
    %50 = vector.load %arg12[%c0_52, %c106] : memref<6x392xf32, #tpu.memory_space<vmem>>, vector<6x82xf32>
    %c104 = arith.constant 104 : index
    %c0_53 = arith.constant 0 : index
    %51 = vector.load %arg13[%c104, %c0_53] : memref<200x328xf32, #tpu.memory_space<vmem>>, vector<6x82xf32>
    tpu.vector_store %arg13[%c104, %c0_53], %50 {strides = array<i32>} : memref<200x328xf32, #tpu.memory_space<vmem>>, vector<6x82xf32>,
    %c0_54 = arith.constant 0 : index
    %c9 = arith.constant 9 : index
    %52 = vector.load %arg12[%c0_54, %c9] : memref<6x392xf32, #tpu.memory_space<vmem>>, vector<6x82xf32>
    %c112 = arith.constant 112 : index
    %c0_55 = arith.constant 0 : index
    %53 = vector.load %arg13[%c112, %c0_55] : memref<200x328xf32, #tpu.memory_space<vmem>>, vector<6x82xf32>
    tpu.vector_store %arg13[%c112, %c0_55], %52 {strides = array<i32>} : memref<200x328xf32, #tpu.memory_space<vmem>>, vector<6x82xf32>,
    %c0_56 = arith.constant 0 : index
    %c203 = arith.constant 203 : index
    %54 = vector.load %arg12[%c0_56, %c203] : memref<6x392xf32, #tpu.memory_space<vmem>>, vector<6x82xf32>
    %c120 = arith.constant 120 : index
    %c0_57 = arith.constant 0 : index
    %55 = vector.load %arg13[%c120, %c0_57] : memref<200x328xf32, #tpu.memory_space<vmem>>, vector<6x82xf32>
    tpu.vector_store %arg13[%c120, %c0_57], %54 {strides = array<i32>} : memref<200x328xf32, #tpu.memory_space<vmem>>, vector<6x82xf32>,
    %c0_58 = arith.constant 0 : index
    %c301 = arith.constant 301 : index
    %56 = vector.load %arg12[%c0_58, %c301] : memref<6x392xf32, #tpu.memory_space<vmem>>, vector<6x82xf32>
    %c128 = arith.constant 128 : index
    %c0_59 = arith.constant 0 : index
    %57 = vector.load %arg13[%c128, %c0_59] : memref<200x328xf32, #tpu.memory_space<vmem>>, vector<6x82xf32>
    tpu.vector_store %arg13[%c128, %c0_59], %56 {strides = array<i32>} : memref<200x328xf32, #tpu.memory_space<vmem>>, vector<6x82xf32>,
    %c0_60 = arith.constant 0 : index
    %c204 = arith.constant 204 : index
    %58 = vector.load %arg12[%c0_60, %c204] : memref<6x392xf32, #tpu.memory_space<vmem>>, vector<6x82xf32>
    %c136 = arith.constant 136 : index
    %c0_61 = arith.constant 0 : index
    %59 = vector.load %arg13[%c136, %c0_61] : memref<200x328xf32, #tpu.memory_space<vmem>>, vector<6x82xf32>
    tpu.vector_store %arg13[%c136, %c0_61], %58 {strides = array<i32>} : memref<200x328xf32, #tpu.memory_space<vmem>>, vector<6x82xf32>,
    %c0_62 = arith.constant 0 : index
    %c302 = arith.constant 302 : index
    %60 = vector.load %arg12[%c0_62, %c302] : memref<6x392xf32, #tpu.memory_space<vmem>>, vector<6x82xf32>
    %c144 = arith.constant 144 : index
    %c0_63 = arith.constant 0 : index
    %61 = vector.load %arg13[%c144, %c0_63] : memref<200x328xf32, #tpu.memory_space<vmem>>, vector<6x82xf32>
    tpu.vector_store %arg13[%c144, %c0_63], %60 {strides = array<i32>} : memref<200x328xf32, #tpu.memory_space<vmem>>, vector<6x82xf32>,
    %c0_64 = arith.constant 0 : index
    %c205 = arith.constant 205 : index
    %62 = vector.load %arg12[%c0_64, %c205] : memref<6x392xf32, #tpu.memory_space<vmem>>, vector<6x82xf32>
    %c152 = arith.constant 152 : index
    %c0_65 = arith.constant 0 : index
    %63 = vector.load %arg13[%c152, %c0_65] : memref<200x328xf32, #tpu.memory_space<vmem>>, vector<6x82xf32>
    tpu.vector_store %arg13[%c152, %c0_65], %62 {strides = array<i32>} : memref<200x328xf32, #tpu.memory_space<vmem>>, vector<6x82xf32>,
    %c0_66 = arith.constant 0 : index
    %c14 = arith.constant 14 : index
    %64 = vector.load %arg12[%c0_66, %c14] : memref<6x392xf32, #tpu.memory_space<vmem>>, vector<6x82xf32>
    %c160 = arith.constant 160 : index
    %c0_67 = arith.constant 0 : index
    %65 = vector.load %arg13[%c160, %c0_67] : memref<200x328xf32, #tpu.memory_space<vmem>>, vector<6x82xf32>
    tpu.vector_store %arg13[%c160, %c0_67], %64 {strides = array<i32>} : memref<200x328xf32, #tpu.memory_space<vmem>>, vector<6x82xf32>,
    %c0_68 = arith.constant 0 : index
    %c112_69 = arith.constant 112 : index
    %66 = vector.load %arg12[%c0_68, %c112_69] : memref<6x392xf32, #tpu.memory_space<vmem>>, vector<6x82xf32>
    %c168 = arith.constant 168 : index
    %c0_70 = arith.constant 0 : index
    %67 = vector.load %arg13[%c168, %c0_70] : memref<200x328xf32, #tpu.memory_space<vmem>>, vector<6x82xf32>
    tpu.vector_store %arg13[%c168, %c0_70], %66 {strides = array<i32>} : memref<200x328xf32, #tpu.memory_space<vmem>>, vector<6x82xf32>,
    %c0_71 = arith.constant 0 : index
    %c15 = arith.constant 15 : index
    %68 = vector.load %arg12[%c0_71, %c15] : memref<6x392xf32, #tpu.memory_space<vmem>>, vector<6x82xf32>
    %c176 = arith.constant 176 : index
    %c0_72 = arith.constant 0 : index
    %69 = vector.load %arg13[%c176, %c0_72] : memref<200x328xf32, #tpu.memory_space<vmem>>, vector<6x82xf32>
    tpu.vector_store %arg13[%c176, %c0_72], %68 {strides = array<i32>} : memref<200x328xf32, #tpu.memory_space<vmem>>, vector<6x82xf32>,
    %c0_73 = arith.constant 0 : index
    %c113 = arith.constant 113 : index
    %70 = vector.load %arg12[%c0_73, %c113] : memref<6x392xf32, #tpu.memory_space<vmem>>, vector<6x82xf32>
    %c184 = arith.constant 184 : index
    %c0_74 = arith.constant 0 : index
    %71 = vector.load %arg13[%c184, %c0_74] : memref<200x328xf32, #tpu.memory_space<vmem>>, vector<6x82xf32>
    tpu.vector_store %arg13[%c184, %c0_74], %70 {strides = array<i32>} : memref<200x328xf32, #tpu.memory_space<vmem>>, vector<6x82xf32>,
    %c0_75 = arith.constant 0 : index
    %c16_76 = arith.constant 16 : index
    %72 = vector.load %arg12[%c0_75, %c16_76] : memref<6x392xf32, #tpu.memory_space<vmem>>, vector<6x82xf32>
    %c192 = arith.constant 192 : index
    %c0_77 = arith.constant 0 : index
    %73 = vector.load %arg13[%c192, %c0_77] : memref<200x328xf32, #tpu.memory_space<vmem>>, vector<6x82xf32>
    tpu.vector_store %arg13[%c192, %c0_77], %72 {strides = array<i32>} : memref<200x328xf32, #tpu.memory_space<vmem>>, vector<6x82xf32>,
    %c0_78 = arith.constant 0 : index
    %c98_79 = arith.constant 98 : index
    %74 = vector.load %arg12[%c0_78, %c98_79] : memref<6x392xf32, #tpu.memory_space<vmem>>, vector<6x82xf32>
    %c0_80 = arith.constant 0 : index
    %c82 = arith.constant 82 : index
    %75 = vector.load %arg13[%c0_80, %c82] : memref<200x328xf32, #tpu.memory_space<vmem>>, vector<6x82xf32>
    tpu.vector_store %arg13[%c0_80, %c82], %74 {strides = array<i32>} : memref<200x328xf32, #tpu.memory_space<vmem>>, vector<6x82xf32>,
    %c0_81 = arith.constant 0 : index
    %c1_82 = arith.constant 1 : index
    %76 = vector.load %arg12[%c0_81, %c1_82] : memref<6x392xf32, #tpu.memory_space<vmem>>, vector<6x82xf32>
    %c8_83 = arith.constant 8 : index
    %c82_84 = arith.constant 82 : index
    %77 = vector.load %arg13[%c8_83, %c82_84] : memref<200x328xf32, #tpu.memory_space<vmem>>, vector<6x82xf32>
    tpu.vector_store %arg13[%c8_83, %c82_84], %76 {strides = array<i32>} : memref<200x328xf32, #tpu.memory_space<vmem>>, vector<6x82xf32>,
    %c0_85 = arith.constant 0 : index
    %c99_86 = arith.constant 99 : index
    %78 = vector.load %arg12[%c0_85, %c99_86] : memref<6x392xf32, #tpu.memory_space<vmem>>, vector<6x82xf32>
    %c16_87 = arith.constant 16 : index
    %c82_88 = arith.constant 82 : index
    %79 = vector.load %arg13[%c16_87, %c82_88] : memref<200x328xf32, #tpu.memory_space<vmem>>, vector<6x82xf32>
    tpu.vector_store %arg13[%c16_87, %c82_88], %78 {strides = array<i32>} : memref<200x328xf32, #tpu.memory_space<vmem>>, vector<6x82xf32>,
    %c0_89 = arith.constant 0 : index
    %c2_90 = arith.constant 2 : index
    %80 = vector.load %arg12[%c0_89, %c2_90] : memref<6x392xf32, #tpu.memory_space<vmem>>, vector<6x82xf32>
    %c24_91 = arith.constant 24 : index
    %c82_92 = arith.constant 82 : index
    %81 = vector.load %arg13[%c24_91, %c82_92] : memref<200x328xf32, #tpu.memory_space<vmem>>, vector<6x82xf32>
    tpu.vector_store %arg13[%c24_91, %c82_92], %80 {strides = array<i32>} : memref<200x328xf32, #tpu.memory_space<vmem>>, vector<6x82xf32>,
    %c0_93 = arith.constant 0 : index
    %c100 = arith.constant 100 : index
    %82 = vector.load %arg12[%c0_93, %c100] : memref<6x392xf32, #tpu.memory_space<vmem>>, vector<6x82xf32>
    %c32_94 = arith.constant 32 : index
    %c82_95 = arith.constant 82 : index
    %83 = vector.load %arg13[%c32_94, %c82_95] : memref<200x328xf32, #tpu.memory_space<vmem>>, vector<6x82xf32>
    tpu.vector_store %arg13[%c32_94, %c82_95], %82 {strides = array<i32>} : memref<200x328xf32, #tpu.memory_space<vmem>>, vector<6x82xf32>,
    %c0_96 = arith.constant 0 : index
    %c294_97 = arith.constant 294 : index
    %84 = vector.load %arg12[%c0_96, %c294_97] : memref<6x392xf32, #tpu.memory_space<vmem>>, vector<6x82xf32>
    %c40_98 = arith.constant 40 : index
    %c82_99 = arith.constant 82 : index
    %85 = vector.load %arg13[%c40_98, %c82_99] : memref<200x328xf32, #tpu.memory_space<vmem>>, vector<6x82xf32>
    tpu.vector_store %arg13[%c40_98, %c82_99], %84 {strides = array<i32>} : memref<200x328xf32, #tpu.memory_space<vmem>>, vector<6x82xf32>,
    %c0_100 = arith.constant 0 : index
    %c197_101 = arith.constant 197 : index
    %86 = vector.load %arg12[%c0_100, %c197_101] : memref<6x392xf32, #tpu.memory_space<vmem>>, vector<6x82xf32>
    %c48_102 = arith.constant 48 : index
    %c82_103 = arith.constant 82 : index
    %87 = vector.load %arg13[%c48_102, %c82_103] : memref<200x328xf32, #tpu.memory_space<vmem>>, vector<6x82xf32>
    tpu.vector_store %arg13[%c48_102, %c82_103], %86 {strides = array<i32>} : memref<200x328xf32, #tpu.memory_space<vmem>>, vector<6x82xf32>,
    %c0_104 = arith.constant 0 : index
    %c295_105 = arith.constant 295 : index
    %88 = vector.load %arg12[%c0_104, %c295_105] : memref<6x392xf32, #tpu.memory_space<vmem>>, vector<6x82xf32>
    %c56_106 = arith.constant 56 : index
    %c82_107 = arith.constant 82 : index
    %89 = vector.load %arg13[%c56_106, %c82_107] : memref<200x328xf32, #tpu.memory_space<vmem>>, vector<6x82xf32>
    tpu.vector_store %arg13[%c56_106, %c82_107], %88 {strides = array<i32>} : memref<200x328xf32, #tpu.memory_space<vmem>>, vector<6x82xf32>,
    %c0_108 = arith.constant 0 : index
    %c198_109 = arith.constant 198 : index
    %90 = vector.load %arg12[%c0_108, %c198_109] : memref<6x392xf32, #tpu.memory_space<vmem>>, vector<6x82xf32>
    %c64_110 = arith.constant 64 : index
    %c82_111 = arith.constant 82 : index
    %91 = vector.load %arg13[%c64_110, %c82_111] : memref<200x328xf32, #tpu.memory_space<vmem>>, vector<6x82xf32>
    tpu.vector_store %arg13[%c64_110, %c82_111], %90 {strides = array<i32>} : memref<200x328xf32, #tpu.memory_space<vmem>>, vector<6x82xf32>,
    %c0_112 = arith.constant 0 : index
    %c296 = arith.constant 296 : index
    %92 = vector.load %arg12[%c0_112, %c296] : memref<6x392xf32, #tpu.memory_space<vmem>>, vector<6x82xf32>
    %c72_113 = arith.constant 72 : index
    %c82_114 = arith.constant 82 : index
    %93 = vector.load %arg13[%c72_113, %c82_114] : memref<200x328xf32, #tpu.memory_space<vmem>>, vector<6x82xf32>
    tpu.vector_store %arg13[%c72_113, %c82_114], %92 {strides = array<i32>} : memref<200x328xf32, #tpu.memory_space<vmem>>, vector<6x82xf32>,
    %c0_115 = arith.constant 0 : index
    %c105_116 = arith.constant 105 : index
    %94 = vector.load %arg12[%c0_115, %c105_116] : memref<6x392xf32, #tpu.memory_space<vmem>>, vector<6x82xf32>
    %c80_117 = arith.constant 80 : index
    %c82_118 = arith.constant 82 : index
    %95 = vector.load %arg13[%c80_117, %c82_118] : memref<200x328xf32, #tpu.memory_space<vmem>>, vector<6x82xf32>
    tpu.vector_store %arg13[%c80_117, %c82_118], %94 {strides = array<i32>} : memref<200x328xf32, #tpu.memory_space<vmem>>, vector<6x82xf32>,
    %c0_119 = arith.constant 0 : index
    %c8_120 = arith.constant 8 : index
    %96 = vector.load %arg12[%c0_119, %c8_120] : memref<6x392xf32, #tpu.memory_space<vmem>>, vector<6x82xf32>
    %c88_121 = arith.constant 88 : index
    %c82_122 = arith.constant 82 : index
    %97 = vector.load %arg13[%c88_121, %c82_122] : memref<200x328xf32, #tpu.memory_space<vmem>>, vector<6x82xf32>
    tpu.vector_store %arg13[%c88_121, %c82_122], %96 {strides = array<i32>} : memref<200x328xf32, #tpu.memory_space<vmem>>, vector<6x82xf32>,
    %c0_123 = arith.constant 0 : index
    %c106_124 = arith.constant 106 : index
    %98 = vector.load %arg12[%c0_123, %c106_124] : memref<6x392xf32, #tpu.memory_space<vmem>>, vector<6x82xf32>
    %c96_125 = arith.constant 96 : index
    %c82_126 = arith.constant 82 : index
    %99 = vector.load %arg13[%c96_125, %c82_126] : memref<200x328xf32, #tpu.memory_space<vmem>>, vector<6x82xf32>
    tpu.vector_store %arg13[%c96_125, %c82_126], %98 {strides = array<i32>} : memref<200x328xf32, #tpu.memory_space<vmem>>, vector<6x82xf32>,
    %c0_127 = arith.constant 0 : index
    %c9_128 = arith.constant 9 : index
    %100 = vector.load %arg12[%c0_127, %c9_128] : memref<6x392xf32, #tpu.memory_space<vmem>>, vector<6x82xf32>
    %c104_129 = arith.constant 104 : index
    %c82_130 = arith.constant 82 : index
    %101 = vector.load %arg13[%c104_129, %c82_130] : memref<200x328xf32, #tpu.memory_space<vmem>>, vector<6x82xf32>
    tpu.vector_store %arg13[%c104_129, %c82_130], %100 {strides = array<i32>} : memref<200x328xf32, #tpu.memory_space<vmem>>, vector<6x82xf32>,
    %c0_131 = arith.constant 0 : index
    %c107 = arith.constant 107 : index
    %102 = vector.load %arg12[%c0_131, %c107] : memref<6x392xf32, #tpu.memory_space<vmem>>, vector<6x82xf32>
    %c112_132 = arith.constant 112 : index
    %c82_133 = arith.constant 82 : index
    %103 = vector.load %arg13[%c112_132, %c82_133] : memref<200x328xf32, #tpu.memory_space<vmem>>, vector<6x82xf32>
    tpu.vector_store %arg13[%c112_132, %c82_133], %102 {strides = array<i32>} : memref<200x328xf32, #tpu.memory_space<vmem>>, vector<6x82xf32>,
    %c0_134 = arith.constant 0 : index
    %c301_135 = arith.constant 301 : index
    %104 = vector.load %arg12[%c0_134, %c301_135] : memref<6x392xf32, #tpu.memory_space<vmem>>, vector<6x82xf32>
    %c120_136 = arith.constant 120 : index
    %c82_137 = arith.constant 82 : index
    %105 = vector.load %arg13[%c120_136, %c82_137] : memref<200x328xf32, #tpu.memory_space<vmem>>, vector<6x82xf32>
    tpu.vector_store %arg13[%c120_136, %c82_137], %104 {strides = array<i32>} : memref<200x328xf32, #tpu.memory_space<vmem>>, vector<6x82xf32>,
    %c0_138 = arith.constant 0 : index
    %c204_139 = arith.constant 204 : index
    %106 = vector.load %arg12[%c0_138, %c204_139] : memref<6x392xf32, #tpu.memory_space<vmem>>, vector<6x82xf32>
    %c128_140 = arith.constant 128 : index
    %c82_141 = arith.constant 82 : index
    %107 = vector.load %arg13[%c128_140, %c82_141] : memref<200x328xf32, #tpu.memory_space<vmem>>, vector<6x82xf32>
    tpu.vector_store %arg13[%c128_140, %c82_141], %106 {strides = array<i32>} : memref<200x328xf32, #tpu.memory_space<vmem>>, vector<6x82xf32>,
    %c0_142 = arith.constant 0 : index
    %c302_143 = arith.constant 302 : index
    %108 = vector.load %arg12[%c0_142, %c302_143] : memref<6x392xf32, #tpu.memory_space<vmem>>, vector<6x82xf32>
    %c136_144 = arith.constant 136 : index
    %c82_145 = arith.constant 82 : index
    %109 = vector.load %arg13[%c136_144, %c82_145] : memref<200x328xf32, #tpu.memory_space<vmem>>, vector<6x82xf32>
    tpu.vector_store %arg13[%c136_144, %c82_145], %108 {strides = array<i32>} : memref<200x328xf32, #tpu.memory_space<vmem>>, vector<6x82xf32>,
    %c0_146 = arith.constant 0 : index
    %c205_147 = arith.constant 205 : index
    %110 = vector.load %arg12[%c0_146, %c205_147] : memref<6x392xf32, #tpu.memory_space<vmem>>, vector<6x82xf32>
    %c144_148 = arith.constant 144 : index
    %c82_149 = arith.constant 82 : index
    %111 = vector.load %arg13[%c144_148, %c82_149] : memref<200x328xf32, #tpu.memory_space<vmem>>, vector<6x82xf32>
    tpu.vector_store %arg13[%c144_148, %c82_149], %110 {strides = array<i32>} : memref<200x328xf32, #tpu.memory_space<vmem>>, vector<6x82xf32>,
    %c0_150 = arith.constant 0 : index
    %c303 = arith.constant 303 : index
    %112 = vector.load %arg12[%c0_150, %c303] : memref<6x392xf32, #tpu.memory_space<vmem>>, vector<6x82xf32>
    %c152_151 = arith.constant 152 : index
    %c82_152 = arith.constant 82 : index
    %113 = vector.load %arg13[%c152_151, %c82_152] : memref<200x328xf32, #tpu.memory_space<vmem>>, vector<6x82xf32>
    tpu.vector_store %arg13[%c152_151, %c82_152], %112 {strides = array<i32>} : memref<200x328xf32, #tpu.memory_space<vmem>>, vector<6x82xf32>,
    %c0_153 = arith.constant 0 : index
    %c112_154 = arith.constant 112 : index
    %114 = vector.load %arg12[%c0_153, %c112_154] : memref<6x392xf32, #tpu.memory_space<vmem>>, vector<6x82xf32>
    %c160_155 = arith.constant 160 : index
    %c82_156 = arith.constant 82 : index
    %115 = vector.load %arg13[%c160_155, %c82_156] : memref<200x328xf32, #tpu.memory_space<vmem>>, vector<6x82xf32>
    tpu.vector_store %arg13[%c160_155, %c82_156], %114 {strides = array<i32>} : memref<200x328xf32, #tpu.memory_space<vmem>>, vector<6x82xf32>,
    %c0_157 = arith.constant 0 : index
    %c15_158 = arith.constant 15 : index
    %116 = vector.load %arg12[%c0_157, %c15_158] : memref<6x392xf32, #tpu.memory_space<vmem>>, vector<6x82xf32>
    %c168_159 = arith.constant 168 : index
    %c82_160 = arith.constant 82 : index
    %117 = vector.load %arg13[%c168_159, %c82_160] : memref<200x328xf32, #tpu.memory_space<vmem>>, vector<6x82xf32>
    tpu.vector_store %arg13[%c168_159, %c82_160], %116 {strides = array<i32>} : memref<200x328xf32, #tpu.memory_space<vmem>>, vector<6x82xf32>,
    %c0_161 = arith.constant 0 : index
    %c113_162 = arith.constant 113 : index
    %118 = vector.load %arg12[%c0_161, %c113_162] : memref<6x392xf32, #tpu.memory_space<vmem>>, vector<6x82xf32>
    %c176_163 = arith.constant 176 : index
    %c82_164 = arith.constant 82 : index
    %119 = vector.load %arg13[%c176_163, %c82_164] : memref<200x328xf32, #tpu.memory_space<vmem>>, vector<6x82xf32>
    tpu.vector_store %arg13[%c176_163, %c82_164], %118 {strides = array<i32>} : memref<200x328xf32, #tpu.memory_space<vmem>>, vector<6x82xf32>,
    %c0_165 = arith.constant 0 : index
    %c16_166 = arith.constant 16 : index
    %120 = vector.load %arg12[%c0_165, %c16_166] : memref<6x392xf32, #tpu.memory_space<vmem>>, vector<6x82xf32>
    %c184_167 = arith.constant 184 : index
    %c82_168 = arith.constant 82 : index
    %121 = vector.load %arg13[%c184_167, %c82_168] : memref<200x328xf32, #tpu.memory_space<vmem>>, vector<6x82xf32>
    tpu.vector_store %arg13[%c184_167, %c82_168], %120 {strides = array<i32>} : memref<200x328xf32, #tpu.memory_space<vmem>>, vector<6x82xf32>,
    %c0_169 = arith.constant 0 : index
    %c114 = arith.constant 114 : index
    %122 = vector.load %arg12[%c0_169, %c114] : memref<6x392xf32, #tpu.memory_space<vmem>>, vector<6x82xf32>
    %c192_170 = arith.constant 192 : index
    %c82_171 = arith.constant 82 : index
    %123 = vector.load %arg13[%c192_170, %c82_171] : memref<200x328xf32, #tpu.memory_space<vmem>>, vector<6x82xf32>
    tpu.vector_store %arg13[%c192_170, %c82_171], %122 {strides = array<i32>} : memref<200x328xf32, #tpu.memory_space<vmem>>, vector<6x82xf32>,
    %c0_172 = arith.constant 0 : index
    %c196_173 = arith.constant 196 : index
    %124 = vector.load %arg12[%c0_172, %c196_173] : memref<6x392xf32, #tpu.memory_space<vmem>>, vector<6x82xf32>
    %c0_174 = arith.constant 0 : index
    %c164 = arith.constant 164 : index
    %125 = vector.load %arg13[%c0_174, %c164] : memref<200x328xf32, #tpu.memory_space<vmem>>, vector<6x82xf32>
    tpu.vector_store %arg13[%c0_174, %c164], %124 {strides = array<i32>} : memref<200x328xf32, #tpu.memory_space<vmem>>, vector<6x82xf32>,
    %c0_175 = arith.constant 0 : index
    %c294_176 = arith.constant 294 : index
    %126 = vector.load %arg12[%c0_175, %c294_176] : memref<6x392xf32, #tpu.memory_space<vmem>>, vector<6x82xf32>
    %c8_177 = arith.constant 8 : index
    %c164_178 = arith.constant 164 : index
    %127 = vector.load %arg13[%c8_177, %c164_178] : memref<200x328xf32, #tpu.memory_space<vmem>>, vector<6x82xf32>
    tpu.vector_store %arg13[%c8_177, %c164_178], %126 {strides = array<i32>} : memref<200x328xf32, #tpu.memory_space<vmem>>, vector<6x82xf32>,
    %c0_179 = arith.constant 0 : index
    %c197_180 = arith.constant 197 : index
    %128 = vector.load %arg12[%c0_179, %c197_180] : memref<6x392xf32, #tpu.memory_space<vmem>>, vector<6x82xf32>
    %c16_181 = arith.constant 16 : index
    %c164_182 = arith.constant 164 : index
    %129 = vector.load %arg13[%c16_181, %c164_182] : memref<200x328xf32, #tpu.memory_space<vmem>>, vector<6x82xf32>
    tpu.vector_store %arg13[%c16_181, %c164_182], %128 {strides = array<i32>} : memref<200x328xf32, #tpu.memory_space<vmem>>, vector<6x82xf32>,
    %c0_183 = arith.constant 0 : index
    %c295_184 = arith.constant 295 : index
    %130 = vector.load %arg12[%c0_183, %c295_184] : memref<6x392xf32, #tpu.memory_space<vmem>>, vector<6x82xf32>
    %c24_185 = arith.constant 24 : index
    %c164_186 = arith.constant 164 : index
    %131 = vector.load %arg13[%c24_185, %c164_186] : memref<200x328xf32, #tpu.memory_space<vmem>>, vector<6x82xf32>
    tpu.vector_store %arg13[%c24_185, %c164_186], %130 {strides = array<i32>} : memref<200x328xf32, #tpu.memory_space<vmem>>, vector<6x82xf32>,
    %c0_187 = arith.constant 0 : index
    %c198_188 = arith.constant 198 : index
    %132 = vector.load %arg12[%c0_187, %c198_188] : memref<6x392xf32, #tpu.memory_space<vmem>>, vector<6x82xf32>
    %c32_189 = arith.constant 32 : index
    %c164_190 = arith.constant 164 : index
    %133 = vector.load %arg13[%c32_189, %c164_190] : memref<200x328xf32, #tpu.memory_space<vmem>>, vector<6x82xf32>
    tpu.vector_store %arg13[%c32_189, %c164_190], %132 {strides = array<i32>} : memref<200x328xf32, #tpu.memory_space<vmem>>, vector<6x82xf32>,
    %c0_191 = arith.constant 0 : index
    %c7_192 = arith.constant 7 : index
    %134 = vector.load %arg12[%c0_191, %c7_192] : memref<6x392xf32, #tpu.memory_space<vmem>>, vector<6x82xf32>
    %c40_193 = arith.constant 40 : index
    %c164_194 = arith.constant 164 : index
    %135 = vector.load %arg13[%c40_193, %c164_194] : memref<200x328xf32, #tpu.memory_space<vmem>>, vector<6x82xf32>
    tpu.vector_store %arg13[%c40_193, %c164_194], %134 {strides = array<i32>} : memref<200x328xf32, #tpu.memory_space<vmem>>, vector<6x82xf32>,
    %c0_195 = arith.constant 0 : index
    %c105_196 = arith.constant 105 : index
    %136 = vector.load %arg12[%c0_195, %c105_196] : memref<6x392xf32, #tpu.memory_space<vmem>>, vector<6x82xf32>
    %c48_197 = arith.constant 48 : index
    %c164_198 = arith.constant 164 : index
    %137 = vector.load %arg13[%c48_197, %c164_198] : memref<200x328xf32, #tpu.memory_space<vmem>>, vector<6x82xf32>
    tpu.vector_store %arg13[%c48_197, %c164_198], %136 {strides = array<i32>} : memref<200x328xf32, #tpu.memory_space<vmem>>, vector<6x82xf32>,
    %c0_199 = arith.constant 0 : index
    %c8_200 = arith.constant 8 : index
    %138 = vector.load %arg12[%c0_199, %c8_200] : memref<6x392xf32, #tpu.memory_space<vmem>>, vector<6x82xf32>
    %c56_201 = arith.constant 56 : index
    %c164_202 = arith.constant 164 : index
    %139 = vector.load %arg13[%c56_201, %c164_202] : memref<200x328xf32, #tpu.memory_space<vmem>>, vector<6x82xf32>
    tpu.vector_store %arg13[%c56_201, %c164_202], %138 {strides = array<i32>} : memref<200x328xf32, #tpu.memory_space<vmem>>, vector<6x82xf32>,
    %c0_203 = arith.constant 0 : index
    %c106_204 = arith.constant 106 : index
    %140 = vector.load %arg12[%c0_203, %c106_204] : memref<6x392xf32, #tpu.memory_space<vmem>>, vector<6x82xf32>
    %c64_205 = arith.constant 64 : index
    %c164_206 = arith.constant 164 : index
    %141 = vector.load %arg13[%c64_205, %c164_206] : memref<200x328xf32, #tpu.memory_space<vmem>>, vector<6x82xf32>
    tpu.vector_store %arg13[%c64_205, %c164_206], %140 {strides = array<i32>} : memref<200x328xf32, #tpu.memory_space<vmem>>, vector<6x82xf32>,
    %c0_207 = arith.constant 0 : index
    %c9_208 = arith.constant 9 : index
    %142 = vector.load %arg12[%c0_207, %c9_208] : memref<6x392xf32, #tpu.memory_space<vmem>>, vector<6x82xf32>
    %c72_209 = arith.constant 72 : index
    %c164_210 = arith.constant 164 : index
    %143 = vector.load %arg13[%c72_209, %c164_210] : memref<200x328xf32, #tpu.memory_space<vmem>>, vector<6x82xf32>
    tpu.vector_store %arg13[%c72_209, %c164_210], %142 {strides = array<i32>} : memref<200x328xf32, #tpu.memory_space<vmem>>, vector<6x82xf32>,
    %c0_211 = arith.constant 0 : index
    %c203_212 = arith.constant 203 : index
    %144 = vector.load %arg12[%c0_211, %c203_212] : memref<6x392xf32, #tpu.memory_space<vmem>>, vector<6x82xf32>
    %c80_213 = arith.constant 80 : index
    %c164_214 = arith.constant 164 : index
    %145 = vector.load %arg13[%c80_213, %c164_214] : memref<200x328xf32, #tpu.memory_space<vmem>>, vector<6x82xf32>
    tpu.vector_store %arg13[%c80_213, %c164_214], %144 {strides = array<i32>} : memref<200x328xf32, #tpu.memory_space<vmem>>, vector<6x82xf32>,
    %c0_215 = arith.constant 0 : index
    %c301_216 = arith.constant 301 : index
    %146 = vector.load %arg12[%c0_215, %c301_216] : memref<6x392xf32, #tpu.memory_space<vmem>>, vector<6x82xf32>
    %c88_217 = arith.constant 88 : index
    %c164_218 = arith.constant 164 : index
    %147 = vector.load %arg13[%c88_217, %c164_218] : memref<200x328xf32, #tpu.memory_space<vmem>>, vector<6x82xf32>
    tpu.vector_store %arg13[%c88_217, %c164_218], %146 {strides = array<i32>} : memref<200x328xf32, #tpu.memory_space<vmem>>, vector<6x82xf32>,
    %c0_219 = arith.constant 0 : index
    %c204_220 = arith.constant 204 : index
    %148 = vector.load %arg12[%c0_219, %c204_220] : memref<6x392xf32, #tpu.memory_space<vmem>>, vector<6x82xf32>
    %c96_221 = arith.constant 96 : index
    %c164_222 = arith.constant 164 : index
    %149 = vector.load %arg13[%c96_221, %c164_222] : memref<200x328xf32, #tpu.memory_space<vmem>>, vector<6x82xf32>
    tpu.vector_store %arg13[%c96_221, %c164_222], %148 {strides = array<i32>} : memref<200x328xf32, #tpu.memory_space<vmem>>, vector<6x82xf32>,
    %c0_223 = arith.constant 0 : index
    %c302_224 = arith.constant 302 : index
    %150 = vector.load %arg12[%c0_223, %c302_224] : memref<6x392xf32, #tpu.memory_space<vmem>>, vector<6x82xf32>
    %c104_225 = arith.constant 104 : index
    %c164_226 = arith.constant 164 : index
    %151 = vector.load %arg13[%c104_225, %c164_226] : memref<200x328xf32, #tpu.memory_space<vmem>>, vector<6x82xf32>
    tpu.vector_store %arg13[%c104_225, %c164_226], %150 {strides = array<i32>} : memref<200x328xf32, #tpu.memory_space<vmem>>, vector<6x82xf32>,
    %c0_227 = arith.constant 0 : index
    %c205_228 = arith.constant 205 : index
    %152 = vector.load %arg12[%c0_227, %c205_228] : memref<6x392xf32, #tpu.memory_space<vmem>>, vector<6x82xf32>
    %c112_229 = arith.constant 112 : index
    %c164_230 = arith.constant 164 : index
    %153 = vector.load %arg13[%c112_229, %c164_230] : memref<200x328xf32, #tpu.memory_space<vmem>>, vector<6x82xf32>
    tpu.vector_store %arg13[%c112_229, %c164_230], %152 {strides = array<i32>} : memref<200x328xf32, #tpu.memory_space<vmem>>, vector<6x82xf32>,
    %c0_231 = arith.constant 0 : index
    %c14_232 = arith.constant 14 : index
    %154 = vector.load %arg12[%c0_231, %c14_232] : memref<6x392xf32, #tpu.memory_space<vmem>>, vector<6x82xf32>
    %c120_233 = arith.constant 120 : index
    %c164_234 = arith.constant 164 : index
    %155 = vector.load %arg13[%c120_233, %c164_234] : memref<200x328xf32, #tpu.memory_space<vmem>>, vector<6x82xf32>
    tpu.vector_store %arg13[%c120_233, %c164_234], %154 {strides = array<i32>} : memref<200x328xf32, #tpu.memory_space<vmem>>, vector<6x82xf32>,
    %c0_235 = arith.constant 0 : index
    %c112_236 = arith.constant 112 : index
    %156 = vector.load %arg12[%c0_235, %c112_236] : memref<6x392xf32, #tpu.memory_space<vmem>>, vector<6x82xf32>
    %c128_237 = arith.constant 128 : index
    %c164_238 = arith.constant 164 : index
    %157 = vector.load %arg13[%c128_237, %c164_238] : memref<200x328xf32, #tpu.memory_space<vmem>>, vector<6x82xf32>
    tpu.vector_store %arg13[%c128_237, %c164_238], %156 {strides = array<i32>} : memref<200x328xf32, #tpu.memory_space<vmem>>, vector<6x82xf32>,
    %c0_239 = arith.constant 0 : index
    %c15_240 = arith.constant 15 : index
    %158 = vector.load %arg12[%c0_239, %c15_240] : memref<6x392xf32, #tpu.memory_space<vmem>>, vector<6x82xf32>
    %c136_241 = arith.constant 136 : index
    %c164_242 = arith.constant 164 : index
    %159 = vector.load %arg13[%c136_241, %c164_242] : memref<200x328xf32, #tpu.memory_space<vmem>>, vector<6x82xf32>
    tpu.vector_store %arg13[%c136_241, %c164_242], %158 {strides = array<i32>} : memref<200x328xf32, #tpu.memory_space<vmem>>, vector<6x82xf32>,
    %c0_243 = arith.constant 0 : index
    %c113_244 = arith.constant 113 : index
    %160 = vector.load %arg12[%c0_243, %c113_244] : memref<6x392xf32, #tpu.memory_space<vmem>>, vector<6x82xf32>
    %c144_245 = arith.constant 144 : index
    %c164_246 = arith.constant 164 : index
    %161 = vector.load %arg13[%c144_245, %c164_246] : memref<200x328xf32, #tpu.memory_space<vmem>>, vector<6x82xf32>
    tpu.vector_store %arg13[%c144_245, %c164_246], %160 {strides = array<i32>} : memref<200x328xf32, #tpu.memory_space<vmem>>, vector<6x82xf32>,
    %c0_247 = arith.constant 0 : index
    %c16_248 = arith.constant 16 : index
    %162 = vector.load %arg12[%c0_247, %c16_248] : memref<6x392xf32, #tpu.memory_space<vmem>>, vector<6x82xf32>
    %c152_249 = arith.constant 152 : index
    %c164_250 = arith.constant 164 : index
    %163 = vector.load %arg13[%c152_249, %c164_250] : memref<200x328xf32, #tpu.memory_space<vmem>>, vector<6x82xf32>
    tpu.vector_store %arg13[%c152_249, %c164_250], %162 {strides = array<i32>} : memref<200x328xf32, #tpu.memory_space<vmem>>, vector<6x82xf32>,
    %c0_251 = arith.constant 0 : index
    %c210 = arith.constant 210 : index
    %164 = vector.load %arg12[%c0_251, %c210] : memref<6x392xf32, #tpu.memory_space<vmem>>, vector<6x82xf32>
    %c160_252 = arith.constant 160 : index
    %c164_253 = arith.constant 164 : index
    %165 = vector.load %arg13[%c160_252, %c164_253] : memref<200x328xf32, #tpu.memory_space<vmem>>, vector<6x82xf32>
    tpu.vector_store %arg13[%c160_252, %c164_253], %164 {strides = array<i32>} : memref<200x328xf32, #tpu.memory_space<vmem>>, vector<6x82xf32>,
    %c0_254 = arith.constant 0 : index
    %c308 = arith.constant 308 : index
    %166 = vector.load %arg12[%c0_254, %c308] : memref<6x392xf32, #tpu.memory_space<vmem>>, vector<6x82xf32>
    %c168_255 = arith.constant 168 : index
    %c164_256 = arith.constant 164 : index
    %167 = vector.load %arg13[%c168_255, %c164_256] : memref<200x328xf32, #tpu.memory_space<vmem>>, vector<6x82xf32>
    tpu.vector_store %arg13[%c168_255, %c164_256], %166 {strides = array<i32>} : memref<200x328xf32, #tpu.memory_space<vmem>>, vector<6x82xf32>,
    %c0_257 = arith.constant 0 : index
    %c211 = arith.constant 211 : index
    %168 = vector.load %arg12[%c0_257, %c211] : memref<6x392xf32, #tpu.memory_space<vmem>>, vector<6x82xf32>
    %c176_258 = arith.constant 176 : index
    %c164_259 = arith.constant 164 : index
    %169 = vector.load %arg13[%c176_258, %c164_259] : memref<200x328xf32, #tpu.memory_space<vmem>>, vector<6x82xf32>
    tpu.vector_store %arg13[%c176_258, %c164_259], %168 {strides = array<i32>} : memref<200x328xf32, #tpu.memory_space<vmem>>, vector<6x82xf32>,
    %c0_260 = arith.constant 0 : index
    %c309 = arith.constant 309 : index
    %170 = vector.load %arg12[%c0_260, %c309] : memref<6x392xf32, #tpu.memory_space<vmem>>, vector<6x82xf32>
    %c184_261 = arith.constant 184 : index
    %c164_262 = arith.constant 164 : index
    %171 = vector.load %arg13[%c184_261, %c164_262] : memref<200x328xf32, #tpu.memory_space<vmem>>, vector<6x82xf32>
    tpu.vector_store %arg13[%c184_261, %c164_262], %170 {strides = array<i32>} : memref<200x328xf32, #tpu.memory_space<vmem>>, vector<6x82xf32>,
    %c0_263 = arith.constant 0 : index
    %c212 = arith.constant 212 : index
    %172 = vector.load %arg12[%c0_263, %c212] : memref<6x392xf32, #tpu.memory_space<vmem>>, vector<6x82xf32>
    %c192_264 = arith.constant 192 : index
    %c164_265 = arith.constant 164 : index
    %173 = vector.load %arg13[%c192_264, %c164_265] : memref<200x328xf32, #tpu.memory_space<vmem>>, vector<6x82xf32>
    tpu.vector_store %arg13[%c192_264, %c164_265], %172 {strides = array<i32>} : memref<200x328xf32, #tpu.memory_space<vmem>>, vector<6x82xf32>,
    %c0_266 = arith.constant 0 : index
    %c294_267 = arith.constant 294 : index
    %174 = vector.load %arg12[%c0_266, %c294_267] : memref<6x392xf32, #tpu.memory_space<vmem>>, vector<6x82xf32>
    %c0_268 = arith.constant 0 : index
    %c246 = arith.constant 246 : index
    %175 = vector.load %arg13[%c0_268, %c246] : memref<200x328xf32, #tpu.memory_space<vmem>>, vector<6x82xf32>
    tpu.vector_store %arg13[%c0_268, %c246], %174 {strides = array<i32>} : memref<200x328xf32, #tpu.memory_space<vmem>>, vector<6x82xf32>,
    %c0_269 = arith.constant 0 : index
    %c197_270 = arith.constant 197 : index
    %176 = vector.load %arg12[%c0_269, %c197_270] : memref<6x392xf32, #tpu.memory_space<vmem>>, vector<6x82xf32>
    %c8_271 = arith.constant 8 : index
    %c246_272 = arith.constant 246 : index
    %177 = vector.load %arg13[%c8_271, %c246_272] : memref<200x328xf32, #tpu.memory_space<vmem>>, vector<6x82xf32>
    tpu.vector_store %arg13[%c8_271, %c246_272], %176 {strides = array<i32>} : memref<200x328xf32, #tpu.memory_space<vmem>>, vector<6x82xf32>,
    %c0_273 = arith.constant 0 : index
    %c295_274 = arith.constant 295 : index
    %178 = vector.load %arg12[%c0_273, %c295_274] : memref<6x392xf32, #tpu.memory_space<vmem>>, vector<6x82xf32>
    %c16_275 = arith.constant 16 : index
    %c246_276 = arith.constant 246 : index
    %179 = vector.load %arg13[%c16_275, %c246_276] : memref<200x328xf32, #tpu.memory_space<vmem>>, vector<6x82xf32>
    tpu.vector_store %arg13[%c16_275, %c246_276], %178 {strides = array<i32>} : memref<200x328xf32, #tpu.memory_space<vmem>>, vector<6x82xf32>,
    %c0_277 = arith.constant 0 : index
    %c198_278 = arith.constant 198 : index
    %180 = vector.load %arg12[%c0_277, %c198_278] : memref<6x392xf32, #tpu.memory_space<vmem>>, vector<6x82xf32>
    %c24_279 = arith.constant 24 : index
    %c246_280 = arith.constant 246 : index
    %181 = vector.load %arg13[%c24_279, %c246_280] : memref<200x328xf32, #tpu.memory_space<vmem>>, vector<6x82xf32>
    tpu.vector_store %arg13[%c24_279, %c246_280], %180 {strides = array<i32>} : memref<200x328xf32, #tpu.memory_space<vmem>>, vector<6x82xf32>,
    %c0_281 = arith.constant 0 : index
    %c296_282 = arith.constant 296 : index
    %182 = vector.load %arg12[%c0_281, %c296_282] : memref<6x392xf32, #tpu.memory_space<vmem>>, vector<6x82xf32>
    %c32_283 = arith.constant 32 : index
    %c246_284 = arith.constant 246 : index
    %183 = vector.load %arg13[%c32_283, %c246_284] : memref<200x328xf32, #tpu.memory_space<vmem>>, vector<6x82xf32>
    tpu.vector_store %arg13[%c32_283, %c246_284], %182 {strides = array<i32>} : memref<200x328xf32, #tpu.memory_space<vmem>>, vector<6x82xf32>,
    %c0_285 = arith.constant 0 : index
    %c105_286 = arith.constant 105 : index
    %184 = vector.load %arg12[%c0_285, %c105_286] : memref<6x392xf32, #tpu.memory_space<vmem>>, vector<6x82xf32>
    %c40_287 = arith.constant 40 : index
    %c246_288 = arith.constant 246 : index
    %185 = vector.load %arg13[%c40_287, %c246_288] : memref<200x328xf32, #tpu.memory_space<vmem>>, vector<6x82xf32>
    tpu.vector_store %arg13[%c40_287, %c246_288], %184 {strides = array<i32>} : memref<200x328xf32, #tpu.memory_space<vmem>>, vector<6x82xf32>,
    %c0_289 = arith.constant 0 : index
    %c8_290 = arith.constant 8 : index
    %186 = vector.load %arg12[%c0_289, %c8_290] : memref<6x392xf32, #tpu.memory_space<vmem>>, vector<6x82xf32>
    %c48_291 = arith.constant 48 : index
    %c246_292 = arith.constant 246 : index
    %187 = vector.load %arg13[%c48_291, %c246_292] : memref<200x328xf32, #tpu.memory_space<vmem>>, vector<6x82xf32>
    tpu.vector_store %arg13[%c48_291, %c246_292], %186 {strides = array<i32>} : memref<200x328xf32, #tpu.memory_space<vmem>>, vector<6x82xf32>,
    %c0_293 = arith.constant 0 : index
    %c106_294 = arith.constant 106 : index
    %188 = vector.load %arg12[%c0_293, %c106_294] : memref<6x392xf32, #tpu.memory_space<vmem>>, vector<6x82xf32>
    %c56_295 = arith.constant 56 : index
    %c246_296 = arith.constant 246 : index
    %189 = vector.load %arg13[%c56_295, %c246_296] : memref<200x328xf32, #tpu.memory_space<vmem>>, vector<6x82xf32>
    tpu.vector_store %arg13[%c56_295, %c246_296], %188 {strides = array<i32>} : memref<200x328xf32, #tpu.memory_space<vmem>>, vector<6x82xf32>,
    %c0_297 = arith.constant 0 : index
    %c9_298 = arith.constant 9 : index
    %190 = vector.load %arg12[%c0_297, %c9_298] : memref<6x392xf32, #tpu.memory_space<vmem>>, vector<6x82xf32>
    %c64_299 = arith.constant 64 : index
    %c246_300 = arith.constant 246 : index
    %191 = vector.load %arg13[%c64_299, %c246_300] : memref<200x328xf32, #tpu.memory_space<vmem>>, vector<6x82xf32>
    tpu.vector_store %arg13[%c64_299, %c246_300], %190 {strides = array<i32>} : memref<200x328xf32, #tpu.memory_space<vmem>>, vector<6x82xf32>,
    %c0_301 = arith.constant 0 : index
    %c107_302 = arith.constant 107 : index
    %192 = vector.load %arg12[%c0_301, %c107_302] : memref<6x392xf32, #tpu.memory_space<vmem>>, vector<6x82xf32>
    %c72_303 = arith.constant 72 : index
    %c246_304 = arith.constant 246 : index
    %193 = vector.load %arg13[%c72_303, %c246_304] : memref<200x328xf32, #tpu.memory_space<vmem>>, vector<6x82xf32>
    tpu.vector_store %arg13[%c72_303, %c246_304], %192 {strides = array<i32>} : memref<200x328xf32, #tpu.memory_space<vmem>>, vector<6x82xf32>,
    %c0_305 = arith.constant 0 : index
    %c301_306 = arith.constant 301 : index
    %194 = vector.load %arg12[%c0_305, %c301_306] : memref<6x392xf32, #tpu.memory_space<vmem>>, vector<6x82xf32>
    %c80_307 = arith.constant 80 : index
    %c246_308 = arith.constant 246 : index
    %195 = vector.load %arg13[%c80_307, %c246_308] : memref<200x328xf32, #tpu.memory_space<vmem>>, vector<6x82xf32>
    tpu.vector_store %arg13[%c80_307, %c246_308], %194 {strides = array<i32>} : memref<200x328xf32, #tpu.memory_space<vmem>>, vector<6x82xf32>,
    %c0_309 = arith.constant 0 : index
    %c204_310 = arith.constant 204 : index
    %196 = vector.load %arg12[%c0_309, %c204_310] : memref<6x392xf32, #tpu.memory_space<vmem>>, vector<6x82xf32>
    %c88_311 = arith.constant 88 : index
    %c246_312 = arith.constant 246 : index
    %197 = vector.load %arg13[%c88_311, %c246_312] : memref<200x328xf32, #tpu.memory_space<vmem>>, vector<6x82xf32>
    tpu.vector_store %arg13[%c88_311, %c246_312], %196 {strides = array<i32>} : memref<200x328xf32, #tpu.memory_space<vmem>>, vector<6x82xf32>,
    %c0_313 = arith.constant 0 : index
    %c302_314 = arith.constant 302 : index
    %198 = vector.load %arg12[%c0_313, %c302_314] : memref<6x392xf32, #tpu.memory_space<vmem>>, vector<6x82xf32>
    %c96_315 = arith.constant 96 : index
    %c246_316 = arith.constant 246 : index
    %199 = vector.load %arg13[%c96_315, %c246_316] : memref<200x328xf32, #tpu.memory_space<vmem>>, vector<6x82xf32>
    tpu.vector_store %arg13[%c96_315, %c246_316], %198 {strides = array<i32>} : memref<200x328xf32, #tpu.memory_space<vmem>>, vector<6x82xf32>,
    %c0_317 = arith.constant 0 : index
    %c205_318 = arith.constant 205 : index
    %200 = vector.load %arg12[%c0_317, %c205_318] : memref<6x392xf32, #tpu.memory_space<vmem>>, vector<6x82xf32>
    %c104_319 = arith.constant 104 : index
    %c246_320 = arith.constant 246 : index
    %201 = vector.load %arg13[%c104_319, %c246_320] : memref<200x328xf32, #tpu.memory_space<vmem>>, vector<6x82xf32>
    tpu.vector_store %arg13[%c104_319, %c246_320], %200 {strides = array<i32>} : memref<200x328xf32, #tpu.memory_space<vmem>>, vector<6x82xf32>,
    %c0_321 = arith.constant 0 : index
    %c303_322 = arith.constant 303 : index
    %202 = vector.load %arg12[%c0_321, %c303_322] : memref<6x392xf32, #tpu.memory_space<vmem>>, vector<6x82xf32>
    %c112_323 = arith.constant 112 : index
    %c246_324 = arith.constant 246 : index
    %203 = vector.load %arg13[%c112_323, %c246_324] : memref<200x328xf32, #tpu.memory_space<vmem>>, vector<6x82xf32>
    tpu.vector_store %arg13[%c112_323, %c246_324], %202 {strides = array<i32>} : memref<200x328xf32, #tpu.memory_space<vmem>>, vector<6x82xf32>,
    %c0_325 = arith.constant 0 : index
    %c112_326 = arith.constant 112 : index
    %204 = vector.load %arg12[%c0_325, %c112_326] : memref<6x392xf32, #tpu.memory_space<vmem>>, vector<6x82xf32>
    %c120_327 = arith.constant 120 : index
    %c246_328 = arith.constant 246 : index
    %205 = vector.load %arg13[%c120_327, %c246_328] : memref<200x328xf32, #tpu.memory_space<vmem>>, vector<6x82xf32>
    tpu.vector_store %arg13[%c120_327, %c246_328], %204 {strides = array<i32>} : memref<200x328xf32, #tpu.memory_space<vmem>>, vector<6x82xf32>,
    %c0_329 = arith.constant 0 : index
    %c15_330 = arith.constant 15 : index
    %206 = vector.load %arg12[%c0_329, %c15_330] : memref<6x392xf32, #tpu.memory_space<vmem>>, vector<6x82xf32>
    %c128_331 = arith.constant 128 : index
    %c246_332 = arith.constant 246 : index
    %207 = vector.load %arg13[%c128_331, %c246_332] : memref<200x328xf32, #tpu.memory_space<vmem>>, vector<6x82xf32>
    tpu.vector_store %arg13[%c128_331, %c246_332], %206 {strides = array<i32>} : memref<200x328xf32, #tpu.memory_space<vmem>>, vector<6x82xf32>,
    %c0_333 = arith.constant 0 : index
    %c113_334 = arith.constant 113 : index
    %208 = vector.load %arg12[%c0_333, %c113_334] : memref<6x392xf32, #tpu.memory_space<vmem>>, vector<6x82xf32>
    %c136_335 = arith.constant 136 : index
    %c246_336 = arith.constant 246 : index
    %209 = vector.load %arg13[%c136_335, %c246_336] : memref<200x328xf32, #tpu.memory_space<vmem>>, vector<6x82xf32>
    tpu.vector_store %arg13[%c136_335, %c246_336], %208 {strides = array<i32>} : memref<200x328xf32, #tpu.memory_space<vmem>>, vector<6x82xf32>,
    %c0_337 = arith.constant 0 : index
    %c16_338 = arith.constant 16 : index
    %210 = vector.load %arg12[%c0_337, %c16_338] : memref<6x392xf32, #tpu.memory_space<vmem>>, vector<6x82xf32>
    %c144_339 = arith.constant 144 : index
    %c246_340 = arith.constant 246 : index
    %211 = vector.load %arg13[%c144_339, %c246_340] : memref<200x328xf32, #tpu.memory_space<vmem>>, vector<6x82xf32>
    tpu.vector_store %arg13[%c144_339, %c246_340], %210 {strides = array<i32>} : memref<200x328xf32, #tpu.memory_space<vmem>>, vector<6x82xf32>,
    %c0_341 = arith.constant 0 : index
    %c114_342 = arith.constant 114 : index
    %212 = vector.load %arg12[%c0_341, %c114_342] : memref<6x392xf32, #tpu.memory_space<vmem>>, vector<6x82xf32>
    %c152_343 = arith.constant 152 : index
    %c246_344 = arith.constant 246 : index
    %213 = vector.load %arg13[%c152_343, %c246_344] : memref<200x328xf32, #tpu.memory_space<vmem>>, vector<6x82xf32>
    tpu.vector_store %arg13[%c152_343, %c246_344], %212 {strides = array<i32>} : memref<200x328xf32, #tpu.memory_space<vmem>>, vector<6x82xf32>,
    %c0_345 = arith.constant 0 : index
    %c308_346 = arith.constant 308 : index
    %214 = vector.load %arg12[%c0_345, %c308_346] : memref<6x392xf32, #tpu.memory_space<vmem>>, vector<6x82xf32>
    %c160_347 = arith.constant 160 : index
    %c246_348 = arith.constant 246 : index
    %215 = vector.load %arg13[%c160_347, %c246_348] : memref<200x328xf32, #tpu.memory_space<vmem>>, vector<6x82xf32>
    tpu.vector_store %arg13[%c160_347, %c246_348], %214 {strides = array<i32>} : memref<200x328xf32, #tpu.memory_space<vmem>>, vector<6x82xf32>,
    %c0_349 = arith.constant 0 : index
    %c211_350 = arith.constant 211 : index
    %216 = vector.load %arg12[%c0_349, %c211_350] : memref<6x392xf32, #tpu.memory_space<vmem>>, vector<6x82xf32>
    %c168_351 = arith.constant 168 : index
    %c246_352 = arith.constant 246 : index
    %217 = vector.load %arg13[%c168_351, %c246_352] : memref<200x328xf32, #tpu.memory_space<vmem>>, vector<6x82xf32>
    tpu.vector_store %arg13[%c168_351, %c246_352], %216 {strides = array<i32>} : memref<200x328xf32, #tpu.memory_space<vmem>>, vector<6x82xf32>,
    %c0_353 = arith.constant 0 : index
    %c309_354 = arith.constant 309 : index
    %218 = vector.load %arg12[%c0_353, %c309_354] : memref<6x392xf32, #tpu.memory_space<vmem>>, vector<6x82xf32>
    %c176_355 = arith.constant 176 : index
    %c246_356 = arith.constant 246 : index
    %219 = vector.load %arg13[%c176_355, %c246_356] : memref<200x328xf32, #tpu.memory_space<vmem>>, vector<6x82xf32>
    tpu.vector_store %arg13[%c176_355, %c246_356], %218 {strides = array<i32>} : memref<200x328xf32, #tpu.memory_space<vmem>>, vector<6x82xf32>,
    %c0_357 = arith.constant 0 : index
    %c212_358 = arith.constant 212 : index
    %220 = vector.load %arg12[%c0_357, %c212_358] : memref<6x392xf32, #tpu.memory_space<vmem>>, vector<6x82xf32>
    %c184_359 = arith.constant 184 : index
    %c246_360 = arith.constant 246 : index
    %221 = vector.load %arg13[%c184_359, %c246_360] : memref<200x328xf32, #tpu.memory_space<vmem>>, vector<6x82xf32>
    tpu.vector_store %arg13[%c184_359, %c246_360], %220 {strides = array<i32>} : memref<200x328xf32, #tpu.memory_space<vmem>>, vector<6x82xf32>,
    %c0_361 = arith.constant 0 : index
    %c310 = arith.constant 310 : index
    %222 = vector.load %arg12[%c0_361, %c310] : memref<6x392xf32, #tpu.memory_space<vmem>>, vector<6x82xf32>
    %c192_362 = arith.constant 192 : index
    %c246_363 = arith.constant 246 : index
    %223 = vector.load %arg13[%c192_362, %c246_363] : memref<200x328xf32, #tpu.memory_space<vmem>>, vector<6x82xf32>
    tpu.vector_store %arg13[%c192_362, %c246_363], %222 {strides = array<i32>} : memref<200x328xf32, #tpu.memory_space<vmem>>, vector<6x82xf32>,
    %c0_364 = arith.constant 0 : index
    %c0_365 = arith.constant 0 : index
    %224 = vector.load %arg3[%c0_364, %c0_365] : memref<16x200xf32, #tpu.memory_space<vmem>>, vector<16x200xf32>
    %c0_366 = arith.constant 0 : index
    %c0_367 = arith.constant 0 : index
    %225 = vector.load %arg13[%c0_366, %c0_367] : memref<200x328xf32, #tpu.memory_space<vmem>>, vector<200x328xf32>
    %cst_368 = arith.constant dense<0.000000e+00> : vector<16x328xf32>
    %226 = tpu.matmul %224, %225, %cst_368 {dimension_numbers = #tpu.dot_dimension_numbers<[1], [0], [0], [1], [0, 0, 1, 1], [], []>} : vector<16x200xf32>, vector<200x328xf32>, vector<16x328xf32> -> vector<16x328xf32>
    %c0_369 = arith.constant 0 : index
    %c0_370 = arith.constant 0 : index
    %227 = vector.load %arg14[%c0_369, %c0_370] : memref<16x328xf32, #tpu.memory_space<vmem>>, vector<16x328xf32>
    tpu.vector_store %arg14[%c0_369, %c0_370], %226 {strides = array<i32>} : memref<16x328xf32, #tpu.memory_space<vmem>>, vector<16x328xf32>,
    %c0_371 = arith.constant 0 : index
    %c0_372 = arith.constant 0 : index
    %228 = vector.load %arg14[%c0_371, %c0_372] : memref<16x328xf32, #tpu.memory_space<vmem>>, vector<16x82xf32>
    %c0_373 = arith.constant 0 : index
    %c82_374 = arith.constant 82 : index
    %229 = vector.load %arg14[%c0_373, %c82_374] : memref<16x328xf32, #tpu.memory_space<vmem>>, vector<16x82xf32>
    %230 = arith.maximumf %228, %229 : vector<16x82xf32>
    %c0_375 = arith.constant 0 : index
    %c164_376 = arith.constant 164 : index
    %231 = vector.load %arg14[%c0_375, %c164_376] : memref<16x328xf32, #tpu.memory_space<vmem>>, vector<16x82xf32>
    %232 = arith.maximumf %230, %231 : vector<16x82xf32>
    %c0_377 = arith.constant 0 : index
    %c246_378 = arith.constant 246 : index
    %233 = vector.load %arg14[%c0_377, %c246_378] : memref<16x328xf32, #tpu.memory_space<vmem>>, vector<16x82xf32>
    %234 = arith.maximumf %232, %233 : vector<16x82xf32>
    %c0_379 = arith.constant 0 : index
    %c0_380 = arith.constant 0 : index
    %235 = vector.load %arg4[%c0_379, %c0_380] : memref<16x1xf32, #tpu.memory_space<vmem>>, vector<16x1xf32>
    %236 = vector.broadcast %235 : vector<16x1xf32> to vector<16x82xf32>
    %237 = arith.addf %234, %236 : vector<16x82xf32>
    %cst_381 = arith.constant 0.000000e+00 : f32
    %238 = vector.broadcast %cst_381 : f32 to vector<16x82xf32>
    %239 = arith.maximumf %237, %238 : vector<16x82xf32>
    %c0_382 = arith.constant 0 : index
    %c0_383 = arith.constant 0 : index
    %240 = vector.load %arg15[%c0_382, %c0_383] : memref<16x82xf32, #tpu.memory_space<vmem>>, vector<16x82xf32>
    tpu.vector_store %arg15[%c0_382, %c0_383], %239 {strides = array<i32>} : memref<16x82xf32, #tpu.memory_space<vmem>>, vector<16x82xf32>,
    %c0_384 = arith.constant 0 : index
    %c0_385 = arith.constant 0 : index
    %241 = vector.load %arg15[%c0_384, %c0_385] : memref<16x82xf32, #tpu.memory_space<vmem>>, vector<1x33xf32>
    %c0_386 = arith.constant 0 : index
    %c0_387 = arith.constant 0 : index
    %242 = vector.load %arg16[%c0_386, %c0_387] : memref<2x528xf32, #tpu.memory_space<vmem>>, vector<1x33xf32>
    tpu.vector_store %arg16[%c0_386, %c0_387], %241 {strides = array<i32>} : memref<2x528xf32, #tpu.memory_space<vmem>>, vector<1x33xf32>,
    %c1_388 = arith.constant 1 : index
    %c0_389 = arith.constant 0 : index
    %243 = vector.load %arg15[%c1_388, %c0_389] : memref<16x82xf32, #tpu.memory_space<vmem>>, vector<1x33xf32>
    %c0_390 = arith.constant 0 : index
    %c33 = arith.constant 33 : index
    %244 = vector.load %arg16[%c0_390, %c33] : memref<2x528xf32, #tpu.memory_space<vmem>>, vector<1x33xf32>
    tpu.vector_store %arg16[%c0_390, %c33], %243 {strides = array<i32>} : memref<2x528xf32, #tpu.memory_space<vmem>>, vector<1x33xf32>,
    %c2_391 = arith.constant 2 : index
    %c0_392 = arith.constant 0 : index
    %245 = vector.load %arg15[%c2_391, %c0_392] : memref<16x82xf32, #tpu.memory_space<vmem>>, vector<1x33xf32>
    %c0_393 = arith.constant 0 : index
    %c66 = arith.constant 66 : index
    %246 = vector.load %arg16[%c0_393, %c66] : memref<2x528xf32, #tpu.memory_space<vmem>>, vector<1x33xf32>
    tpu.vector_store %arg16[%c0_393, %c66], %245 {strides = array<i32>} : memref<2x528xf32, #tpu.memory_space<vmem>>, vector<1x33xf32>,
    %c3_394 = arith.constant 3 : index
    %c0_395 = arith.constant 0 : index
    %247 = vector.load %arg15[%c3_394, %c0_395] : memref<16x82xf32, #tpu.memory_space<vmem>>, vector<1x33xf32>
    %c0_396 = arith.constant 0 : index
    %c99_397 = arith.constant 99 : index
    %248 = vector.load %arg16[%c0_396, %c99_397] : memref<2x528xf32, #tpu.memory_space<vmem>>, vector<1x33xf32>
    tpu.vector_store %arg16[%c0_396, %c99_397], %247 {strides = array<i32>} : memref<2x528xf32, #tpu.memory_space<vmem>>, vector<1x33xf32>,
    %c4 = arith.constant 4 : index
    %c0_398 = arith.constant 0 : index
    %249 = vector.load %arg15[%c4, %c0_398] : memref<16x82xf32, #tpu.memory_space<vmem>>, vector<1x33xf32>
    %c0_399 = arith.constant 0 : index
    %c132 = arith.constant 132 : index
    %250 = vector.load %arg16[%c0_399, %c132] : memref<2x528xf32, #tpu.memory_space<vmem>>, vector<1x33xf32>
    tpu.vector_store %arg16[%c0_399, %c132], %249 {strides = array<i32>} : memref<2x528xf32, #tpu.memory_space<vmem>>, vector<1x33xf32>,
    %c5 = arith.constant 5 : index
    %c0_400 = arith.constant 0 : index
    %251 = vector.load %arg15[%c5, %c0_400] : memref<16x82xf32, #tpu.memory_space<vmem>>, vector<1x33xf32>
    %c0_401 = arith.constant 0 : index
    %c165 = arith.constant 165 : index
    %252 = vector.load %arg16[%c0_401, %c165] : memref<2x528xf32, #tpu.memory_space<vmem>>, vector<1x33xf32>
    tpu.vector_store %arg16[%c0_401, %c165], %251 {strides = array<i32>} : memref<2x528xf32, #tpu.memory_space<vmem>>, vector<1x33xf32>,
    %c6 = arith.constant 6 : index
    %c0_402 = arith.constant 0 : index
    %253 = vector.load %arg15[%c6, %c0_402] : memref<16x82xf32, #tpu.memory_space<vmem>>, vector<1x33xf32>
    %c0_403 = arith.constant 0 : index
    %c198_404 = arith.constant 198 : index
    %254 = vector.load %arg16[%c0_403, %c198_404] : memref<2x528xf32, #tpu.memory_space<vmem>>, vector<1x33xf32>
    tpu.vector_store %arg16[%c0_403, %c198_404], %253 {strides = array<i32>} : memref<2x528xf32, #tpu.memory_space<vmem>>, vector<1x33xf32>,
    %c7_405 = arith.constant 7 : index
    %c0_406 = arith.constant 0 : index
    %255 = vector.load %arg15[%c7_405, %c0_406] : memref<16x82xf32, #tpu.memory_space<vmem>>, vector<1x33xf32>
    %c0_407 = arith.constant 0 : index
    %c231 = arith.constant 231 : index
    %256 = vector.load %arg16[%c0_407, %c231] : memref<2x528xf32, #tpu.memory_space<vmem>>, vector<1x33xf32>
    tpu.vector_store %arg16[%c0_407, %c231], %255 {strides = array<i32>} : memref<2x528xf32, #tpu.memory_space<vmem>>, vector<1x33xf32>,
    %c8_408 = arith.constant 8 : index
    %c0_409 = arith.constant 0 : index
    %257 = vector.load %arg15[%c8_408, %c0_409] : memref<16x82xf32, #tpu.memory_space<vmem>>, vector<1x33xf32>
    %c0_410 = arith.constant 0 : index
    %c264 = arith.constant 264 : index
    %258 = vector.load %arg16[%c0_410, %c264] : memref<2x528xf32, #tpu.memory_space<vmem>>, vector<1x33xf32>
    tpu.vector_store %arg16[%c0_410, %c264], %257 {strides = array<i32>} : memref<2x528xf32, #tpu.memory_space<vmem>>, vector<1x33xf32>,
    %c9_411 = arith.constant 9 : index
    %c0_412 = arith.constant 0 : index
    %259 = vector.load %arg15[%c9_411, %c0_412] : memref<16x82xf32, #tpu.memory_space<vmem>>, vector<1x33xf32>
    %c0_413 = arith.constant 0 : index
    %c297 = arith.constant 297 : index
    %260 = vector.load %arg16[%c0_413, %c297] : memref<2x528xf32, #tpu.memory_space<vmem>>, vector<1x33xf32>
    tpu.vector_store %arg16[%c0_413, %c297], %259 {strides = array<i32>} : memref<2x528xf32, #tpu.memory_space<vmem>>, vector<1x33xf32>,
    %c10 = arith.constant 10 : index
    %c0_414 = arith.constant 0 : index
    %261 = vector.load %arg15[%c10, %c0_414] : memref<16x82xf32, #tpu.memory_space<vmem>>, vector<1x33xf32>
    %c0_415 = arith.constant 0 : index
    %c330 = arith.constant 330 : index
    %262 = vector.load %arg16[%c0_415, %c330] : memref<2x528xf32, #tpu.memory_space<vmem>>, vector<1x33xf32>
    tpu.vector_store %arg16[%c0_415, %c330], %261 {strides = array<i32>} : memref<2x528xf32, #tpu.memory_space<vmem>>, vector<1x33xf32>,
    %c11 = arith.constant 11 : index
    %c0_416 = arith.constant 0 : index
    %263 = vector.load %arg15[%c11, %c0_416] : memref<16x82xf32, #tpu.memory_space<vmem>>, vector<1x33xf32>
    %c0_417 = arith.constant 0 : index
    %c363 = arith.constant 363 : index
    %264 = vector.load %arg16[%c0_417, %c363] : memref<2x528xf32, #tpu.memory_space<vmem>>, vector<1x33xf32>
    tpu.vector_store %arg16[%c0_417, %c363], %263 {strides = array<i32>} : memref<2x528xf32, #tpu.memory_space<vmem>>, vector<1x33xf32>,
    %c12 = arith.constant 12 : index
    %c0_418 = arith.constant 0 : index
    %265 = vector.load %arg15[%c12, %c0_418] : memref<16x82xf32, #tpu.memory_space<vmem>>, vector<1x33xf32>
    %c0_419 = arith.constant 0 : index
    %c396 = arith.constant 396 : index
    %266 = vector.load %arg16[%c0_419, %c396] : memref<2x528xf32, #tpu.memory_space<vmem>>, vector<1x33xf32>
    tpu.vector_store %arg16[%c0_419, %c396], %265 {strides = array<i32>} : memref<2x528xf32, #tpu.memory_space<vmem>>, vector<1x33xf32>,
    %c13 = arith.constant 13 : index
    %c0_420 = arith.constant 0 : index
    %267 = vector.load %arg15[%c13, %c0_420] : memref<16x82xf32, #tpu.memory_space<vmem>>, vector<1x33xf32>
    %c0_421 = arith.constant 0 : index
    %c429 = arith.constant 429 : index
    %268 = vector.load %arg16[%c0_421, %c429] : memref<2x528xf32, #tpu.memory_space<vmem>>, vector<1x33xf32>
    tpu.vector_store %arg16[%c0_421, %c429], %267 {strides = array<i32>} : memref<2x528xf32, #tpu.memory_space<vmem>>, vector<1x33xf32>,
    %c14_422 = arith.constant 14 : index
    %c0_423 = arith.constant 0 : index
    %269 = vector.load %arg15[%c14_422, %c0_423] : memref<16x82xf32, #tpu.memory_space<vmem>>, vector<1x33xf32>
    %c0_424 = arith.constant 0 : index
    %c462 = arith.constant 462 : index
    %270 = vector.load %arg16[%c0_424, %c462] : memref<2x528xf32, #tpu.memory_space<vmem>>, vector<1x33xf32>
    tpu.vector_store %arg16[%c0_424, %c462], %269 {strides = array<i32>} : memref<2x528xf32, #tpu.memory_space<vmem>>, vector<1x33xf32>,
    %c15_425 = arith.constant 15 : index
    %c0_426 = arith.constant 0 : index
    %271 = vector.load %arg15[%c15_425, %c0_426] : memref<16x82xf32, #tpu.memory_space<vmem>>, vector<1x33xf32>
    %c0_427 = arith.constant 0 : index
    %c495 = arith.constant 495 : index
    %272 = vector.load %arg16[%c0_427, %c495] : memref<2x528xf32, #tpu.memory_space<vmem>>, vector<1x33xf32>
    tpu.vector_store %arg16[%c0_427, %c495], %271 {strides = array<i32>} : memref<2x528xf32, #tpu.memory_space<vmem>>, vector<1x33xf32>,
    %c0_428 = arith.constant 0 : index
    %c49 = arith.constant 49 : index
    %273 = vector.load %arg15[%c0_428, %c49] : memref<16x82xf32, #tpu.memory_space<vmem>>, vector<1x33xf32>
    %c1_429 = arith.constant 1 : index
    %c0_430 = arith.constant 0 : index
    %274 = vector.load %arg16[%c1_429, %c0_430] : memref<2x528xf32, #tpu.memory_space<vmem>>, vector<1x33xf32>
    tpu.vector_store %arg16[%c1_429, %c0_430], %273 {strides = array<i32>} : memref<2x528xf32, #tpu.memory_space<vmem>>, vector<1x33xf32>,
    %c1_431 = arith.constant 1 : index
    %c49_432 = arith.constant 49 : index
    %275 = vector.load %arg15[%c1_431, %c49_432] : memref<16x82xf32, #tpu.memory_space<vmem>>, vector<1x33xf32>
    %c1_433 = arith.constant 1 : index
    %c33_434 = arith.constant 33 : index
    %276 = vector.load %arg16[%c1_433, %c33_434] : memref<2x528xf32, #tpu.memory_space<vmem>>, vector<1x33xf32>
    tpu.vector_store %arg16[%c1_433, %c33_434], %275 {strides = array<i32>} : memref<2x528xf32, #tpu.memory_space<vmem>>, vector<1x33xf32>,
    %c2_435 = arith.constant 2 : index
    %c49_436 = arith.constant 49 : index
    %277 = vector.load %arg15[%c2_435, %c49_436] : memref<16x82xf32, #tpu.memory_space<vmem>>, vector<1x33xf32>
    %c1_437 = arith.constant 1 : index
    %c66_438 = arith.constant 66 : index
    %278 = vector.load %arg16[%c1_437, %c66_438] : memref<2x528xf32, #tpu.memory_space<vmem>>, vector<1x33xf32>
    tpu.vector_store %arg16[%c1_437, %c66_438], %277 {strides = array<i32>} : memref<2x528xf32, #tpu.memory_space<vmem>>, vector<1x33xf32>,
    %c3_439 = arith.constant 3 : index
    %c49_440 = arith.constant 49 : index
    %279 = vector.load %arg15[%c3_439, %c49_440] : memref<16x82xf32, #tpu.memory_space<vmem>>, vector<1x33xf32>
    %c1_441 = arith.constant 1 : index
    %c99_442 = arith.constant 99 : index
    %280 = vector.load %arg16[%c1_441, %c99_442] : memref<2x528xf32, #tpu.memory_space<vmem>>, vector<1x33xf32>
    tpu.vector_store %arg16[%c1_441, %c99_442], %279 {strides = array<i32>} : memref<2x528xf32, #tpu.memory_space<vmem>>, vector<1x33xf32>,
    %c4_443 = arith.constant 4 : index
    %c49_444 = arith.constant 49 : index
    %281 = vector.load %arg15[%c4_443, %c49_444] : memref<16x82xf32, #tpu.memory_space<vmem>>, vector<1x33xf32>
    %c1_445 = arith.constant 1 : index
    %c132_446 = arith.constant 132 : index
    %282 = vector.load %arg16[%c1_445, %c132_446] : memref<2x528xf32, #tpu.memory_space<vmem>>, vector<1x33xf32>
    tpu.vector_store %arg16[%c1_445, %c132_446], %281 {strides = array<i32>} : memref<2x528xf32, #tpu.memory_space<vmem>>, vector<1x33xf32>,
    %c5_447 = arith.constant 5 : index
    %c49_448 = arith.constant 49 : index
    %283 = vector.load %arg15[%c5_447, %c49_448] : memref<16x82xf32, #tpu.memory_space<vmem>>, vector<1x33xf32>
    %c1_449 = arith.constant 1 : index
    %c165_450 = arith.constant 165 : index
    %284 = vector.load %arg16[%c1_449, %c165_450] : memref<2x528xf32, #tpu.memory_space<vmem>>, vector<1x33xf32>
    tpu.vector_store %arg16[%c1_449, %c165_450], %283 {strides = array<i32>} : memref<2x528xf32, #tpu.memory_space<vmem>>, vector<1x33xf32>,
    %c6_451 = arith.constant 6 : index
    %c49_452 = arith.constant 49 : index
    %285 = vector.load %arg15[%c6_451, %c49_452] : memref<16x82xf32, #tpu.memory_space<vmem>>, vector<1x33xf32>
    %c1_453 = arith.constant 1 : index
    %c198_454 = arith.constant 198 : index
    %286 = vector.load %arg16[%c1_453, %c198_454] : memref<2x528xf32, #tpu.memory_space<vmem>>, vector<1x33xf32>
    tpu.vector_store %arg16[%c1_453, %c198_454], %285 {strides = array<i32>} : memref<2x528xf32, #tpu.memory_space<vmem>>, vector<1x33xf32>,
    %c7_455 = arith.constant 7 : index
    %c49_456 = arith.constant 49 : index
    %287 = vector.load %arg15[%c7_455, %c49_456] : memref<16x82xf32, #tpu.memory_space<vmem>>, vector<1x33xf32>
    %c1_457 = arith.constant 1 : index
    %c231_458 = arith.constant 231 : index
    %288 = vector.load %arg16[%c1_457, %c231_458] : memref<2x528xf32, #tpu.memory_space<vmem>>, vector<1x33xf32>
    tpu.vector_store %arg16[%c1_457, %c231_458], %287 {strides = array<i32>} : memref<2x528xf32, #tpu.memory_space<vmem>>, vector<1x33xf32>,
    %c8_459 = arith.constant 8 : index
    %c49_460 = arith.constant 49 : index
    %289 = vector.load %arg15[%c8_459, %c49_460] : memref<16x82xf32, #tpu.memory_space<vmem>>, vector<1x33xf32>
    %c1_461 = arith.constant 1 : index
    %c264_462 = arith.constant 264 : index
    %290 = vector.load %arg16[%c1_461, %c264_462] : memref<2x528xf32, #tpu.memory_space<vmem>>, vector<1x33xf32>
    tpu.vector_store %arg16[%c1_461, %c264_462], %289 {strides = array<i32>} : memref<2x528xf32, #tpu.memory_space<vmem>>, vector<1x33xf32>,
    %c9_463 = arith.constant 9 : index
    %c49_464 = arith.constant 49 : index
    %291 = vector.load %arg15[%c9_463, %c49_464] : memref<16x82xf32, #tpu.memory_space<vmem>>, vector<1x33xf32>
    %c1_465 = arith.constant 1 : index
    %c297_466 = arith.constant 297 : index
    %292 = vector.load %arg16[%c1_465, %c297_466] : memref<2x528xf32, #tpu.memory_space<vmem>>, vector<1x33xf32>
    tpu.vector_store %arg16[%c1_465, %c297_466], %291 {strides = array<i32>} : memref<2x528xf32, #tpu.memory_space<vmem>>, vector<1x33xf32>,
    %c10_467 = arith.constant 10 : index
    %c49_468 = arith.constant 49 : index
    %293 = vector.load %arg15[%c10_467, %c49_468] : memref<16x82xf32, #tpu.memory_space<vmem>>, vector<1x33xf32>
    %c1_469 = arith.constant 1 : index
    %c330_470 = arith.constant 330 : index
    %294 = vector.load %arg16[%c1_469, %c330_470] : memref<2x528xf32, #tpu.memory_space<vmem>>, vector<1x33xf32>
    tpu.vector_store %arg16[%c1_469, %c330_470], %293 {strides = array<i32>} : memref<2x528xf32, #tpu.memory_space<vmem>>, vector<1x33xf32>,
    %c11_471 = arith.constant 11 : index
    %c49_472 = arith.constant 49 : index
    %295 = vector.load %arg15[%c11_471, %c49_472] : memref<16x82xf32, #tpu.memory_space<vmem>>, vector<1x33xf32>
    %c1_473 = arith.constant 1 : index
    %c363_474 = arith.constant 363 : index
    %296 = vector.load %arg16[%c1_473, %c363_474] : memref<2x528xf32, #tpu.memory_space<vmem>>, vector<1x33xf32>
    tpu.vector_store %arg16[%c1_473, %c363_474], %295 {strides = array<i32>} : memref<2x528xf32, #tpu.memory_space<vmem>>, vector<1x33xf32>,
    %c12_475 = arith.constant 12 : index
    %c49_476 = arith.constant 49 : index
    %297 = vector.load %arg15[%c12_475, %c49_476] : memref<16x82xf32, #tpu.memory_space<vmem>>, vector<1x33xf32>
    %c1_477 = arith.constant 1 : index
    %c396_478 = arith.constant 396 : index
    %298 = vector.load %arg16[%c1_477, %c396_478] : memref<2x528xf32, #tpu.memory_space<vmem>>, vector<1x33xf32>
    tpu.vector_store %arg16[%c1_477, %c396_478], %297 {strides = array<i32>} : memref<2x528xf32, #tpu.memory_space<vmem>>, vector<1x33xf32>,
    %c13_479 = arith.constant 13 : index
    %c49_480 = arith.constant 49 : index
    %299 = vector.load %arg15[%c13_479, %c49_480] : memref<16x82xf32, #tpu.memory_space<vmem>>, vector<1x33xf32>
    %c1_481 = arith.constant 1 : index
    %c429_482 = arith.constant 429 : index
    %300 = vector.load %arg16[%c1_481, %c429_482] : memref<2x528xf32, #tpu.memory_space<vmem>>, vector<1x33xf32>
    tpu.vector_store %arg16[%c1_481, %c429_482], %299 {strides = array<i32>} : memref<2x528xf32, #tpu.memory_space<vmem>>, vector<1x33xf32>,
    %c14_483 = arith.constant 14 : index
    %c49_484 = arith.constant 49 : index
    %301 = vector.load %arg15[%c14_483, %c49_484] : memref<16x82xf32, #tpu.memory_space<vmem>>, vector<1x33xf32>
    %c1_485 = arith.constant 1 : index
    %c462_486 = arith.constant 462 : index
    %302 = vector.load %arg16[%c1_485, %c462_486] : memref<2x528xf32, #tpu.memory_space<vmem>>, vector<1x33xf32>
    tpu.vector_store %arg16[%c1_485, %c462_486], %301 {strides = array<i32>} : memref<2x528xf32, #tpu.memory_space<vmem>>, vector<1x33xf32>,
    %c15_487 = arith.constant 15 : index
    %c49_488 = arith.constant 49 : index
    %303 = vector.load %arg15[%c15_487, %c49_488] : memref<16x82xf32, #tpu.memory_space<vmem>>, vector<1x33xf32>
    %c1_489 = arith.constant 1 : index
    %c495_490 = arith.constant 495 : index
    %304 = vector.load %arg16[%c1_489, %c495_490] : memref<2x528xf32, #tpu.memory_space<vmem>>, vector<1x33xf32>
    tpu.vector_store %arg16[%c1_489, %c495_490], %303 {strides = array<i32>} : memref<2x528xf32, #tpu.memory_space<vmem>>, vector<1x33xf32>,
    %c0_491 = arith.constant 0 : index
    %c0_492 = arith.constant 0 : index
    %305 = vector.load %arg16[%c0_491, %c0_492] : memref<2x528xf32, #tpu.memory_space<vmem>>, vector<2x528xf32>
    %c0_493 = arith.constant 0 : index
    %c0_494 = arith.constant 0 : index
    %306 = vector.load %arg5[%c0_493, %c0_494] : memref<528x120xf32, #tpu.memory_space<vmem>>, vector<528x120xf32>
    %cst_495 = arith.constant dense<0.000000e+00> : vector<2x120xf32>
    %307 = tpu.matmul %305, %306, %cst_495 {dimension_numbers = #tpu.dot_dimension_numbers<[1], [0], [0], [1], [0, 0, 1, 1], [], []>} : vector<2x528xf32>, vector<528x120xf32>, vector<2x120xf32> -> vector<2x120xf32>
    %c0_496 = arith.constant 0 : index
    %c0_497 = arith.constant 0 : index
    %308 = vector.load %arg6[%c0_496, %c0_497] : memref<1x120xf32, #tpu.memory_space<vmem>>, vector<1x120xf32>
    %309 = vector.broadcast %308 : vector<1x120xf32> to vector<2x120xf32>
    %310 = arith.addf %307, %309 : vector<2x120xf32>
    %cst_498 = arith.constant 0.000000e+00 : f32
    %311 = vector.broadcast %cst_498 : f32 to vector<2x120xf32>
    %312 = arith.maximumf %310, %311 : vector<2x120xf32>
    %c0_499 = arith.constant 0 : index
    %c0_500 = arith.constant 0 : index
    %313 = vector.load %arg7[%c0_499, %c0_500] : memref<120x84xf32, #tpu.memory_space<vmem>>, vector<120x84xf32>
    %cst_501 = arith.constant dense<0.000000e+00> : vector<2x84xf32>
    %314 = tpu.matmul %312, %313, %cst_501 {dimension_numbers = #tpu.dot_dimension_numbers<[1], [0], [0], [1], [0, 0, 1, 1], [], []>} : vector<2x120xf32>, vector<120x84xf32>, vector<2x84xf32> -> vector<2x84xf32>
    %c0_502 = arith.constant 0 : index
    %c0_503 = arith.constant 0 : index
    %315 = vector.load %arg8[%c0_502, %c0_503] : memref<1x84xf32, #tpu.memory_space<vmem>>, vector<1x84xf32>
    %316 = vector.broadcast %315 : vector<1x84xf32> to vector<2x84xf32>
    %317 = arith.addf %314, %316 : vector<2x84xf32>
    %cst_504 = arith.constant 0.000000e+00 : f32
    %318 = vector.broadcast %cst_504 : f32 to vector<2x84xf32>
    %319 = arith.maximumf %317, %318 : vector<2x84xf32>
    %c0_505 = arith.constant 0 : index
    %c0_506 = arith.constant 0 : index
    %320 = vector.load %arg9[%c0_505, %c0_506] : memref<84x10xf32, #tpu.memory_space<vmem>>, vector<84x10xf32>
    %cst_507 = arith.constant dense<0.000000e+00> : vector<2x10xf32>
    %321 = tpu.matmul %319, %320, %cst_507 {dimension_numbers = #tpu.dot_dimension_numbers<[1], [0], [0], [1], [0, 0, 1, 1], [], []>} : vector<2x84xf32>, vector<84x10xf32>, vector<2x10xf32> -> vector<2x10xf32>
    %c0_508 = arith.constant 0 : index
    %c0_509 = arith.constant 0 : index
    %322 = vector.load %arg10[%c0_508, %c0_509] : memref<1x10xf32, #tpu.memory_space<vmem>>, vector<1x10xf32>
    %323 = vector.broadcast %322 : vector<1x10xf32> to vector<2x10xf32>
    %324 = arith.addf %321, %323 : vector<2x10xf32>
    %c0_510 = arith.constant 0 : index
    %c0_511 = arith.constant 0 : index
    %325 = vector.load %arg11[%c0_510, %c0_511] : memref<2x10xf32, #tpu.memory_space<vmem>>, vector<2x10xf32>
    tpu.vector_store %arg11[%c0_510, %c0_511], %324 {strides = array<i32>} : memref<2x10xf32, #tpu.memory_space<vmem>>, vector<2x10xf32>,
    return
  }
}

</mosaic_0001>

<bundles_post_ra>
// kernel: lenet_forward_fused.1
= control target key start
LH: loop header
LB: loop body
LE: loop exit
PB: predicated region body
PF: predicated region fallthrough
CT: control target
= control target key end

     0   :  { %vm60_vm0 = vcmask 1040384   ;;  %vm56_vm1 = vcmask 203776   ;;  %s4065_s0 = inlined_call_operand.vmem [shape: f32[4,25,392], index: 0, kind: input, shape index: {}]   ;;  %s4066_s1 = inlined_call_operand.vmem [shape: f32[6,25], index: 1, kind: input, shape index: {}]   ;;  %s4067_s2 = inlined_call_operand.vmem [shape: f32[6,1], index: 2, kind: input, shape index: {}]   ;;  %s4068_s3 = inlined_call_operand.vmem [shape: f32[16,200], index: 3, kind: input, shape index: {}]   ;;  %s4069_s4 = inlined_call_operand.vmem [shape: f32[16,1], index: 4, kind: input, shape index: {}]   ;;  %s4070_s5 = inlined_call_operand.vmem [shape: f32[528,120], index: 5, kind: input, shape index: {}]   ;;  %s4071_s6 = inlined_call_operand.vmem [shape: f32[1,120], index: 6, kind: input, shape index: {}]   ;;  %s4072_s7 = inlined_call_operand.vmem [shape: f32[120,84], index: 7, kind: input, shape index: {}]   ;;  %s4073_s8 = inlined_call_operand.vmem [shape: f32[1,84], index: 8, kind: input, shape index: {}]   ;;  %s4074_s9 = inlined_call_operand.vmem [shape: f32[84,10], index: 9, kind: input, shape index: {}]   ;;  %s4075_s10 = inlined_call_operand.vmem [shape: f32[1,10], index: 10, kind: input, shape index: {}]   ;;  %s4076_s11 = inlined_call_operand.hbm [shape: f32[2,10], index: 11, kind: output, shape index: {}]  }
   0x1   :  { %v52_v0 = vld [vmem:[%s4065_s0 + $0x60] sm:$0x1]  ;;  %v53_v1 = vld [vmem:[%s4065_s0 + $0x68] sm:$0x1]  ;;  %v2445_v3 = vld [vmem:[%s4065_s0 + $0xf0] sm:$0x1] }
   0x2   :  { %v48_v2 = vld [vmem:[%s4065_s0 + $0x40] sm:$0xff]  ;;  %2423 = vmatpush.msk.msra.mxu0 %vm60_vm0, %v52_v0  ;;  %2425 = vmatpush.msk.msra.mxu1 %vm60_vm0, %v53_v1  ;;  %v2446_v4 = vld [vmem:[%s4065_s0 + $0xf8] sm:$0x1]  ;;  %v49_v5 = vld [vmem:[%s4065_s0 + $0x48] sm:$0xff] }
   0x3   :  { %2451 = vmatpush.msk.msra.mxu2 %vm60_vm0, %v2445_v3  ;;  %2453 = vmatpush.msk.msra.mxu3 %vm60_vm0, %v2446_v4  ;;  %v2441_v6 = vld [vmem:[%s4065_s0 + $0xd0] sm:$0xff]  ;;  %v2442_v7 = vld [vmem:[%s4065_s0 + $0xd8] sm:$0xff]  ;;  %v44_v8 = vld [vmem:[%s4065_s0 + $0x20] sm:$0xff] }
   0x4   :  { %86 = vmatpush.msra.mxu0 %v48_v2  ;;  %106 = vmatpush.msra.mxu1 %v49_v5  ;;  %v45_v9 = vld [vmem:[%s4065_s0 + $0x28] sm:$0xff]  ;;  %v2437_v10 = vld [vmem:[%s4065_s0 + $0xb0] sm:$0xff]  ;;  %v2438_v11 = vld [vmem:[%s4065_s0 + $0xb8] sm:$0xff] }
   0x5   :  { %235 = vmatpush.msra.mxu2 %v2441_v6  ;;  %255 = vmatpush.msra.mxu3 %v2442_v7  ;;  %v40_v12 = vld [vmem:[%s4065_s0] sm:$0xff]  ;;  %v41_v13 = vld [vmem:[%s4065_s0 + $0x8] sm:$0xff]  ;;  %v2433_v14 = vld [vmem:[%s4065_s0 + $0x90] sm:$0xff] }
   0x6   :  { %87 = vmatpush.msra.mxu0 %v44_v8  ;;  %107 = vmatpush.msra.mxu1 %v45_v9  ;;  %v2434_v15 = vld [vmem:[%s4065_s0 + $0x98] sm:$0xff]  ;;  %v2842_v16 = vld [vmem:[%s4066_s1] sm:$0x3f]  ;;  %v2469_v17 = vld [vmem:[%s4065_s0 + $0x170] sm:$0x1] }
   0x7   :  { %236 = vmatpush.msra.mxu2 %v2437_v10  ;;  %256 = vmatpush.msra.mxu3 %v2438_v11  ;;  %v54_v18 = vld [vmem:[%s4065_s0 + $0x70] sm:$0x1]  ;;  %v2444_v19 = vld [vmem:[%s4065_s0 + $0xe8] sm:$0x1]  ;;  %v2470_v20 = vld [vmem:[%s4065_s0 + $0x178] sm:$0x1] }
   0x8   :  { %88 = vmatpush.msra.mxu0 %v40_v12  ;;  %108 = vmatpush.msra.mxu1 %v41_v13  ;;  %v2465_v21 = vld [vmem:[%s4065_s0 + $0x150] sm:$0xff]  ;;  %v2440_v23 = vld [vmem:[%s4065_s0 + $0xc8] sm:$0xff]  ;;  %v2466_v24 = vld [vmem:[%s4065_s0 + $0x158] sm:$0xff] }
   0x9   :  { %237 = vmatpush.msra.mxu2 %v2433_v14  ;;  %257 = vmatpush.msra.mxu3 %v2434_v15  ;;  %v50_v22 = vld [vmem:[%s4065_s0 + $0x50] sm:$0xff]  ;;  %v2436_v27 = vld [vmem:[%s4065_s0 + $0xa8] sm:$0xff]  ;;  %v2462_v28 = vld [vmem:[%s4065_s0 + $0x138] sm:$0xff] }
   0xa   :  { %2424 = vmatmul.msk.f32.vlgmr.msra.gmra.mxu0 %vm56_vm1, %v2842_v16  ;;  %2426 = vmatmul.msk.f32.vlgmr.msra.gmra.mxu1 %vm56_vm1, %v2842_v16  ;;  %v2461_v25 = vld [vmem:[%s4065_s0 + $0x130] sm:$0xff]  ;;  %v2432_v31 = vld [vmem:[%s4065_s0 + $0x88] sm:$0xff]  ;;  %v2458_v32 = vld [vmem:[%s4065_s0 + $0x118] sm:$0xff] }
   0xb   :  { %2452 = vmatmul.msk.f32.vlgmr.msra.gmra.mxu2 %vm56_vm1, %v2842_v16  ;;  %2454 = vmatmul.msk.f32.vlgmr.msra.gmra.mxu3 %vm56_vm1, %v2842_v16  ;;  %v46_v26 = vld [vmem:[%s4065_s0 + $0x30] sm:$0xff]  ;;  %v55_v34 = vld [vmem:[%s4065_s0 + $0x78] sm:$0x1]  ;;  %v2468_v35 = vld [vmem:[%s4065_s0 + $0x168] sm:$0x1] }
   0xc   :  { %2475 = vmatpush.msk.msrb.mxu2 %vm60_vm0, %v2469_v17  ;;  %2427 = vmatpush.msk.msrb.mxu0 %vm60_vm0, %v54_v18  ;;  %v2457_v29 = vld [vmem:[%s4065_s0 + $0x110] sm:$0xff]  ;;  %v2494_v36 = vld [vmem:[%s4065_s0 + $0x1f8] sm:$0x1]  ;;  %v2464_v39 = vld [vmem:[%s4065_s0 + $0x148] sm:$0xff] }
   0xd   :  { %2449 = vmatpush.msk.msrb.mxu1 %vm60_vm0, %v2444_v19  ;;  %2477 = vmatpush.msk.msrb.mxu3 %vm60_vm0, %v2470_v20  ;;  %v42_v30 = vld [vmem:[%s4065_s0 + $0x10] sm:$0xff]  ;;  %v51_v38 = vld [vmem:[%s4065_s0 + $0x58] sm:$0xff]  ;;  %v2460_v43 = vld [vmem:[%s4065_s0 + $0x128] sm:$0xff] }
   0xe   :  { %348 = vmatpush.msrb.mxu2 %v2465_v21  ;;  %126 = vmatpush.msrb.mxu0 %v50_v22  ;;  %v2493_v33 = vld [vmem:[%s4065_s0 + $0x1f0] sm:$0x1]  ;;  %v2490_v40 = vld [vmem:[%s4065_s0 + $0x1d8] sm:$0xff] }
   0xf   :  { %215 = vmatpush.msrb.mxu1 %v2440_v23  ;;  %368 = vmatpush.msrb.mxu3 %v2466_v24  ;;  %v2489_v37 = vld [vmem:[%s4065_s0 + $0x1d0] sm:$0xff]  ;;  %v47_v42 = vld [vmem:[%s4065_s0 + $0x38] sm:$0xff] }
  0x10   :  { %349 = vmatpush.msrb.mxu2 %v2461_v25  ;;  %127 = vmatpush.msrb.mxu0 %v46_v26  ;;  %v2485_v41 = vld [vmem:[%s4065_s0 + $0x1b0] sm:$0xff]  ;;  %v2486_v44 = vld [vmem:[%s4065_s0 + $0x1b8] sm:$0xff] }
  0x11   :  { %216 = vmatpush.msrb.mxu1 %v2436_v27  ;;  %369 = vmatpush.msrb.mxu3 %v2462_v28 }
  0x12   :  { %350 = vmatpush.msrb.mxu2 %v2457_v29  ;;  %128 = vmatpush.msrb.mxu0 %v42_v30 }
  0x13   :  { %217 = vmatpush.msrb.mxu1 %v2432_v31  ;;  %370 = vmatpush.msrb.mxu3 %v2458_v32 }
  0x14   :  { %2428 = vmatmul.msk.f32.vlgmr.msrb.gmra.mxu0 %vm56_vm1, %v2842_v16  ;;  %2450 = vmatmul.msk.f32.vlgmr.msrb.gmra.mxu1 %vm56_vm1, %v2842_v16 }
  0x15   :  { %2476 = vmatmul.msk.f32.vlgmr.msrb.gmra.mxu2 %vm56_vm1, %v2842_v16  ;;  %2478 = vmatmul.msk.f32.vlgmr.msrb.gmra.mxu3 %vm56_vm1, %v2842_v16 }
  0x16   :  { %2499 = vmatpush.msk.msra.mxu2 %vm60_vm0, %v2493_v33  ;;  %2429 = vmatpush.msk.msra.mxu0 %vm60_vm0, %v55_v34 }
  0x17   :  { %2473 = vmatpush.msk.msra.mxu1 %vm60_vm0, %v2468_v35  ;;  %2501 = vmatpush.msk.msra.mxu3 %vm60_vm0, %v2494_v36 }
  0x18   :  { %461 = vmatpush.msra.mxu2 %v2489_v37  ;;  %146 = vmatpush.msra.mxu0 %v51_v38 }
  0x19   :  { %16 = vsyncpa [#allocation8], 0  ;;  %328 = vmatpush.msra.mxu1 %v2464_v39  ;;  %481 = vmatpush.msra.mxu3 %v2490_v40  ;;  %v2481_v45 = vld [vmem:[%s4065_s0 + $0x190] sm:$0xff]  ;;  %v43_v46 = vld [vmem:[%s4065_s0 + $0x18] sm:$0xff]  ;;  %v2635_v56 = vmov 0   ;;  %vm509_vm2 = vcmask 62464  }
  0x1a   :  { %462 = vmatpush.msra.mxu2 %v2485_v41  ;;  %147 = vmatpush.msra.mxu0 %v47_v42  ;;  %v2456_v47 = vld [vmem:[%s4065_s0 + $0x108] sm:$0xff]  ;;  %v2482_v48 = vld [vmem:[%s4065_s0 + $0x198] sm:$0xff]  ;;  %v2443_v49 = vld [vmem:[%s4065_s0 + $0xe0] sm:$0x1]  ;;  %v2636_v34 = vmov 0.0   ;;  %s4077_s29 = smov 37  }
  0x1b   :  { %329 = vmatpush.msra.mxu1 %v2460_v43  ;;  %482 = vmatpush.msra.mxu3 %v2486_v44  ;;  %v2492_v50 = vld [vmem:[%s4065_s0 + $0x1e8] sm:$0x1]  ;;  %v2439_v51 = vld [vmem:[%s4065_s0 + $0xc0] sm:$0xff]  ;;  %558 = vst [vmem:[#allocation3 + $0x170] sm:$0xff] %v2636_v34  ;;  %s4078_s30 = smov 111   ;;  %s2640_s12 = smov 71  }
  0x1c   :  { %463 = vmatpush.msra.mxu2 %v2481_v45  ;;  %148 = vmatpush.msra.mxu0 %v43_v46  ;;  %v2488_v52 = vld [vmem:[%s4065_s0 + $0x1c8] sm:$0xff]  ;;  %v492_v53 = vld [vmem:[%s4067_s2] sm:$0x3f]  ;;  %s4082_s13 = smov 87   ;;  %511 = vst [vmem:[#allocation3] sm:$0xff] %v2636_v34  ;;  %s2642_s14 = smov 118  }
  0x1d   :  { %330 = vmatpush.msra.mxu1 %v2456_v47  ;;  %483 = vmatpush.msra.mxu3 %v2482_v48  ;;  %v2435_v54 = vld [vmem:[%s4065_s0 + $0xa0] sm:$0xff]  ;;  %v2484_v55 = vld [vmem:[%s4065_s0 + $0x1a8] sm:$0xff]  ;;  %512 = vst [vmem:[#allocation3 + $0x8] sm:$0xff] %v2636_v34  ;;  %s2643_s2 = smov 112   ;;  %s2644_s15 = smov 88   ;;  %vm588_vm3 = vcmask 668672  }
  0x1e   :  { %2430 = vmatmul.msk.f32.vlgmr.msra.gmra.mxu0 %vm56_vm1, %v2842_v16  ;;  %2474 = vmatmul.msk.f32.vlgmr.msra.gmra.mxu1 %vm56_vm1, %v2842_v16  ;;  %v2431_v57 = vld [vmem:[%s4065_s0 + $0x80] sm:$0xff]  ;;  %v2480_v58 = vld [vmem:[%s4065_s0 + $0x188] sm:$0xff]  ;;  %515 = vst [vmem:[#allocation3 + $0x18] sm:$0xff] %v2636_v34  ;;  %s4085_s16 = smov 65   ;;  %s2646_s1 = smov 64   ;;  %vm513_vm4 = vcmask 588800  }
  0x1f   :  { %2500 = vmatmul.msk.f32.vlgmr.msra.gmra.mxu2 %vm56_vm1, %v2842_v16  ;;  %2502 = vmatmul.msk.f32.vlgmr.msra.gmra.mxu3 %vm56_vm1, %v2842_v16  ;;  %v2467_v59 = vld [vmem:[%s4065_s0 + $0x160] sm:$0x1]  ;;  %516 = vst [vmem:[#allocation3 + $0x20] sm:$0xff] %v2636_v34  ;;  %s2647_s17 = smov 72   ;;  %s2648_s18 = smov 82   ;;  %vm820_vm5 = vcmask 291840  }
  0x20   :  { %2447 = vmatpush.msk.msrb.mxu0 %vm60_vm0, %v2443_v49  ;;  %2497 = vmatpush.msk.msrb.mxu1 %vm60_vm0, %v2492_v50  ;;  %v2463_v60 = vld [vmem:[%s4065_s0 + $0x140] sm:$0xff]  ;;  %518 = vst [vmem:[#allocation3 + $0x30] sm:$0xff] %v2636_v34  ;;  %s2649_s19 = smov 53   ;;  %s2650_s20 = smov 119   ;;  %vm1322_vm6 = vcmask 586752   ;;  %vm1213_vm7 = vcmask 711680  }
  0x21   :  { %2605 = vset.pattern.permute.xlu0 %v2635_v56  ;;  %v2459_v61 = vld [vmem:[%s4065_s0 + $0x120] sm:$0xff]  ;;  %519 = vst [vmem:[#allocation3 + $0x38] sm:$0xff] %v2636_v34  ;;  %s4084_s21 = smov 35   ;;  %s4083_s22 = smov 81   ;;  %vm1091_vm8 = vcmask 963872   ;;  %vm1311_vm9 = vcmask 654336  }
  0x22   :  { %195 = vmatpush.msrb.mxu0 %v2439_v51  ;;  %441 = vmatpush.msrb.mxu1 %v2488_v52  ;;  %v2455_v62 = vld [vmem:[%s4065_s0 + $0x100] sm:$0xff]  ;;  %521 = vst [vmem:[#allocation3 + $0x48] sm:$0xff] %v2636_v34  ;;  %s2653_s23 = smov 66   ;;  %s2654_s24 = smov 42   ;;  %vm1320_vm10 = vcmask 1046448   ;;  %vm724_vm11 = vcmask 433152  }
  0x23   :  { %495 = vperm.xlu0 %2605, %v492_v53   ;;  %v2491_v63 = vld [vmem:[%s4065_s0 + $0x1e0] sm:$0x1]  ;;  %522 = vst [vmem:[#allocation3 + $0x50] sm:$0xff] %v2636_v34  ;;  %s2655_s25 = smov 103   ;;  %s2656_s26 = smov 12   ;;  %vm1019_vm12 = vcmask 285696  }
  0x24   :  { %196 = vmatpush.msrb.mxu0 %v2435_v54  ;;  %442 = vmatpush.msrb.mxu1 %v2484_v55  ;;  %v2487_v0 = vld [vmem:[%s4065_s0 + $0x1c0] sm:$0xff]  ;;  %524 = vst [vmem:[#allocation3 + $0x60] sm:$0xff] %v2636_v34  ;;  %s4088_s27 = smov 89   ;;  %s2658_s28 = smov 5   ;;  %vm818_vm13 = vcmask 1046160   ;;  %vm1288_vm14 = vcmask 662528  }
  0x25   :  { %v2483_v1 = vld [vmem:[%s4065_s0 + $0x1a0] sm:$0xff]  ;;  %525 = vst [vmem:[#allocation3 + $0x68] sm:$0xff] %v2636_v34  ;;  %vm1470_vm15 = vcmask 580608  }
  0x26   :  { %197 = vmatpush.msrb.mxu0 %v2431_v57  ;;  %443 = vmatpush.msrb.mxu1 %v2480_v58  ;;  %v2479_v2 = vld [vmem:[%s4065_s0 + $0x180] sm:$0xff]  ;;  %s4080_s0 = smov 80   ;;  %527 = vst [vmem:[#allocation3 + $0x78] sm:$0xff] %v2636_v34 }
  0x27   :  { %2448 = vmatmul.msk.f32.vlgmr.msrb.gmra.mxu0 %vm56_vm1, %v2842_v16  ;;  %2498 = vmatmul.msk.f32.vlgmr.msrb.gmra.mxu1 %vm56_vm1, %v2842_v16  ;;  %528 = vst [vmem:[#allocation3 + $0x80] sm:$0xff] %v2636_v34 }
  0x28   :  { %2471 = vmatpush.msk.msra.mxu0 %vm60_vm0, %v2467_v59  ;;  %530 = vst [vmem:[#allocation3 + $0x90] sm:$0xff] %v2636_v34 }
  0x29   :  { %531 = vst [vmem:[#allocation3 + $0x98] sm:$0xff] %v2636_v34 }
  0x2a   :  { %308 = vmatpush.msra.mxu0 %v2463_v60  ;;  %533 = vst [vmem:[#allocation3 + $0xa8] sm:$0xff] %v2636_v34 }
  0x2b   :  { %534 = vst [vmem:[#allocation3 + $0xb0] sm:$0xff] %v2636_v34 }
  0x2c   :  { %309 = vmatpush.msra.mxu0 %v2459_v61  ;;  %536 = vst [vmem:[#allocation3 + $0xc0] sm:$0xff] %v2636_v34 }
  0x2d   :  { %537 = vst [vmem:[#allocation3 + $0xc8] sm:$0xff] %v2636_v34 }
  0x2e   :  { %310 = vmatpush.msra.mxu0 %v2455_v62  ;;  %539 = vst [vmem:[#allocation3 + $0xd8] sm:$0xff] %v2636_v34 }
  0x2f   :  { %2472 = vmatmul.msk.f32.vlgmr.msra.gmra.mxu0 %vm56_vm1, %v2842_v16  ;;  %540 = vst [vmem:[#allocation3 + $0xe0] sm:$0xff] %v2636_v34 }
  0x30   :  { %2495 = vmatpush.msk.msrb.mxu0 %vm60_vm0, %v2491_v63  ;;  %542 = vst [vmem:[#allocation3 + $0xf0] sm:$0xff] %v2636_v34  ;;  %vm1195_vm0 = vcmask 719872  }
  0x31   :  { %543 = vst [vmem:[#allocation3 + $0xf8] sm:$0xff] %v2636_v34 }
  0x32   :  { %421 = vmatpush.msrb.mxu0 %v2487_v0  ;;  %545 = vst [vmem:[#allocation3 + $0x108] sm:$0xff] %v2636_v34 }
  0x33   :  { %546 = vst [vmem:[#allocation3 + $0x110] sm:$0xff] %v2636_v34 }
  0x34   :  { %422 = vmatpush.msrb.mxu0 %v2483_v1  ;;  %548 = vst [vmem:[#allocation3 + $0x120] sm:$0xff] %v2636_v34 }
  0x35   :  { %549 = vst [vmem:[#allocation3 + $0x128] sm:$0xff] %v2636_v34 }
  0x36   :  { %423 = vmatpush.msrb.mxu0 %v2479_v2  ;;  %551 = vst [vmem:[#allocation3 + $0x138] sm:$0xff] %v2636_v34 }
  0x37   :  { %2496 = vmatmul.msk.f32.vlgmr.msrb.gmra.mxu0 %vm56_vm1, %v2842_v16  ;;  %552 = vst [vmem:[#allocation3 + $0x140] sm:$0xff] %v2636_v34  ;;  %vm4091_vm1 = vcmask 670720  }
  0x38   :  { %554 = vst [vmem:[#allocation3 + $0x150] sm:$0xff] %v2636_v34 }
  0x39   :  { %555 = vst [vmem:[#allocation3 + $0x158] sm:$0xff] %v2636_v34 }
  0x3a   :  { %557 = vst [vmem:[#allocation3 + $0x168] sm:$0xff] %v2636_v34 }
  0x3b   :  { %560 = vst [vmem:[#allocation3 + $0x180] sm:$0xff] %v2636_v34 }
  0x3c   :  { %561 = vst [vmem:[#allocation3 + $0x188] sm:$0xff] %v2636_v34 }
  0x3d   :  { %563 = vst [vmem:[#allocation3 + $0x198] sm:$0xff] %v2636_v34 }
  0x3e   :  { %564 = vst [vmem:[#allocation3 + $0x1a0] sm:$0xff] %v2636_v34 }
  0x3f   :  { %566 = vst [vmem:[#allocation3 + $0x1b0] sm:$0xff] %v2636_v34 }
  0x40   :  { %567 = vst [vmem:[#allocation3 + $0x1b8] sm:$0xff] %v2636_v34 }
  0x41   :  { %569 = vst [vmem:[#allocation3 + $0x1c8] sm:$0xff] %v2636_v34 }
  0x42   :  { %570 = vst [vmem:[#allocation3 + $0x1d0] sm:$0xff] %v2636_v34 }
  0x43   :  { %572 = vst [vmem:[#allocation3 + $0x1e0] sm:$0xff] %v2636_v34 }
  0x44   :  { %573 = vst [vmem:[#allocation3 + $0x1e8] sm:$0xff] %v2636_v34 }
  0x45   :  { %575 = vst [vmem:[#allocation3 + $0x1f8] sm:$0xff] %v2636_v34 }
  0x46   :  { %576 = vst [vmem:[#allocation3 + $0x200] sm:$0xff] %v2636_v34 }
  0x47   :  { %578 = vst [vmem:[#allocation3 + $0x210] sm:$0xff] %v2636_v34 }
  0x48   :  { %579 = vst [vmem:[#allocation3 + $0x218] sm:$0xff] %v2636_v34 }
  0x49   :  { %581 = vst [vmem:[#allocation3 + $0x228] sm:$0xff] %v2636_v34 }
  0x4a   :  { %582 = vst [vmem:[#allocation3 + $0x230] sm:$0xff] %v2636_v34 }
  0x4b   :  { %584 = vst [vmem:[#allocation3 + $0x240] sm:$0xff] %v2636_v34 }
  0x4c   :  { %585 = vst [vmem:[#allocation3 + $0x248] sm:$0xff] %v2636_v34 }
  0x4d   :  { %550 = vst.msk [vmem:[#allocation3 + $0x130] sm:$0xff] %vm513_vm4, %v2636_v34 }
  0x4e   :  { %514 = vst.msk [vmem:[#allocation3 + $0x10] sm:$0xff] %vm513_vm4, %v2636_v34 }
  0x4f   :  { %517 = vst.msk [vmem:[#allocation3 + $0x28] sm:$0xff] %vm513_vm4, %v2636_v34 }
  0x50   :  { %520 = vst.msk [vmem:[#allocation3 + $0x40] sm:$0xff] %vm513_vm4, %v2636_v34 }
  0x51   :  { %523 = vst.msk [vmem:[#allocation3 + $0x58] sm:$0xff] %vm513_vm4, %v2636_v34 }
  0x52   :  { %526 = vst.msk [vmem:[#allocation3 + $0x70] sm:$0xff] %vm513_vm4, %v2636_v34 }
  0x53   :  { %529 = vst.msk [vmem:[#allocation3 + $0x88] sm:$0xff] %vm513_vm4, %v2636_v34 }
  0x54   :  { %532 = vst.msk [vmem:[#allocation3 + $0xa0] sm:$0xff] %vm513_vm4, %v2636_v34 }
  0x55   :  { %535 = vst.msk [vmem:[#allocation3 + $0xb8] sm:$0xff] %vm513_vm4, %v2636_v34 }
  0x56   :  { %538 = vst.msk [vmem:[#allocation3 + $0xd0] sm:$0xff] %vm513_vm4, %v2636_v34 }
  0x57   :  { %541 = vst.msk [vmem:[#allocation3 + $0xe8] sm:$0xff] %vm513_vm4, %v2636_v34 }
  0x58   :  { %544 = vst.msk [vmem:[#allocation3 + $0x100] sm:$0xff] %vm513_vm4, %v2636_v34 }
  0x59   :  { %547 = vst.msk [vmem:[#allocation3 + $0x118] sm:$0xff] %vm513_vm4, %v2636_v34 }
  0x5a   :  { %553 = vst.msk [vmem:[#allocation3 + $0x148] sm:$0xff] %vm513_vm4, %v2636_v34 }
  0x5b   :  { %556 = vst.msk [vmem:[#allocation3 + $0x160] sm:$0xff] %vm513_vm4, %v2636_v34 }
  0x5c   :  { %559 = vst.msk [vmem:[#allocation3 + $0x178] sm:$0xff] %vm513_vm4, %v2636_v34 }
  0x5d   :  { %562 = vst.msk [vmem:[#allocation3 + $0x190] sm:$0xff] %vm513_vm4, %v2636_v34 }
  0x5e   :  { %565 = vst.msk [vmem:[#allocation3 + $0x1a8] sm:$0xff] %vm513_vm4, %v2636_v34 }
  0x5f   :  { %568 = vst.msk [vmem:[#allocation3 + $0x1c0] sm:$0xff] %vm513_vm4, %v2636_v34 }
  0x60   :  { %571 = vst.msk [vmem:[#allocation3 + $0x1d8] sm:$0xff] %vm513_vm4, %v2636_v34 }
  0x61   :  { %574 = vst.msk [vmem:[#allocation3 + $0x1f0] sm:$0xff] %vm513_vm4, %v2636_v34 }
  0x62   :  { %577 = vst.msk [vmem:[#allocation3 + $0x208] sm:$0xff] %vm513_vm4, %v2636_v34 }
  0x63   :  { %580 = vst.msk [vmem:[#allocation3 + $0x220] sm:$0xff] %vm513_vm4, %v2636_v34 }
  0x64   :  { %583 = vst.msk [vmem:[#allocation3 + $0x238] sm:$0xff] %vm513_vm4, %v2636_v34 }
  0x65   :  { %586 = vst.msk [vmem:[#allocation3 + $0x250] sm:$0xff] %vm513_vm4, %v2636_v34 }
  0x87   :  { %v90_v3 = vpop.f32.mrf.mxu0  ;;  %v110_v4 = vpop.f32.mrf.mxu1 }
  0x8e   :  { %v239_v5 = vpop.f32.mrf.mxu2  ;;  %v259_v6 = vpop.f32.mrf.mxu3 }
  0x91   :  { %v130_v7 = vpop.f32.mrf.mxu0  ;;  %v219_v8 = vpop.f32.mrf.mxu1 }
  0x92   :  { %v263_v14 = vmax.f32 %v110_v4, %v219_v8  ;;  %v264_v15 = vmax.f32 %v130_v7, %v239_v5 }
  0x95   :  { %v496_v20 = vpop.permute.xlu0 %495 }
  0x98   :  { %v352_v9 = vpop.f32.mrf.mxu2  ;;  %v372_v10 = vpop.f32.mrf.mxu3 }
  0x99   :  { %v377_v18 = vmax.f32 %v264_v15, %v352_v9 }
  0x9b   :  { %v150_v11 = vpop.f32.mrf.mxu0  ;;  %v332_v12 = vpop.f32.mrf.mxu1 }
  0x9c   :  { %v265_v13 = vmax.f32 %v150_v11, %v259_v6  ;;  %v376_v19 = vmax.f32 %v263_v14, %v332_v12 }
  0x9e   :  { %v378_v17 = vmax.f32 %v265_v13, %v372_v10 }
  0xa2   :  { %v465_v21 = vpop.f32.mrf.mxu2  ;;  %v485_v22 = vpop.f32.mrf.mxu3 }
  0xa3   :  { %v490_v16 = vmax.f32 %v377_v18, %v465_v21  ;;  %v491_v23 = vmax.f32 %v378_v17, %v485_v22 }
  0xa4   :  { %v199_v24 = vpop.f32.mrf.mxu0  ;;  %v445_v25 = vpop.f32.mrf.mxu1 }
  0xa5   :  { %v500_v26 = vadd.f32 %v496_v20, %v490_v16  ;;  %v501_v27 = vadd.f32 %v496_v20, %v491_v23  ;;  %v489_v28 = vmax.f32 %v376_v19, %v445_v25  ;;  %v262_v37 = vmax.f32 %v90_v3, %v199_v24 }
  0xa7   :  { %v504_v29 = vmax.f32 %v500_v26, 0.0  ;;  %v505_v30 = vmax.f32 %v501_v27, 0.0  ;;  %v499_v31 = vadd.f32 %v496_v20, %v489_v28 }
  0xa9   :  { %508 = vst [vmem:[#allocation2 + $0x10] sm:$0x3f] %v504_v29  ;;  %v503_v32 = vmax.f32 %v499_v31, 0.0 }
  0xaa   :  { %510 = vst.msk [vmem:[#allocation2 + $0x18] sm:$0x3f] %vm509_vm2, %v505_v30  ;;  %vm1177_vm2 = vcmask 728064  }
  0xab   :  { %507 = vst [vmem:[#allocation2 + $0x8] sm:$0x3f] %v503_v32 }
  0xac   :  { %v312_v33 = vpop.f32.mrf.mxu0 }
  0xad   :  { %v375_v39 = vmax.f32 %v262_v37, %v312_v33 }
  0xb0   :  { %v1304_v35 = vld [vmem:[#allocation2 + $0x10] sm:$0x3f] }
  0xb1   :  { %v969_v36 = vld [vmem:[#allocation2 + $0x10] sm:$0x3f]  ;;  %1309 = vrot.lane.b32.xlu2 %v1304_v35, %s4080_s0  ;;  %v1293_v38 = vld [vmem:[#allocation2 + $0x18] sm:$0x3f] }
  0xb2   :  { %971 = vrot.lane.b32.xlu0 %v969_v36, %s4077_s29  ;;  %1298 = vrot.lane.b32.xlu1 %v1293_v38, %s4078_s30  ;;  %v1462_v43 = vld [vmem:[#allocation2 + $0x10] sm:$0x3f]  ;;  %v1270_v60 = vld [vmem:[#allocation2 + $0x18] sm:$0x3f]  ;;  %v956_v61 = vld [vmem:[#allocation2 + $0x8] sm:$0x3f] }
  0xb3   :  { %v1206_v44 = vld [vmem:[#allocation2 + $0x10] sm:$0x3f]  ;;  %v1303_v0 = vld [vmem:[#allocation2 + $0x8] sm:$0x3f]  ;;  %v1012_v2 = vld [vmem:[#allocation2 + $0x18] sm:$0x3f] }
  0xb4   :  { %v425_v40 = vpop.f32.mrf.mxu0  ;;  %v1199_v46 = vld [vmem:[#allocation2 + $0x10] sm:$0x3f]  ;;  %v935_v3 = vld [vmem:[#allocation2 + $0x8] sm:$0x3f]  ;;  %s2661_s29 = smov 73  }
  0xb5   :  { %v488_v41 = vmax.f32 %v375_v39, %v425_v40  ;;  %v1269_v47 = vld [vmem:[#allocation2 + $0x10] sm:$0x3f]  ;;  %v1068_v5 = vld [vmem:[#allocation2 + $0x8] sm:$0x3f]  ;;  %v1463_v9 = vld [vmem:[#allocation2 + $0x18] sm:$0x3f] }
  0xb6   :  { %v1292_v48 = vld [vmem:[#allocation2 + $0x10] sm:$0x3f]  ;;  %v1448_v7 = vld [vmem:[#allocation2 + $0x8] sm:$0x3f] }
  0xb7   :  { %v498_v42 = vadd.f32 %v496_v20, %v488_v41  ;;  %v1188_v49 = vld [vmem:[#allocation2 + $0x10] sm:$0x3f]  ;;  %v1205_v8 = vld [vmem:[#allocation2 + $0x8] sm:$0x3f] }
  0xb8   :  { %v1557_v50 = vld [vmem:[#allocation2 + $0x10] sm:$0x3f]  ;;  %v1026_v10 = vld [vmem:[#allocation2 + $0x8] sm:$0x3f] }
  0xb9   :  { %v502_v45 = vmax.f32 %v498_v42, 0.0  ;;  %1466 = vrot.lane.b32.xlu2 %v1462_v43, %s2640_s12  ;;  %v1585_v51 = vld [vmem:[#allocation2 + $0x10] sm:$0x3f]  ;;  %v716_v11 = vld [vmem:[#allocation2 + $0x8] sm:$0x3f] }
  0xba   :  { %1211 = vrot.lane.b32.xlu0 %v1206_v44, %s4082_s13  ;;  %1201 = vrot.lane.b32.xlu1 %v1199_v46, %s2642_s14  ;;  %v1441_v52 = vld [vmem:[#allocation2 + $0x10] sm:$0x3f]  ;;  %s2659_s14 = smov 104   ;;  %v1187_v12 = vld [vmem:[#allocation2 + $0x8] sm:$0x3f] }
  0xbb   :  { %506 = vst [vmem:[#allocation2] sm:$0x3f] %v502_v45  ;;  %v1258_v53 = vld [vmem:[#allocation2 + $0x10] sm:$0x3f]  ;;  %v1257_v13 = vld [vmem:[#allocation2 + $0x8] sm:$0x3f] }
  0xbc   :  { %v717_v54 = vld [vmem:[#allocation2 + $0x10] sm:$0x3f]  ;;  %v1047_v15 = vld [vmem:[#allocation2 + $0x8] sm:$0x3f] }
  0xbd   :  { %v1181_v55 = vld [vmem:[#allocation2 + $0x10] sm:$0x3f]  ;;  %v699_v17 = vld [vmem:[#allocation2 + $0x8] sm:$0x3f] }
  0xbe   :  { %v1011_v56 = vld [vmem:[#allocation2 + $0x10] sm:$0x3f]  ;;  %v1544_v18 = vld [vmem:[#allocation2 + $0x8] sm:$0x3f] }
  0xbf   :  { %v1281_v57 = vld [vmem:[#allocation2 + $0x10] sm:$0x3f]  ;;  %v1280_v20 = vld [vmem:[#allocation2 + $0x8] sm:$0x3f] }
  0xc0   :  { %v1530_v58 = vld [vmem:[#allocation2 + $0x10] sm:$0x3f]  ;;  %v914_v21 = vld [vmem:[#allocation2 + $0x8] sm:$0x3f] }
  0xc1   :  { %1273 = vrot.lane.b32.xlu2 %v1269_v47, %s2643_s2  ;;  %v906_v59 = vld [vmem:[#allocation2 + $0x10] sm:$0x3f]  ;;  %v1477_v22 = vld [vmem:[#allocation2 + $0x8] sm:$0x3f] }
  0xc2   :  { %1296 = vrot.lane.b32.xlu0 %v1292_v48, %s4078_s30  ;;  %1193 = vrot.lane.b32.xlu1 %v1188_v49, %s2644_s15  ;;  %v893_v62 = vld [vmem:[#allocation2 + $0x10] sm:$0x3f]  ;;  %v587_v4 = vld [vmem:[#allocation2] sm:$0x3f]  ;;  %s4089_s30 = smov 41  }
  0xc3   :  { %v1170_v63 = vld [vmem:[#allocation2 + $0x10] sm:$0x3f]  ;;  %589 = vst.msk [vmem:[#allocation3] sm:$0x3f] %vm588_vm3, %v587_v4  ;;  %v1571_v23 = vld [vmem:[#allocation2 + $0x8] sm:$0x3f] }
  0xc4   :  { %v998_v1 = vld [vmem:[#allocation2 + $0x10] sm:$0x3f]  ;;  %v1427_v24 = vld [vmem:[#allocation2 + $0x8] sm:$0x3f]  ;;  %v1476_v30 = vld [vmem:[#allocation2] sm:$0x3f] }
  0xc5   :  { %v1420_v6 = vld [vmem:[#allocation2 + $0x10] sm:$0x3f]  ;;  %v892_v25 = vld [vmem:[#allocation2 + $0x8] sm:$0x3f]  ;;  %v927_v37 = vld [vmem:[#allocation2] sm:$0x3f] }
  0xc6   :  { %v789_v29 = vld [vmem:[#allocation2 + $0x8] sm:$0x3f]  ;;  %v710_v43 = vld [vmem:[#allocation2] sm:$0x3f] }
  0xc7   :  { %v997_v31 = vld [vmem:[#allocation2 + $0x8] sm:$0x3f]  ;;  %v1217_v44 = vld [vmem:[#allocation2] sm:$0x3f] }
  0xc8   :  { %v1169_v36 = vld [vmem:[#allocation2 + $0x8] sm:$0x3f]  ;;  %v1060_v34 = vld [vmem:[#allocation2] sm:$0x3f] }
  0xc9   :  { %1561 = vrot.lane.b32.xlu2 %v1557_v50, %s4085_s16  ;;  %v771_v38 = vld [vmem:[#allocation2 + $0x8] sm:$0x3f]  ;;  %s4087_s16 = smov 74   ;;  %v1067_v48 = vld [vmem:[#allocation2] sm:$0x3f] }
  0xca   :  { %1589 = vrot.lane.b32.xlu0 %v1585_v51, %s2646_s1  ;;  %1443 = vrot.lane.b32.xlu1 %v1441_v52, %s2647_s17  ;;  %s2660_s17 = smov 96   ;;  %v681_v42 = vld [vmem:[#allocation2 + $0x8] sm:$0x3f]  ;;  %v948_v49 = vld [vmem:[#allocation2] sm:$0x3f] }
  0xd1   :  { %1263 = vrot.lane.b32.xlu2 %v1258_v53, %s2648_s18  ;;  %v955_v53 = vld [vmem:[#allocation2] sm:$0x3f] }
  0xd2   :  { %722 = vrot.lane.b32.xlu0 %v717_v54, %s2649_s19  ;;  %1183 = vrot.lane.b32.xlu1 %v1181_v55, %s2650_s20  ;;  %v782_v54 = vld [vmem:[#allocation2] sm:$0x3f] }
  0xd3   :  { %v1039_v55 = vld [vmem:[#allocation2] sm:$0x3f] }
  0xd9   :  { %1015 = vrot.lane.b32.xlu2 %v1011_v56, %s4084_s21 }
  0xda   :  { %1286 = vrot.lane.b32.xlu0 %v1281_v57, %s4083_s22  ;;  %1534 = vrot.lane.b32.xlu1 %v1530_v58, %s2653_s23 }
  0xe1   :  { %908 = vrot.lane.b32.xlu2 %v906_v59, %s2654_s24  ;;  %v934_v59 = vld [vmem:[#allocation2] sm:$0x3f] }
  0xe2   :  { %1275 = vrot.lane.b32.xlu0 %v1270_v60, %s2643_s2  ;;  %961 = vrot.lane.b32.xlu1 %v956_v61, %s2655_s25  ;;  %v698_v60 = vld [vmem:[#allocation2] sm:$0x3f] }
  0xe3   :  { %v800_v61 = vld [vmem:[#allocation2] sm:$0x3f] }
  0xe9   :  { %898 = vrot.lane.b32.xlu2 %v893_v62, %s2656_s26 }
  0xea   :  { %1175 = vrot.lane.b32.xlu0 %v1170_v63, %s4088_s27  ;;  %1307 = vrot.lane.b32.xlu1 %v1303_v0, %s4080_s0  ;;  %s2663_s0 = smov 98  }
  0xf1   :  { %1003 = vrot.lane.b32.xlu2 %v998_v1, %s2658_s28  ;;  %v1046_v1 = vld [vmem:[#allocation2] sm:$0x3f] }
  0xf2   :  { %1017 = vrot.lane.b32.xlu0 %v1012_v2, %s4084_s21  ;;  %940 = vrot.lane.b32.xlu1 %v935_v3, %s2659_s14  ;;  %v692_v2 = vld [vmem:[#allocation2] sm:$0x3f] }
  0xf3   :  { %v788_v3 = vld [vmem:[#allocation2] sm:$0x3f] }
  0xf9   :  { %1073 = vrot.lane.b32.xlu2 %v1068_v5, %s2660_s17 }
  0xfa   :  { %1422 = vrot.lane.b32.xlu0 %v1420_v6, %s2661_s29  ;;  %1452 = vrot.lane.b32.xlu1 %v1448_v7, %s4089_s30 }
 0x101   :  { %1209 = vrot.lane.b32.xlu2 %v1205_v8, %s4082_s13  ;;  %s2664_s13 = smov 97  }
 0x102   :  { %1468 = vrot.lane.b32.xlu0 %v1463_v9, %s2640_s12  ;;  %1031 = vrot.lane.b32.xlu1 %v1026_v10, %s2663_s0  ;;  %s2665_s12 = smov 22   ;;  %v770_v9 = vld [vmem:[#allocation2] sm:$0x3f] }
 0x103   :  { %v1251_v10 = vld [vmem:[#allocation2] sm:$0x3f] }
 0x109   :  { %720 = vrot.lane.b32.xlu2 %v716_v11, %s2649_s19  ;;  %s2667_s19 = smov 6   ;;  %v1163_v11 = vld [vmem:[#allocation2] sm:$0x3f] }
 0x10a   :  { %1191 = vrot.lane.b32.xlu0 %v1187_v12, %s2644_s15  ;;  %1261 = vrot.lane.b32.xlu1 %v1257_v13, %s2648_s18  ;;  %s2666_s15 = smov 105  }
 0x10b   :  { %v3120_v14 = vpop.permute.xlu2 %1309 }
 0x111   :  { %1052 = vrot.lane.b32.xlu2 %v1047_v15, %s2664_s13 }
 0x112   :  { %704 = vrot.lane.b32.xlu0 %v699_v17, %s2665_s12  ;;  %1548 = vrot.lane.b32.xlu1 %v1544_v18, %s4084_s21  ;;  %s2669_s21 = smov 15  }
 0x113   :  { %v3125_v19 = vpop.permute.xlu2 %1466 }
 0x119   :  { %1284 = vrot.lane.b32.xlu2 %v1280_v20, %s4083_s22  ;;  %s4086_s22 = smov 34   ;;  %v1153_v20 = vld [vmem:[#allocation2 + $0x8] sm:$0x3f] }
 0x11a   :  { %919 = vrot.lane.b32.xlu0 %v914_v21, %s2666_s15  ;;  %1482 = vrot.lane.b32.xlu1 %v1477_v22, %s2667_s19  ;;  %v1152_v21 = vld [vmem:[#allocation2] sm:$0x3f] }
 0x11b   :  { %v3130_v16 = vpop.permute.xlu2 %1273  ;;  %v680_v22 = vld [vmem:[#allocation2] sm:$0x3f] }
 0x121   :  { %1575 = vrot.lane.b32.xlu2 %v1571_v23, %s4086_s22  ;;  %s2671_s22 = smov 16  }
 0x122   :  { %1431 = vrot.lane.b32.xlu0 %v1427_v24, %s2654_s24  ;;  %896 = vrot.lane.b32.xlu1 %v892_v25, %s2656_s26 }
 0x123   :  { %v3147_v26 = vpop.permute.xlu2 %1561 }
 0x124   :  { %v3149_v27 = vpop.permute.xlu0 %971  ;;  %v3155_v28 = vpop.permute.xlu1 %1298 }
 0x125   :  { %975 = vst.msk [vmem:[#allocation3 + $0x170] sm:$0x3f] %vm820_vm5, %v3149_v27 }
 0x129   :  { %794 = vrot.lane.b32.xlu2 %v789_v29, %s2669_s21  ;;  %v1406_v29 = vld [vmem:[#allocation2] sm:$0x3f] }
 0x12a   :  { %1480 = vrot.lane.b32.xlu0 %v1476_v30, %s2667_s19  ;;  %1001 = vrot.lane.b32.xlu1 %v997_v31, %s2658_s28  ;;  %v1241_v30 = vld [vmem:[#allocation2 + $0x8] sm:$0x3f]  ;;  %v1240_v31 = vld [vmem:[#allocation2] sm:$0x3f] }
 0x12b   :  { %v3172_v32 = vpop.permute.xlu2 %1263 }
 0x12c   :  { %v3174_v33 = vpop.permute.xlu0 %1211  ;;  %v3178_v35 = vpop.permute.xlu1 %1201 }
 0x131   :  { %1173 = vrot.lane.b32.xlu2 %v1169_v36, %s4088_s27  ;;  %s2674_s27 = smov 67  }
 0x132   :  { %929 = vrot.lane.b32.xlu0 %v927_v37, %s4087_s16  ;;  %776 = vrot.lane.b32.xlu1 %v771_v38, %s2671_s22  ;;  %s2672_s16 = smov 23  }
 0x133   :  { %v3197_v39 = vpop.permute.xlu2 %1015 }
 0x134   :  { %v3199_v40 = vpop.permute.xlu0 %1296  ;;  %v3203_v41 = vpop.permute.xlu1 %1193 }
 0x139   :  { %686 = vrot.lane.b32.xlu2 %v681_v42, %s2672_s16 }
 0x13a   :  { %712 = vrot.lane.b32.xlu0 %v710_v43, %s2650_s20  ;;  %1219 = vrot.lane.b32.xlu1 %v1217_v44, %s2665_s12  ;;  %s2673_s20 = smov 113   ;;  %v885_v43 = vld [vmem:[#allocation2 + $0x10] sm:$0x3f] }
 0x13b   :  { %v3216_v46 = vpop.permute.xlu2 %908  ;;  %v1449_v44 = vld [vmem:[#allocation2 + $0x10] sm:$0x3f] }
 0x13c   :  { %v3214_v45 = vpop.permute.xlu0 %1589  ;;  %912 = vst.msk [vmem:[#allocation3 + $0xe0] sm:$0x3f] %vm820_vm5, %v3216_v46  ;;  %v3220_v47 = vpop.permute.xlu1 %1443 }
 0x13d   :  { %1447 = vst.msk [vmem:[#allocation3 + $0x130] sm:$0x3f] %vm1322_vm6, %v3220_v47 }
 0x141   :  { %1062 = vrot.lane.b32.xlu2 %v1060_v34, %s2653_s23  ;;  %v1516_v34 = vld [vmem:[#allocation2] sm:$0x3f] }
 0x142   :  { %1071 = vrot.lane.b32.xlu0 %v1067_v48, %s2660_s17  ;;  %950 = vrot.lane.b32.xlu1 %v948_v49, %s2661_s29  ;;  %s2675_s29 = smov 120  }
 0x143   :  { %v3227_v50 = vpop.permute.xlu2 %898 }
 0x144   :  { %v723_v51 = vpop.permute.xlu0 %722  ;;  %v3229_v52 = vpop.permute.xlu1 %1183 }
 0x149   :  { %959 = vrot.lane.b32.xlu2 %v955_v53, %s2655_s25 }
 0x14a   :  { %784 = vrot.lane.b32.xlu0 %v782_v54, %s2673_s20  ;;  %1041 = vrot.lane.b32.xlu1 %v1039_v55, %s2674_s27  ;;  %s2679_s27 = smov 11   ;;  %v1509_v54 = vld [vmem:[#allocation2] sm:$0x3f]  ;;  %s2683_s20 = smov 102  }
 0x14b   :  { %v3232_v56 = vpop.permute.xlu2 %1003  ;;  %v1399_v55 = vld [vmem:[#allocation2] sm:$0x3f] }
 0x14c   :  { %v3234_v57 = vpop.permute.xlu0 %1286  ;;  %v3236_v58 = vpop.permute.xlu1 %1534 }
 0x151   :  { %702 = vrot.lane.b32.xlu2 %v698_v60, %s2665_s12  ;;  %s2682_s12 = smov 4   ;;  %v871_v60 = vld [vmem:[#allocation2 + $0x8] sm:$0x3f] }
 0x152   :  { %938 = vrot.lane.b32.xlu0 %v934_v59, %s2659_s14  ;;  %802 = vrot.lane.b32.xlu1 %v800_v61, %s2643_s2  ;;  %s2681_s14 = smov 43   ;;  %v764_v61 = vld [vmem:[#allocation2] sm:$0x3f] }
 0x153   :  { %v3241_v62 = vpop.permute.xlu2 %1073 }
 0x154   :  { %v3243_v63 = vpop.permute.xlu0 %1275  ;;  %1080 = vst.msk [vmem:[#allocation3 + $0x248] sm:$0x3f] %vm820_vm5, %v3241_v62  ;;  %v3247_v0 = vpop.permute.xlu1 %961 }
 0x155   :  { %968 = vst.msk [vmem:[#allocation3 + $0x158] sm:$0x3f] %vm820_vm5, %v3247_v0 }
 0x159   :  { %694 = vrot.lane.b32.xlu2 %v692_v2, %s2675_s29 }
 0x15a   :  { %1050 = vrot.lane.b32.xlu0 %v1046_v1, %s2664_s13  ;;  %792 = vrot.lane.b32.xlu1 %v788_v3, %s2669_s21  ;;  %s2676_s13 = smov 20   ;;  %s2677_s21 = smov 27  }
 0x15b   :  { %v1210_v4 = vpop.permute.xlu2 %1209 }
 0x15c   :  { %v3254_v5 = vpop.permute.xlu0 %1175  ;;  %v1214_v6 = vsel %vm1213_vm7, %v1210_v4, %v3174_v33  ;;  %v1308_v7 = vpop.permute.xlu1 %1307  ;;  %vm900_vm7 = vcmask 97280  }
 0x15d   :  { %1216 = vst.msk [vmem:[#allocation3 + $0x158] sm:$0x3f] %vm1091_vm8, %v1214_v6  ;;  %v1312_v8 = vsel %vm1311_vm9, %v1308_v7, %v3120_v14  ;;  %v976_v6 = vld [vmem:[#allocation2 + $0x8] sm:$0x3f]  ;;  %v913_v7 = vld [vmem:[#allocation2] sm:$0x3f] }
 0x15e   :  { %1474 = vst.msk [vmem:[#allocation3 + $0x158] sm:$0x3f] %vm1320_vm10, %v3125_v19  ;;  %vm984_vm9 = vcmask 48128  }
 0x15f   :  { %1314 = vst.msk [vmem:[#allocation3 + $0x248] sm:$0x3f] %vm1091_vm8, %v1312_v8  ;;  %v872_v8 = vld [vmem:[#allocation2 + $0x10] sm:$0x3f] }
 0x160   :  { %1597 = vst.msk [vmem:[#allocation3 + $0x248] sm:$0x3f] %vm1320_vm10, %v3214_v45 }
 0x161   :  { %1253 = vrot.lane.b32.xlu2 %v1251_v10, %s2676_s13  ;;  %s2684_s13 = smov 109  }
 0x162   :  { %774 = vrot.lane.b32.xlu0 %v770_v9, %s2671_s22  ;;  %1165 = vrot.lane.b32.xlu1 %v1163_v11, %s2677_s21  ;;  %s2678_s22 = smov 58   ;;  %s2685_s21 = smov 36  }
 0x163   :  { %v721_v12 = vpop.permute.xlu2 %720 }
 0x164   :  { %v1018_v13 = vpop.permute.xlu0 %1017  ;;  %v725_v14 = vsel %vm724_vm11, %v721_v12, %v723_v51  ;;  %v3265_v15 = vpop.permute.xlu1 %940  ;;  %v1146_v12 = vld [vmem:[#allocation2] sm:$0x3f]  ;;  %vm4092_vm11 = vcmask 39936  }
 0x165   :  { %727 = vst.msk [vmem:[#allocation3 + $0x168] sm:$0x3f] %vm588_vm3, %v725_v14  ;;  %v1020_v17 = vsel %vm1019_vm12, %v3197_v39, %v1018_v13  ;;  %v1025_v13 = vld [vmem:[#allocation2] sm:$0x3f]  ;;  %v977_v14 = vld [vmem:[#allocation2 + $0x10] sm:$0x3f] }
 0x166   :  { %974 = vst.msk [vmem:[#allocation3 + $0x168] sm:$0x3f] %vm818_vm13, %v3149_v27 }
 0x167   :  { %947 = vst.msk [vmem:[#allocation3 + $0x128] sm:$0x3f] %vm820_vm5, %v3265_v15  ;;  %v1676_v18 = vld [vmem:[#allocation3 + $0x248] sm:$0xff] }
 0x168   :  { %1024 = vst.msk [vmem:[#allocation3 + $0x1d0] sm:$0x3f] %vm820_vm5, %v1020_v17  ;;  %1760 = vmatpush.msrb.mxu3 %v1676_v18 }
 0x169   :  { %1156 = vrot.lane.b32.xlu2 %v1152_v21, %s2678_s22 }
 0x16a   :  { %1158 = vrot.lane.b32.xlu0 %v1153_v20, %s2678_s22  ;;  %684 = vrot.lane.b32.xlu1 %v680_v22, %s2672_s16  ;;  %s2680_s16 = smov 51  }
 0x16b   :  { %v3278_v23 = vpop.permute.xlu2 %1052 }
 0x16c   :  { %v3280_v24 = vpop.permute.xlu0 %1422  ;;  %1059 = vst.msk [vmem:[#allocation3 + $0x218] sm:$0x3f] %vm820_vm5, %v3278_v23  ;;  %v3284_v25 = vpop.permute.xlu1 %1452 }
 0x16d   :  { %1426 = vst.msk [vmem:[#allocation3 + $0x100] sm:$0x3f] %vm1322_vm6, %v3280_v24  ;;  %v1648_v27 = vld [vmem:[#allocation3 + $0x168] sm:$0xff] }
 0x16e   :  { %1684 = vmatpush.msra.mxu0 %v1648_v27  ;;  %v662_v27 = vld [vmem:[#allocation2 + $0x8] sm:$0x3f] }
 0x171   :  { %1246 = vrot.lane.b32.xlu2 %v1241_v30, %s2680_s16 }
 0x172   :  { %1410 = vrot.lane.b32.xlu0 %v1406_v29, %s2679_s27  ;;  %1244 = vrot.lane.b32.xlu1 %v1240_v31, %s2680_s16  ;;  %v1135_v31 = vld [vmem:[#allocation2] sm:$0x3f] }
 0x173   :  { %v1285_v33 = vpop.permute.xlu2 %1284 }
 0x174   :  { %v1469_v36 = vpop.permute.xlu0 %1468  ;;  %v1289_v37 = vsel %vm1288_vm14, %v1285_v33, %v3234_v57  ;;  %v3292_v38 = vpop.permute.xlu1 %1031  ;;  %vm4094_vm14 = vcmask 908288   ;;  %v753_v33 = vld [vmem:[#allocation2 + $0x10] sm:$0x3f] }
 0x175   :  { %1291 = vst.msk [vmem:[#allocation3 + $0x218] sm:$0x3f] %vm1091_vm8, %v1289_v37  ;;  %v1471_v42 = vsel %vm1470_vm15, %v3125_v19, %v1469_v36  ;;  %v1300_v22 = vsel %vm4094_vm14, %v3199_v40, %v3155_v28  ;;  %v752_v37 = vld [vmem:[#allocation2 + $0x8] sm:$0x3f]  ;;  %vm706_vm15 = vcmask 179200   ;;  %vm921_vm14 = vcmask 859136  }
 0x176   :  { %1569 = vst.msk [vmem:[#allocation3 + $0x218] sm:$0x3f] %vm1320_vm10, %v3147_v26 }
 0x177   :  { %1038 = vst.msk [vmem:[#allocation3 + $0x1e8] sm:$0x3f] %vm820_vm5, %v3292_v38 }
 0x178   :  { %1475 = vst.msk [vmem:[#allocation3 + $0x160] sm:$0x3f] %vm1322_vm6, %v1471_v42 }
 0x179   :  { %1454 = vrot.lane.b32.xlu2 %v1449_v44, %s4089_s30  ;;  %s2687_s30 = smov 114  }
 0x17a   :  { %887 = vrot.lane.b32.xlu0 %v885_v43, %s2681_s14  ;;  %1520 = vrot.lane.b32.xlu1 %v1516_v34, %s2682_s12  ;;  %s2686_s14 = smov 13  }
 0x17b   :  { %v3303_v19 = vpop.permute.xlu2 %1575 }
 0x17c   :  { %v1192_v48 = vpop.permute.xlu0 %1191  ;;  %v1262_v49 = vpop.permute.xlu1 %1261 }
 0x17d   :  { %v1196_v51 = vsel %vm1195_vm0, %v1192_v48, %v3203_v41  ;;  %v1266_v53 = vsel %vm4091_vm1, %v1262_v49, %v3172_v32  ;;  %v990_v41 = vld [vmem:[#allocation2 + $0x10] sm:$0x3f]  ;;  %v1670_v36 = vld [vmem:[#allocation3 + $0x218] sm:$0xff]  ;;  %vm4090_vm0 = vcmask 842752   ;;  %v1224_v48 = vld [vmem:[#allocation2 + $0x8] sm:$0x3f] }
 0x17e   :  { %1198 = vst.msk [vmem:[#allocation3 + $0x128] sm:$0x3f] %vm1091_vm8, %v1196_v51  ;;  %v1223_v49 = vld [vmem:[#allocation2] sm:$0x3f]  ;;  %v1136_v51 = vld [vmem:[#allocation2 + $0x8] sm:$0x3f] }
 0x17f   :  { %1268 = vst.msk [vmem:[#allocation3 + $0x1e8] sm:$0x3f] %vm1091_vm8, %v1266_v53  ;;  %vm796_vm1 = vcmask 121856  }
 0x180   :  { %1542 = vst.msk [vmem:[#allocation3 + $0x1e8] sm:$0x3f] %vm1320_vm10, %v3236_v58 }
 0x181   :  { %1446 = vst.msk [vmem:[#allocation3 + $0x128] sm:$0x3f] %vm1320_vm10, %v3220_v47  ;;  %1401 = vrot.lane.b32.xlu2 %v1399_v55, %s2684_s13  ;;  %v674_v47 = vld [vmem:[#allocation2] sm:$0x3f]  ;;  %s2695_s13 = smov 29  }
 0x182   :  { %1511 = vrot.lane.b32.xlu0 %v1509_v54, %s2683_s20  ;;  %992 = vrot.lane.b32.xlu1 %v990_v41, %s2685_s21  ;;  %s2688_s20 = smov 121   ;;  %s2696_s21 = smov 94  }
 0x183   :  { %v3314_v32 = vpop.permute.xlu2 %794 }
 0x184   :  { %v3316_v57 = vpop.permute.xlu0 %704  ;;  %v3318_v59 = vpop.permute.xlu1 %1548 }
 0x189   :  { %766 = vrot.lane.b32.xlu2 %v764_v61, %s2687_s30  ;;  %s2689_s30 = smov 28   ;;  %v1496_v61 = vld [vmem:[#allocation2] sm:$0x3f] }
 0x18a   :  { %875 = vrot.lane.b32.xlu0 %v871_v60, %s2686_s14  ;;  %676 = vrot.lane.b32.xlu1 %v674_v47, %s2688_s20  ;;  %v1428_v60 = vld [vmem:[#allocation2 + $0x10] sm:$0x3f]  ;;  %v1386_v47 = vld [vmem:[#allocation2] sm:$0x3f]  ;;  %s4098_s20 = smov 65  }
 0x18b   :  { %v1174_v1 = vpop.permute.xlu2 %1173 }
 0x18c   :  { %v3321_v2 = vpop.permute.xlu0 %919  ;;  %v1178_v3 = vsel %vm1177_vm2, %v1174_v1, %v3254_v5  ;;  %v1483_v4 = vpop.permute.xlu1 %1482  ;;  %vm814_vm2 = vcmask 916480  }
 0x18d   :  { %926 = vst.msk [vmem:[#allocation3 + $0xf8] sm:$0x3f] %vm820_vm5, %v3321_v2 }
 0x18e   :  { %1180 = vst.msk [vmem:[#allocation3 + $0xf8] sm:$0x3f] %vm1091_vm8, %v1178_v3 }
 0x18f   :  { %1425 = vst.msk [vmem:[#allocation3 + $0xf8] sm:$0x3f] %vm1320_vm10, %v3280_v24  ;;  %v663_v24 = vld [vmem:[#allocation2 + $0x10] sm:$0x3f] }
 0x191   :  { %917 = vrot.lane.b32.xlu2 %v913_v7, %s2666_s15  ;;  %s2691_s15 = smov 59  }
 0x192   :  { %980 = vrot.lane.b32.xlu0 %v976_v6, %s2667_s19  ;;  %877 = vrot.lane.b32.xlu1 %v872_v8, %s2686_s14  ;;  %v1277_v6 = vsel %vm814_vm2, %v3130_v16, %v3243_v63  ;;  %v1379_v8 = vld [vmem:[#allocation2] sm:$0x3f]  ;;  %v1586_v16 = vld [vmem:[#allocation2 + $0x18] sm:$0x3f] }
 0x193   :  { %v3332_v5 = vpop.permute.xlu2 %686 }
 0x194   :  { %v3334_v9 = vpop.permute.xlu0 %1431  ;;  %v3336_v10 = vpop.permute.xlu1 %896 }
 0x195   :  { %v901_v11 = vsel %vm900_vm7, %v3336_v10, %v3227_v50 }
 0x196   :  { %905 = vst.msk [vmem:[#allocation3 + $0xc8] sm:$0x3f] %vm820_vm5, %v901_v11  ;;  %v864_v11 = vld [vmem:[#allocation2 + $0x10] sm:$0x3f] }
 0x199   :  { %1029 = vrot.lane.b32.xlu2 %v1025_v13, %s2663_s0  ;;  %s2690_s0 = smov 21  }
 0x19a   :  { %1148 = vrot.lane.b32.xlu0 %v1146_v12, %s2689_s30  ;;  %982 = vrot.lane.b32.xlu1 %v977_v14, %s2667_s19  ;;  %s2692_s19 = smov 52   ;;  %v1640_v12 = vld [vmem:[#allocation3 + $0x128] sm:$0xff]  ;;  %s2697_s30 = smov 90  }
 0x19b   :  { %v3344_v18 = vpop.permute.xlu2 %1062 }
 0x19c   :  { %v1481_v17 = vpop.permute.xlu0 %1480  ;;  %v3346_v20 = vpop.permute.xlu1 %1001  ;;  %1066 = vst.msk [vmem:[#allocation3 + $0x230] sm:$0x3f] %vm820_vm5, %v3344_v18 }
 0x19d   :  { %v1484_v50 = vsel %vm984_vm9, %v1481_v17, %v1483_v4  ;;  %v1006_v21 = vsel %vm4092_vm11, %v3346_v20, %v3232_v56  ;;  %1302 = vst.msk [vmem:[#allocation3 + $0x230] sm:$0x3f] %vm1091_vm8, %v1300_v22  ;;  %v1234_v56 = vld [vmem:[#allocation2] sm:$0x3f]  ;;  %v1634_v22 = vld [vmem:[#allocation3 + $0xf8] sm:$0xff]  ;;  %vm4093_vm11 = vcmask 130048  }
 0x19e   :  { %1488 = vst.msk [vmem:[#allocation3 + $0x178] sm:$0x3f] %vm1322_vm6, %v1484_v50 }
 0x19f   :  { %1010 = vst.msk [vmem:[#allocation3 + $0x1b8] sm:$0x3f] %vm820_vm5, %v1006_v21 }
 0x1a0   :  { %1583 = vst.msk [vmem:[#allocation3 + $0x230] sm:$0x3f] %vm1320_vm10, %v3303_v19 }
 0x1a1   :  { %666 = vrot.lane.b32.xlu2 %v662_v27, %s2678_s22  ;;  %v1664_v27 = vld [vmem:[#allocation3 + $0x1e8] sm:$0xff] }
 0x1a2   :  { %668 = vrot.lane.b32.xlu0 %v663_v24, %s2678_s22  ;;  %1236 = vrot.lane.b32.xlu1 %v1234_v56, %s2690_s0  ;;  %v746_v56 = vld [vmem:[#allocation2 + $0x10] sm:$0x3f] }
 0x1a3   :  { %v960_v29 = vpop.permute.xlu2 %959 }
 0x1a4   :  { %v3365_v30 = vpop.permute.xlu0 %929  ;;  %v3367_v28 = vpop.permute.xlu1 %776  ;;  %v964_v34 = vsel %vm4090_vm0, %v960_v29, %v3247_v0  ;;  %vm1075_vm0 = vcmask 785408   ;;  %v656_v29 = vld [vmem:[#allocation2 + $0x10] sm:$0x3f] }
 0x1a5   :  { %933 = vst.msk [vmem:[#allocation3 + $0x110] sm:$0x3f] %vm820_vm5, %v3365_v30 }
 0x1a6   :  { %1186 = vst.msk [vmem:[#allocation3 + $0x110] sm:$0x3f] %vm1091_vm8, %v3229_v52 }
 0x1a7   :  { %1439 = vst.msk [vmem:[#allocation3 + $0x110] sm:$0x3f] %vm1320_vm10, %v3334_v9  ;;  %v1673_v40 = vld [vmem:[#allocation3 + $0x230] sm:$0xff] }
 0x1a8   :  { %1761 = vmatpush.msrb.mxu3 %v1673_v40 }
 0x1a9   :  { %758 = vrot.lane.b32.xlu2 %v753_v33, %s2680_s16 }
 0x1aa   :  { %1139 = vrot.lane.b32.xlu0 %v1135_v31, %s2691_s15  ;;  %1762 = vmatpush.msrb.mxu3 %v1670_v36 }
 0x1ab   :  { %756 = vrot.lane.b32.xlu1 %v752_v37, %s2680_s16  ;;  %v703_v42 = vpop.permute.xlu2 %702  ;;  %s2694_s16 = smov 44  }
 0x1ac   :  { %v713_v52 = vpop.permute.xlu0 %712  ;;  %v1220_v43 = vpop.permute.xlu1 %1219  ;;  %v707_v44 = vsel %vm706_vm15, %v703_v42, %v3316_v57  ;;  %v1646_v57 = vld [vmem:[#allocation3 + $0x158] sm:$0xff]  ;;  %vm942_vm15 = vcmask 850944   ;;  %v644_v42 = vld [vmem:[#allocation2 + $0x8] sm:$0x3f] }
 0x1ad   :  { %715 = vst.msk [vmem:[#allocation3 + $0x150] sm:$0x3f] %vm588_vm3, %v713_v52 }
 0x1ae   :  { %1222 = vst.msk [vmem:[#allocation3 + $0x170] sm:$0x3f] %vm1091_vm8, %v1220_v43  ;;  %v1637_v63 = vld [vmem:[#allocation3 + $0x110] sm:$0xff] }
 0x1af   :  { %1487 = vst.msk [vmem:[#allocation3 + $0x170] sm:$0x3f] %vm1320_vm10, %v1481_v17  ;;  %v1572_v43 = vld [vmem:[#allocation2 + $0x10] sm:$0x3f] }
 0x1b0   :  { %967 = vst.msk [vmem:[#allocation3 + $0x150] sm:$0x3f] %vm818_vm13, %v964_v34 }
 0x1b1   :  { %709 = vst.msk [vmem:[#allocation3 + $0x138] sm:$0x3f] %vm588_vm3, %v707_v44  ;;  %1227 = vrot.lane.b32.xlu2 %v1223_v49, %s2692_s19  ;;  %v1129_v44 = vld [vmem:[#allocation2] sm:$0x3f] }
 0x1b2   :  { %1229 = vrot.lane.b32.xlu0 %v1224_v48, %s2692_s19 }
 0x1b3   :  { %1141 = vrot.lane.b32.xlu1 %v1136_v51, %s2691_s15  ;;  %v695_v54 = vpop.permute.xlu2 %694 }
 0x1b4   :  { %v1072_v53 = vpop.permute.xlu0 %1071  ;;  %v951_v55 = vpop.permute.xlu1 %950  ;;  %697 = vst.msk [vmem:[#allocation3 + $0x120] sm:$0x3f] %vm588_vm3, %v695_v54  ;;  %v734_v54 = vld [vmem:[#allocation2 + $0x8] sm:$0x3f] }
 0x1b5   :  { %953 = vst.msk [vmem:[#allocation3 + $0x138] sm:$0x3f] %vm818_vm13, %v951_v55  ;;  %v1076_v21 = vsel %vm1075_vm0, %v1072_v53, %v3241_v62  ;;  %v735_v53 = vld [vmem:[#allocation2 + $0x10] sm:$0x3f] }
 0x1b6   :  { %v1649_v0 = vld [vmem:[#allocation3 + $0x170] sm:$0xff]  ;;  %954 = vst.msk [vmem:[#allocation3 + $0x140] sm:$0x3f] %vm820_vm5, %v951_v55 }
 0x1b7   :  { %v1645_v41 = vld [vmem:[#allocation3 + $0x150] sm:$0xff]  ;;  %1730 = vmatpush.msrb.mxu2 %v1649_v0  ;;  %1204 = vst.msk [vmem:[#allocation3 + $0x140] sm:$0x3f] %vm1091_vm8, %v3178_v35 }
 0x1b8   :  { %1685 = vmatpush.msra.mxu0 %v1645_v41  ;;  %1460 = vst.msk [vmem:[#allocation3 + $0x140] sm:$0x3f] %vm1320_vm10, %v3284_v25 }
 0x1b9   :  { %1731 = vmatpush.msrb.mxu2 %v1646_v57  ;;  %1500 = vrot.lane.b32.xlu2 %v1496_v61, %s2658_s28  ;;  %v1118_v61 = vld [vmem:[#allocation2 + $0x10] sm:$0x3f] }
 0x1ba   :  { %1433 = vrot.lane.b32.xlu0 %v1428_v60, %s2654_s24  ;;  %s2693_s24 = smov 110  }
 0x1bb   :  { %1390 = vrot.lane.b32.xlu1 %v1386_v47, %s2656_s26  ;;  %v1254_v3 = vpop.permute.xlu2 %1253  ;;  %v1117_v47 = vld [vmem:[#allocation2 + $0x8] sm:$0x3f] }
 0x1bc   :  { %v785_v1 = vpop.permute.xlu0 %784  ;;  %v3399_v4 = vpop.permute.xlu1 %1041  ;;  %v1642_v35 = vld [vmem:[#allocation3 + $0x138] sm:$0xff]  ;;  %1256 = vst.msk [vmem:[#allocation3 + $0x1d0] sm:$0x3f] %vm1091_vm8, %v1254_v3 }
 0x1bd   :  { %787 = vst.msk [vmem:[#allocation3 + $0x210] sm:$0x3f] %vm588_vm3, %v785_v1  ;;  %1686 = vmatpush.msra.mxu0 %v1642_v35  ;;  %v851_v1 = vld [vmem:[#allocation2 + $0x8] sm:$0x3f] }
 0x1be   :  { %1045 = vst.msk [vmem:[#allocation3 + $0x200] sm:$0x3f] %vm820_vm5, %v3399_v4 }
 0x1bf   :  { %1279 = vst.msk [vmem:[#allocation3 + $0x200] sm:$0x3f] %vm1091_vm8, %v1277_v6  ;;  %v1643_v7 = vld [vmem:[#allocation3 + $0x140] sm:$0xff]  ;;  %v1558_v6 = vld [vmem:[#allocation2 + $0x18] sm:$0x3f] }
 0x1c0   :  { %1555 = vst.msk [vmem:[#allocation3 + $0x200] sm:$0x3f] %vm1320_vm10, %v3318_v59  ;;  %1732 = vmatpush.msrb.mxu2 %v1643_v7  ;;  %v1407_v7 = vld [vmem:[#allocation2 + $0x8] sm:$0x3f] }
 0x1c1   :  { %866 = vrot.lane.b32.xlu2 %v864_v11, %s2694_s16  ;;  %s2699_s16 = smov 125  }
 0x1c2   :  { %1381 = vrot.lane.b32.xlu0 %v1379_v8, %s2693_s24  ;;  %1733 = vmatpush.msrb.mxu2 %v1640_v12  ;;  %v1366_v8 = vld [vmem:[#allocation2] sm:$0x3f] }
 0x1c3   :  { %1591 = vrot.lane.b32.xlu1 %v1586_v16, %s2646_s1  ;;  %v3413_v14 = vpop.permute.xlu2 %1156  ;;  %s4096_s1 = smov 89  }
 0x1c4   :  { %v939_v13 = vpop.permute.xlu0 %938  ;;  %1734 = vmatpush.msrb.mxu2 %v1637_v63  ;;  %v803_v17 = vpop.permute.xlu1 %802 }
 0x1c5   :  { %v943_v50 = vsel %vm942_vm15, %v939_v13, %v3265_v15  ;;  %805 = vst.msk [vmem:[#allocation3 + $0x240] sm:$0x3f] %vm588_vm3, %v803_v17  ;;  %v1489_v15 = vld [vmem:[#allocation2] sm:$0x3f]  ;;  %vm1054_vm15 = vcmask 793600  }
 0x1c6   :  { %1079 = vst.msk [vmem:[#allocation3 + $0x240] sm:$0x3f] %vm818_vm13, %v1076_v21  ;;  %1735 = vmatpush.msrb.mxu2 %v1634_v22  ;;  %v1359_v17 = vld [vmem:[#allocation2 + $0x10] sm:$0x3f] }
 0x1c7   :  { %v1667_v24 = vld [vmem:[#allocation3 + $0x200] sm:$0xff]  ;;  %946 = vst.msk [vmem:[#allocation3 + $0x120] sm:$0x3f] %vm818_vm13, %v943_v50 }
 0x1c8   :  { %1763 = vmatpush.msrb.mxu3 %v1667_v24  ;;  %v843_v50 = vld [vmem:[#allocation2] sm:$0x3f] }
 0x1c9   :  { %658 = vrot.lane.b32.xlu2 %v656_v29, %s4096_s1  ;;  %v1545_v29 = vld [vmem:[#allocation2 + $0x10] sm:$0x3f]  ;;  %s2700_s1 = smov 83  }
 0x1ca   :  { %1764 = vmatpush.msrb.mxu3 %v1664_v27  ;;  %748 = vrot.lane.b32.xlu0 %v746_v56, %s2648_s18  ;;  %s4097_s18 = smov 34  }
 0x1cb   :  { %1491 = vrot.lane.b32.xlu1 %v1489_v15, %s2655_s25  ;;  %v3424_v40 = vpop.permute.xlu2 %1246  ;;  %v1111_v15 = vld [vmem:[#allocation2 + $0x10] sm:$0x3f] }
 0x1cc   :  { %v1051_v62 = vpop.permute.xlu0 %1050  ;;  %v793_v31 = vpop.permute.xlu1 %792 }
 0x1cd   :  { %v1055_v33 = vsel %vm1054_vm15, %v1051_v62, %v3278_v23  ;;  %v797_v36 = vsel %vm796_vm1, %v793_v31, %v3314_v32  ;;  %v1675_v37 = vld [vmem:[#allocation3 + $0x240] sm:$0xff]  ;;  %vm1456_vm1 = vcmask 334848   ;;  %vm4095_vm15 = vcmask 474112   ;;  %v728_v62 = vld [vmem:[#allocation2 + $0x10] sm:$0x3f] }
 0x1ce   :  { %1058 = vst.msk [vmem:[#allocation3 + $0x210] sm:$0x3f] %vm818_vm13, %v1055_v33  ;;  %v1639_v52 = vld [vmem:[#allocation3 + $0x120] sm:$0xff]  ;;  %1714 = vmatpush.msra.mxu1 %v1675_v37 }
 0x1cf   :  { %799 = vst.msk [vmem:[#allocation3 + $0x228] sm:$0x3f] %vm588_vm3, %v797_v36  ;;  %1687 = vmatpush.msra.mxu0 %v1639_v52  ;;  %v830_v52 = vld [vmem:[#allocation2 + $0x8] sm:$0x3f] }
 0x1d0   :  { %1065 = vst.msk [vmem:[#allocation3 + $0x228] sm:$0x3f] %vm818_vm13, %v3344_v18 }
 0x1d1   :  { %1577 = vrot.lane.b32.xlu2 %v1572_v43, %s4097_s18  ;;  %s4101_s18 = smov 111   ;;  %v626_v43 = vld [vmem:[#allocation2 + $0x8] sm:$0x3f] }
 0x1d2   :  { %648 = vrot.lane.b32.xlu0 %v644_v42, %s2691_s15  ;;  %v627_v42 = vld [vmem:[#allocation2 + $0x10] sm:$0x3f] }
 0x1d3   :  { %1131 = vrot.lane.b32.xlu1 %v1129_v44, %s2695_s13  ;;  %v1455_v32 = vpop.permute.xlu2 %1454 }
 0x1d4   :  { %v775_v23 = vpop.permute.xlu0 %774  ;;  %v1166_v34 = vpop.permute.xlu1 %1165  ;;  %v1457_v18 = vsel %vm1456_vm1, %v3284_v25, %v1455_v32  ;;  %vm688_vm1 = vcmask 187392  }
 0x1d5   :  { %v779_v48 = vsel %vm4093_vm11, %v775_v23, %v3367_v28  ;;  %1168 = vst.msk [vmem:[#allocation3 + $0xe0] sm:$0x3f] %vm1091_vm8, %v1166_v34  ;;  %v1669_v51 = vld [vmem:[#allocation3 + $0x210] sm:$0xff]  ;;  %vm760_vm11 = vcmask 416768  }
 0x1d6   :  { %781 = vst.msk [vmem:[#allocation3 + $0x1f8] sm:$0x3f] %vm588_vm3, %v779_v48  ;;  %v645_v28 = vld [vmem:[#allocation2 + $0x10] sm:$0x3f]  ;;  %v1345_v48 = vld [vmem:[#allocation2 + $0x8] sm:$0x3f] }
 0x1d7   :  { %v1672_v49 = vld [vmem:[#allocation3 + $0x228] sm:$0xff]  ;;  %1044 = vst.msk [vmem:[#allocation3 + $0x1f8] sm:$0x3f] %vm818_vm13, %v3399_v4 }
 0x1d8   :  { %1715 = vmatpush.msra.mxu1 %v1672_v49  ;;  %1461 = vst.msk [vmem:[#allocation3 + $0x148] sm:$0x3f] %vm1322_vm6, %v1457_v18  ;;  %v1100_v18 = vld [vmem:[#allocation2 + $0x10] sm:$0x3f]  ;;  %v1099_v49 = vld [vmem:[#allocation2 + $0x8] sm:$0x3f] }
 0x1d9   :  { %738 = vrot.lane.b32.xlu2 %v734_v54, %s2692_s19 }
 0x1da   :  { %1716 = vmatpush.msra.mxu1 %v1669_v51  ;;  %740 = vrot.lane.b32.xlu0 %v735_v53, %s2692_s19  ;;  %s4100_s19 = smov 35  }
 0x1db   :  { %650 = vrot.lane.b32.xlu1 %v645_v28, %s2691_s15  ;;  %v1402_v55 = vpop.permute.xlu2 %1401  ;;  %s4099_s15 = smov 80  }
 0x1dc   :  { %v1159_v25 = vpop.permute.xlu0 %1158  ;;  %1405 = vst.msk [vmem:[#allocation3 + $0xd0] sm:$0x3f] %vm1322_vm6, %v1402_v55  ;;  %v685_v41 = vpop.permute.xlu1 %684 }
 0x1dd   :  { %v1160_v0 = vsel %vm4095_vm15, %v3413_v14, %v1159_v25  ;;  %v689_v57 = vsel %vm688_vm1, %v685_v41, %v3332_v5  ;;  %v638_v14 = vld [vmem:[#allocation2 + $0x10] sm:$0x3f]  ;;  %vm1033_vm1 = vcmask 801792   ;;  %v822_v25 = vld [vmem:[#allocation2] sm:$0x3f] }
 0x1de   :  { %1162 = vst.msk [vmem:[#allocation3 + $0xc8] sm:$0x3f] %vm1091_vm8, %v1160_v0  ;;  %v1666_v60 = vld [vmem:[#allocation3 + $0x1f8] sm:$0xff]  ;;  %v1387_v0 = vld [vmem:[#allocation2 + $0x8] sm:$0x3f] }
 0x1df   :  { %1404 = vst.msk [vmem:[#allocation3 + $0xc8] sm:$0x3f] %vm1320_vm10, %v1402_v55  ;;  %1717 = vmatpush.msra.mxu1 %v1666_v60  ;;  %v1531_v55 = vld [vmem:[#allocation2 + $0x18] sm:$0x3f] }
 0x1e0   :  { %691 = vst.msk [vmem:[#allocation3 + $0x108] sm:$0x3f] %vm588_vm3, %v689_v57 }
 0x1e1   :  { %932 = vst.msk [vmem:[#allocation3 + $0x108] sm:$0x3f] %vm818_vm13, %v3365_v30  ;;  %1121 = vrot.lane.b32.xlu2 %v1117_v47, %s2696_s21  ;;  %v850_v47 = vld [vmem:[#allocation2] sm:$0x3f] }
 0x1e2   :  { %1123 = vrot.lane.b32.xlu0 %v1118_v61, %s2696_s21  ;;  %s2701_s21 = smov 60  }
 0x1e3   :  { %856 = vrot.lane.b32.xlu1 %v851_v1, %s2693_s24  ;;  %v767_v5 = vpop.permute.xlu2 %766  ;;  %v1338_v1 = vld [vmem:[#allocation2 + $0x10] sm:$0x3f] }
 0x1e4   :  { %v3456_v3 = vpop.permute.xlu0 %1410  ;;  %v1245_v4 = vpop.permute.xlu1 %1244  ;;  %769 = vst.msk [vmem:[#allocation3 + $0x1e0] sm:$0x3f] %vm588_vm3, %v767_v5  ;;  %v620_v5 = vld [vmem:[#allocation2] sm:$0x3f] }
 0x1e5   :  { %1418 = vst.msk [vmem:[#allocation3 + $0xe0] sm:$0x3f] %vm1320_vm10, %v3456_v3  ;;  %v1248_v30 = vsel %vm760_vm11, %v1245_v4, %v3424_v40 }
 0x1e6   :  { %1250 = vst.msk [vmem:[#allocation3 + $0x1b8] sm:$0x3f] %vm1091_vm8, %v1248_v30  ;;  %v1628_v13 = vld [vmem:[#allocation3 + $0xc8] sm:$0xff] }
 0x1e8   :  { %v1636_v35 = vld [vmem:[#allocation3 + $0x108] sm:$0xff] }
 0x1e9   :  { %1688 = vmatpush.msra.mxu0 %v1636_v35  ;;  %1412 = vrot.lane.b32.xlu2 %v1407_v7, %s2679_s27  ;;  %s2698_s27 = smov 78  }
 0x1ea   :  { %1563 = vrot.lane.b32.xlu0 %v1558_v6, %s4098_s20  ;;  %s2702_s20 = smov 48  }
 0x1eb   :  { %1370 = vrot.lane.b32.xlu1 %v1366_v8, %s2686_s14  ;;  %v918_v12 = vpop.permute.xlu2 %917  ;;  %v608_v8 = vld [vmem:[#allocation2] sm:$0x3f] }
 0x1ec   :  { %v3467_v11 = vpop.permute.xlu0 %887  ;;  %v1631_v16 = vld [vmem:[#allocation3 + $0xe0] sm:$0xff]  ;;  %v3471_v63 = vpop.permute.xlu1 %1520  ;;  %v922_v36 = vsel %vm921_vm14, %v918_v12, %v3321_v2  ;;  %v1093_v12 = vld [vmem:[#allocation2 + $0x10] sm:$0x3f]  ;;  %vm652_vm14 = vcmask 482304  }
 0x1ed   :  { %891 = vst.msk [vmem:[#allocation3 + $0xb0] sm:$0x3f] %vm820_vm5, %v3467_v11  ;;  %1736 = vmatpush.msrb.mxu2 %v1631_v16  ;;  %v1517_v16 = vld [vmem:[#allocation2 + $0x8] sm:$0x3f] }
 0x1ee   :  { %1528 = vst.msk [vmem:[#allocation3 + $0x1d0] sm:$0x3f] %vm1320_vm10, %v3471_v63 }
 0x1ef   :  { %1737 = vmatpush.msrb.mxu2 %v1628_v13 }
 0x1f1   :  { %1361 = vrot.lane.b32.xlu2 %v1359_v17, %s2698_s27 }
 0x1f2   :  { %640 = vrot.lane.b32.xlu0 %v638_v14, %s2697_s30  ;;  %s2703_s30 = smov 95  }
 0x1f3   :  { %845 = vrot.lane.b32.xlu1 %v843_v50, %s4099_s15  ;;  %v1030_v22 = vpop.permute.xlu2 %1029 }
 0x1f4   :  { %v1512_v21 = vpop.permute.xlu0 %1511  ;;  %v1034_v24 = vsel %vm1033_vm1, %v1030_v22, %v3292_v38  ;;  %v3479_v27 = vpop.permute.xlu1 %992  ;;  %vm879_vm1 = vcmask 105472   ;;  %v1081_v22 = vld [vmem:[#allocation2 + $0x8] sm:$0x3f] }
 0x1f5   :  { %1514 = vst.msk [vmem:[#allocation3 + $0x1b8] sm:$0x3f] %vm1320_vm10, %v1512_v21  ;;  %v1661_v56 = vld [vmem:[#allocation3 + $0x1d0] sm:$0xff] }
 0x1f6   :  { %1515 = vst.msk [vmem:[#allocation3 + $0x1c0] sm:$0x3f] %vm1322_vm6, %v1512_v21  ;;  %1765 = vmatpush.msrb.mxu3 %v1661_v56  ;;  %v807_v56 = vld [vmem:[#allocation2 + $0x8] sm:$0x3f] }
 0x1f7   :  { %1037 = vst.msk [vmem:[#allocation3 + $0x1e0] sm:$0x3f] %vm818_vm13, %v1034_v24  ;;  %v609_v24 = vld [vmem:[#allocation2 + $0x8] sm:$0x3f] }
 0x1f8   :  { %996 = vst.msk [vmem:[#allocation3 + $0x1a0] sm:$0x3f] %vm820_vm5, %v3479_v27 }
 0x1f9   :  { %1113 = vrot.lane.b32.xlu2 %v1111_v15, %s2699_s16  ;;  %s2704_s16 = smov 79  }
 0x1fa   :  { %1550 = vrot.lane.b32.xlu0 %v1545_v29, %s4100_s19  ;;  %s4102_s19 = smov 81  }
 0x1fb   :  { %730 = vrot.lane.b32.xlu1 %v728_v62, %s2700_s1  ;;  %v667_v40 = vpop.permute.xlu2 %666 }
 0x1fc   :  { %v3487_v38 = vpop.permute.xlu0 %875  ;;  %v1658_v31 = vld [vmem:[#allocation3 + $0x1b8] sm:$0xff]  ;;  %v677_v33 = vpop.permute.xlu1 %676 }
 0x1fd   :  { %1766 = vmatpush.msrb.mxu3 %v1658_v31  ;;  %679 = vst.msk [vmem:[#allocation3 + $0xf0] sm:$0x3f] %vm588_vm3, %v677_v33  ;;  %v1367_v33 = vld [vmem:[#allocation2 + $0x8] sm:$0x3f] }
 0x1fe   :  { %v1663_v37 = vld [vmem:[#allocation3 + $0x1e0] sm:$0xff]  ;;  %925 = vst.msk [vmem:[#allocation3 + $0xf0] sm:$0x3f] %vm818_vm13, %v922_v36  ;;  %v1082_v36 = vld [vmem:[#allocation2 + $0x10] sm:$0x3f] }
 0x1ff   :  { %1718 = vmatpush.msra.mxu1 %v1663_v37  ;;  %v1324_v37 = vld [vmem:[#allocation2 + $0x8] sm:$0x3f] }
 0x201   :  { %632 = vrot.lane.b32.xlu2 %v627_v42, %s2701_s21 }
 0x202   :  { %835 = vrot.lane.b32.xlu0 %v830_v52, %s4101_s18 }
 0x203   :  { %630 = vrot.lane.b32.xlu1 %v626_v43, %s2701_s21  ;;  %v759_v23 = vpop.permute.xlu2 %758  ;;  %s2705_s21 = smov 126  }
 0x204   :  { %v3493_v44 = vpop.permute.xlu0 %980  ;;  %v878_v32 = vpop.permute.xlu1 %877 }
 0x205   :  { %v880_v2 = vsel %vm879_vm1, %v3487_v38, %v878_v32  ;;  %v1633_v34 = vld [vmem:[#allocation3 + $0xf0] sm:$0xff] }
 0x206   :  { %884 = vst.msk [vmem:[#allocation3 + $0x98] sm:$0x3f] %vm820_vm5, %v880_v2  ;;  %1689 = vmatpush.msra.mxu0 %v1633_v34  ;;  %v1315_v32 = vld [vmem:[#allocation2 + $0x10] sm:$0x3f]  ;;  %v602_v2 = vld [vmem:[#allocation2] sm:$0x3f] }
 0x209   :  { %1105 = vrot.lane.b32.xlu2 %v1100_v18, %s2703_s30 }
 0x20a   :  { %1349 = vrot.lane.b32.xlu0 %v1345_v48, %s2702_s20 }
 0x20b   :  { %1103 = vrot.lane.b32.xlu1 %v1099_v49, %s2703_s30  ;;  %v1228_v53 = vpop.permute.xlu2 %1227  ;;  %s2711_s30 = smov 10  }
 0x20c   :  { %v1149_v51 = vpop.permute.xlu0 %1148  ;;  %v983_v54 = vpop.permute.xlu1 %982 }
 0x20d   :  { %1151 = vst.msk [vmem:[#allocation3 + $0xb0] sm:$0x3f] %vm1091_vm8, %v1149_v51  ;;  %v985_v28 = vsel %vm984_vm9, %v3493_v44, %v983_v54  ;;  %vm742_vm9 = vcmask 424960   ;;  %v1497_v51 = vld [vmem:[#allocation2 + $0x8] sm:$0x3f] }
 0x20e   :  { %989 = vst.msk [vmem:[#allocation3 + $0x188] sm:$0x3f] %vm820_vm5, %v985_v28 }
 0x211   :  { %1536 = vrot.lane.b32.xlu2 %v1531_v55, %s2653_s23 }
 0x212   :  { %824 = vrot.lane.b32.xlu0 %v822_v25, %s4102_s19  ;;  %s2713_s19 = smov 99  }
 0x213   :  { %1392 = vrot.lane.b32.xlu1 %v1387_v0, %s2656_s26  ;;  %v3506_v57 = vpop.permute.xlu2 %1500 }
 0x214   :  { %v669_v41 = vpop.permute.xlu0 %668  ;;  %v1237_v61 = vpop.permute.xlu1 %1236 }
 0x215   :  { %v671_v60 = vsel %vm4095_vm15, %v667_v40, %v669_v41  ;;  %1239 = vst.msk [vmem:[#allocation3 + $0x1a0] sm:$0x3f] %vm1091_vm8, %v1237_v61  ;;  %vm1579_vm15 = vcmask 277504   ;;  %v1325_v61 = vld [vmem:[#allocation2 + $0x10] sm:$0x3f] }
 0x216   :  { %673 = vst.msk [vmem:[#allocation3 + $0xd8] sm:$0x3f] %vm588_vm3, %v671_v60 }
 0x217   :  { %911 = vst.msk [vmem:[#allocation3 + $0xd8] sm:$0x3f] %vm818_vm13, %v3216_v46 }
 0x218   :  { %1507 = vst.msk [vmem:[#allocation3 + $0x1a0] sm:$0x3f] %vm1320_vm10, %v3506_v57 }
 0x219   :  { %622 = vrot.lane.b32.xlu2 %v620_v5, %s2705_s21 }
 0x21a   :  { %854 = vrot.lane.b32.xlu0 %v850_v47, %s2693_s24  ;;  %s2706_s24 = smov 49   ;;  %v1346_v47 = vld [vmem:[#allocation2 + $0x10] sm:$0x3f] }
 0x21b   :  { %1340 = vrot.lane.b32.xlu1 %v1338_v1, %s2704_s16  ;;  %v3517_v30 = vpop.permute.xlu2 %866  ;;  %v806_v1 = vld [vmem:[#allocation2] sm:$0x3f] }
 0x21c   :  { %v1140_v4 = vpop.permute.xlu0 %1139  ;;  %870 = vst.msk [vmem:[#allocation3 + $0x80] sm:$0x3f] %vm820_vm5, %v3517_v30 }
 0x21d   :  { %v757_v46 = vpop.permute.xlu1 %756 }
 0x21e   :  { %v761_v35 = vsel %vm760_vm11, %v757_v46, %v759_v23  ;;  %v1630_v6 = vld [vmem:[#allocation3 + $0xd8] sm:$0xff]  ;;  %vm1435_vm11 = vcmask 343040   ;;  %v829_v23 = vld [vmem:[#allocation2] sm:$0x3f] }
 0x21f   :  { %763 = vst.msk [vmem:[#allocation3 + $0x1c8] sm:$0x3f] %vm588_vm3, %v761_v35  ;;  %1690 = vmatpush.msra.mxu0 %v1630_v6  ;;  %v1655_v7 = vld [vmem:[#allocation3 + $0x1a0] sm:$0xff]  ;;  %v1878_v6 = vld [vmem:[%s4069_s4] sm:$0xff] }
 0x220   :  { %1023 = vst.msk [vmem:[#allocation3 + $0x1c8] sm:$0x3f] %vm818_vm13, %v3197_v39  ;;  %1767 = vmatpush.msrb.mxu3 %v1655_v7 }
 0x221   :  { %1522 = vrot.lane.b32.xlu2 %v1517_v16, %s2682_s12 }
 0x222   :  { %612 = vrot.lane.b32.xlu0 %v608_v8, %s2695_s13 }
 0x223   :  { %1095 = vrot.lane.b32.xlu1 %v1093_v12, %s2705_s21  ;;  %v659_v17 = vpop.permute.xlu2 %658  ;;  %s2714_s21 = smov 33  }
 0x224   :  { %v1230_v13 = vpop.permute.xlu0 %1229  ;;  %661 = vst.msk [vmem:[#allocation3 + $0xc0] sm:$0x3f] %vm588_vm3, %v659_v17 }
 0x225   :  { %v1231_v14 = vsel %vm742_vm9, %v1228_v53, %v1230_v13  ;;  %v1142_v50 = vpop.permute.xlu1 %1141  ;;  %904 = vst.msk [vmem:[#allocation3 + $0xc0] sm:$0x3f] %vm818_vm13, %v3336_v10  ;;  %v590_v53 = vld [vmem:[#allocation2] sm:$0x3f] }
 0x226   :  { %1233 = vst.msk [vmem:[#allocation3 + $0x188] sm:$0x3f] %vm1091_vm8, %v1231_v14  ;;  %v1143_v39 = vsel %vm652_vm14, %v1140_v4, %v1142_v50  ;;  %v1879_v13 = vld [vmem:[%s4069_s4 + $0x8] sm:$0xff]  ;;  %s2712_s4 = smov 50  }
 0x227   :  { %v1660_v21 = vld [vmem:[#allocation3 + $0x1c8] sm:$0xff]  ;;  %1145 = vst.msk [vmem:[#allocation3 + $0x98] sm:$0x3f] %vm1091_vm8, %v1143_v39 }
 0x228   :  { %1719 = vmatpush.msra.mxu1 %v1660_v21 }
 0x229   :  { %812 = vrot.lane.b32.xlu2 %v807_v56, %s2643_s2 }
 0x22a   :  { %1085 = vrot.lane.b32.xlu0 %v1081_v22, %s2660_s17 }
 0x22b   :  { %614 = vrot.lane.b32.xlu1 %v609_v24, %s2695_s13  ;;  %v1578_v62 = vpop.permute.xlu2 %1577 }
 0x22c   :  { %v1434_v29 = vpop.permute.xlu0 %1433  ;;  %v1580_v10 = vsel %vm1579_vm15, %v3303_v19, %v1578_v62  ;;  %v1627_v31 = vld [vmem:[#allocation3 + $0xc0] sm:$0xff]  ;;  %vm1414_vm15 = vcmask 89088  }
 0x22d   :  { %v1436_v15 = vsel %vm1435_vm11, %v3334_v9, %v1434_v29  ;;  %v3538_v40 = vpop.permute.xlu1 %1390  ;;  %1584 = vst.msk [vmem:[#allocation3 + $0x238] sm:$0x3f] %vm1322_vm6, %v1580_v10  ;;  %1691 = vmatpush.msra.mxu0 %v1627_v31  ;;  %vm1593_vm11 = vcmask 523264  }
 0x22e   :  { %1440 = vst.msk [vmem:[#allocation3 + $0x118] sm:$0x3f] %vm1322_vm6, %v1436_v15 }
 0x22f   :  { %1397 = vst.msk [vmem:[#allocation3 + $0xb0] sm:$0x3f] %vm1320_vm10, %v3538_v40 }
 0x231   :  { %1328 = vrot.lane.b32.xlu2 %v1324_v37, %s2706_s24 }
 0x232   :  { %1372 = vrot.lane.b32.xlu0 %v1367_v33, %s2686_s14  ;;  %s2708_s14 = smov 30  }
 0x233   :  { %1087 = vrot.lane.b32.xlu1 %v1082_v36, %s2660_s17  ;;  %v739_v19 = vpop.permute.xlu2 %738  ;;  %s2707_s17 = smov 127  }
 0x234   :  { %v1382_v9 = vpop.permute.xlu0 %1381  ;;  %v1674_v60 = vld [vmem:[#allocation3 + $0x238] sm:$0xff] }
 0x235   :  { %1384 = vst.msk [vmem:[#allocation3 + $0x98] sm:$0x3f] %vm1320_vm10, %v1382_v9  ;;  %v1592_v52 = vpop.permute.xlu1 %1591 }
 0x236   :  { %1385 = vst.msk [vmem:[#allocation3 + $0xa0] sm:$0x3f] %vm1322_vm6, %v1382_v9  ;;  %v1594_v42 = vsel %vm1593_vm11, %v3214_v45, %v1592_v52  ;;  %v1625_v43 = vld [vmem:[#allocation3 + $0xb0] sm:$0xff]  ;;  %v591_v45 = vld [vmem:[#allocation2 + $0x8] sm:$0x3f]  ;;  %vm1538_vm11 = vcmask 539648  }
 0x237   :  { %1598 = vst.msk [vmem:[#allocation3 + $0x250] sm:$0x3f] %vm1322_vm6, %v1594_v42  ;;  %1738 = vmatpush.msrb.mxu2 %v1625_v43  ;;  %v1650_v52 = vld [vmem:[#allocation3 + $0x178] sm:$0xff]  ;;  %v1647_v42 = vld [vmem:[#allocation3 + $0x160] sm:$0xff] }
 0x239   :  { %604 = vrot.lane.b32.xlu2 %v602_v2, %s2707_s17  ;;  %s4107_s17 = smov 37  }
 0x23a   :  { %833 = vrot.lane.b32.xlu0 %v829_v23, %s4101_s18  ;;  %v1644_v23 = vld [vmem:[#allocation3 + $0x148] sm:$0xff] }
 0x23b   :  { %1317 = vrot.lane.b32.xlu1 %v1315_v32, %s4099_s15  ;;  %v1122_v18 = vpop.permute.xlu2 %1121  ;;  %s2722_s15 = smov 62  }
 0x23c   :  { %v749_v34 = vpop.permute.xlu0 %748  ;;  %v1622_v48 = vld [vmem:[#allocation3 + $0x98] sm:$0xff] }
 0x23d   :  { %751 = vst.msk [vmem:[#allocation3 + $0x1b0] sm:$0x3f] %vm588_vm3, %v749_v34  ;;  %v1492_v49 = vpop.permute.xlu1 %1491  ;;  %1739 = vmatpush.msrb.mxu2 %v1622_v48  ;;  %v1641_v48 = vld [vmem:[#allocation3 + $0x130] sm:$0xff] }
 0x23e   :  { %1009 = vst.msk [vmem:[#allocation3 + $0x1b0] sm:$0x3f] %vm818_vm13, %v3346_v20  ;;  %v1677_v41 = vld [vmem:[#allocation3 + $0x250] sm:$0xff] }
 0x23f   :  { %1494 = vst.msk [vmem:[#allocation3 + $0x188] sm:$0x3f] %vm1320_vm10, %v1492_v49 }
 0x240   :  { %1495 = vst.msk [vmem:[#allocation3 + $0x190] sm:$0x3f] %vm1322_vm6, %v1492_v49  ;;  %v1638_v49 = vld [vmem:[#allocation3 + $0x118] sm:$0xff] }
 0x241   :  { %594 = vrot.lane.b32.xlu2 %v590_v53, %s2708_s14 }
 0x242   :  { %596 = vrot.lane.b32.xlu0 %v591_v45, %s2708_s14  ;;  %v1635_v45 = vld [vmem:[#allocation3 + $0x100] sm:$0xff]  ;;  %s2721_s14 = smov 25  }
 0x243   :  { %1502 = vrot.lane.b32.xlu1 %v1497_v51, %s2658_s28  ;;  %v1413_v28 = vpop.permute.xlu2 %1412  ;;  %s4110_s28 = smov 74  }
 0x244   :  { %v649_v54 = vpop.permute.xlu0 %648  ;;  %v1415_v0 = vsel %vm1414_vm15, %v3456_v3, %v1413_v28  ;;  %vm634_vm15 = vcmask 490496  }
 0x245   :  { %v1132_v25 = vpop.permute.xlu1 %1131  ;;  %v1657_v55 = vld [vmem:[#allocation3 + $0x1b0] sm:$0xff]  ;;  %1419 = vst.msk [vmem:[#allocation3 + $0xe8] sm:$0x3f] %vm1322_vm6, %v1415_v0 }
 0x246   :  { %1134 = vst.msk [vmem:[#allocation3 + $0x80] sm:$0x3f] %vm1091_vm8, %v1132_v25  ;;  %v1652_v20 = vld [vmem:[#allocation3 + $0x188] sm:$0xff]  ;;  %1720 = vmatpush.msra.mxu1 %v1657_v55  ;;  %v1629_v55 = vld [vmem:[#allocation3 + $0xd0] sm:$0xff] }
 0x247   :  { %1768 = vmatpush.msrb.mxu3 %v1652_v20  ;;  %v1659_v20 = vld [vmem:[#allocation3 + $0x1c0] sm:$0xff] }
 0x249   :  { %1806 = vmatpush.msra.mxu3 %v1677_v41  ;;  %810 = vrot.lane.b32.xlu2 %v806_v1, %s2643_s2  ;;  %v1623_v1 = vld [vmem:[#allocation3 + $0xa0] sm:$0xff] }
 0x24a   :  { %1330 = vrot.lane.b32.xlu0 %v1325_v61, %s2706_s24  ;;  %s2716_s24 = smov 54  }
 0x24b   :  { %1807 = vmatpush.msra.mxu3 %v1674_v60  ;;  %1351 = vrot.lane.b32.xlu1 %v1346_v47, %s2702_s20  ;;  %v1362_v4 = vpop.permute.xlu2 %1361  ;;  %s2710_s20 = smov 46  }
 0x24c   :  { %v741_v3 = vpop.permute.xlu0 %740  ;;  %1365 = vst.msk [vmem:[#allocation3 + $0x70] sm:$0x3f] %vm1322_vm6, %v1362_v4 }
 0x24d   :  { %v743_v5 = vsel %vm742_vm9, %v739_v19, %v741_v3  ;;  %v651_v46 = vpop.permute.xlu1 %650  ;;  %vm1125_vm9 = vcmask 769024  }
 0x24e   :  { %745 = vst.msk [vmem:[#allocation3 + $0x198] sm:$0x3f] %vm588_vm3, %v743_v5  ;;  %v653_v35 = vsel %vm652_vm14, %v649_v54, %v651_v46  ;;  %vm1565_vm14 = vcmask 531456   ;;  %v1632_v54 = vld [vmem:[#allocation3 + $0xe8] sm:$0xff] }
 0x24f   :  { %995 = vst.msk [vmem:[#allocation3 + $0x198] sm:$0x3f] %vm818_vm13, %v3479_v27 }
 0x250   :  { %655 = vst.msk [vmem:[#allocation3 + $0xa8] sm:$0x3f] %vm588_vm3, %v653_v35 }
 0x251   :  { %890 = vst.msk [vmem:[#allocation3 + $0xa8] sm:$0x3f] %vm818_vm13, %v3467_v11 }
 0x252   :  { %1882 = vperm.xlu0 %2605, %v1878_v6   ;;  %v3645_v6 = vld [vmem:[%s4068_s3 + $0x8] sm:$0xff] }
 0x253   :  { %v1114_v12 = vpop.permute.xlu2 %1113  ;;  %2505 = vmatmul.msk.f32.vlgmr.msrb.gmra.mxu3 %vm513_vm4, %v3645_v6 }
 0x254   :  { %v1124_v7 = vpop.permute.xlu0 %1123 }
 0x255   :  { %v1126_v8 = vsel %vm1125_vm9, %v1122_v18, %v1124_v7  ;;  %v3578_v16 = vpop.permute.xlu1 %856  ;;  %vm1524_vm9 = vcmask 31744  }
 0x256   :  { %863 = vst.msk [vmem:[#allocation3 + $0x68] sm:$0x3f] %vm820_vm5, %v3578_v16  ;;  %v1654_v27 = vld [vmem:[#allocation3 + $0x198] sm:$0xff] }
 0x257   :  { %1128 = vst.msk [vmem:[#allocation3 + $0x68] sm:$0x3f] %vm1091_vm8, %v1126_v8  ;;  %1721 = vmatpush.msra.mxu1 %v1654_v27 }
 0x258   :  { %1364 = vst.msk [vmem:[#allocation3 + $0x68] sm:$0x3f] %vm1320_vm10, %v1362_v4  ;;  %v1624_v11 = vld [vmem:[#allocation3 + $0xa8] sm:$0xff] }
 0x259   :  { %1692 = vmatpush.msra.mxu0 %v1624_v11 }
 0x25a   :  { %1887 = vperm.xlu0 %2605, %v1879_v13   ;;  %v3657_v13 = vld [vmem:[%s4068_s3 + $0x18] sm:$0xff] }
 0x25b   :  { %v633_v50 = vpop.permute.xlu2 %632  ;;  %2506 = vmatmul.msk.f32.gmra.mxu3 %vm513_vm4, %v3657_v13 }
 0x25c   :  { %v1564_v14 = vpop.permute.xlu0 %1563 }
 0x25d   :  { %v1566_v17 = vsel %vm1565_vm14, %v3147_v26, %v1564_v14  ;;  %v3588_v39 = vpop.permute.xlu1 %1370  ;;  %vm858_vm14 = vcmask 900096  }
 0x25e   :  { %1570 = vst.msk [vmem:[#allocation3 + $0x220] sm:$0x3f] %vm1322_vm6, %v1566_v17 }
 0x25f   :  { %1377 = vst.msk [vmem:[#allocation3 + $0x80] sm:$0x3f] %vm1320_vm10, %v3588_v39  ;;  %v1616_v26 = vld [vmem:[#allocation3 + $0x68] sm:$0xff] }
 0x263   :  { %v1106_v22 = vpop.permute.xlu2 %1105 }
 0x264   :  { %v641_v21 = vpop.permute.xlu0 %640 }
 0x265   :  { %643 = vst.msk [vmem:[#allocation3 + $0x90] sm:$0x3f] %vm588_vm3, %v641_v21  ;;  %v3594_v24 = vpop.permute.xlu1 %845  ;;  %v1671_v56 = vld [vmem:[#allocation3 + $0x220] sm:$0xff] }
 0x266   :  { %883 = vst.msk [vmem:[#allocation3 + $0x90] sm:$0x3f] %vm818_vm13, %v3487_v38  ;;  %v1619_v29 = vld [vmem:[#allocation3 + $0x80] sm:$0xff]  ;;  %1808 = vmatpush.msra.mxu3 %v1671_v56 }
 0x267   :  { %849 = vst.msk [vmem:[#allocation3 + $0x50] sm:$0x3f] %vm820_vm5, %v3594_v24  ;;  %1740 = vmatpush.msrb.mxu2 %v1619_v29 }
 0x268   :  { %1116 = vst.msk [vmem:[#allocation3 + $0x50] sm:$0x3f] %vm1091_vm8, %v1114_v12 }
 0x269   :  { %1741 = vmatpush.msrb.mxu2 %v1616_v26 }
 0x26b   :  { %v1537_v10 = vpop.permute.xlu2 %1536 }
 0x26c   :  { %v1551_v15 = vpop.permute.xlu0 %1550  ;;  %v1539_v38 = vsel %vm1538_vm11, %v3236_v58, %v1537_v10  ;;  %v1599_v10 = vld [vmem:[%s4068_s3] sm:$0xff]  ;;  %vm1904_vm11 = vcmask 532744  }
 0x26d   :  { %v1552_v62 = vsel %vm1019_vm12, %v3318_v59, %v1551_v15  ;;  %v731_v31 = vpop.permute.xlu1 %730  ;;  %v1621_v33 = vld [vmem:[#allocation3 + $0x90] sm:$0xff]  ;;  %1543 = vst.msk [vmem:[#allocation3 + $0x1f0] sm:$0x3f] %vm1322_vm6, %v1539_v38  ;;  %vm1107_vm12 = vcmask 777216  }
 0x26e   :  { %1556 = vst.msk [vmem:[#allocation3 + $0x208] sm:$0x3f] %vm1322_vm6, %v1552_v62  ;;  %1693 = vmatpush.msra.mxu0 %v1621_v33 }
 0x26f   :  { %733 = vst.msk [vmem:[#allocation3 + $0x180] sm:$0x3f] %vm588_vm3, %v731_v31 }
 0x270   :  { %988 = vst.msk [vmem:[#allocation3 + $0x180] sm:$0x3f] %vm818_vm13, %v3493_v44 }
 0x273   :  { %v623_v37 = vpop.permute.xlu2 %622 }
 0x274   :  { %v3609_v36 = vpop.permute.xlu0 %835  ;;  %625 = vst.msk [vmem:[#allocation3 + $0x60] sm:$0x3f] %vm588_vm3, %v623_v37  ;;  %v1665_v58 = vld [vmem:[#allocation3 + $0x1f0] sm:$0xff] }
 0x275   :  { %842 = vst.msk [vmem:[#allocation3 + $0x38] sm:$0x3f] %vm820_vm5, %v3609_v36  ;;  %v631_v59 = vpop.permute.xlu1 %630  ;;  %v1668_v9 = vld [vmem:[#allocation3 + $0x208] sm:$0xff] }
 0x276   :  { %v635_v19 = vsel %vm634_vm15, %v631_v59, %v633_v50  ;;  %1809 = vmatpush.msra.mxu3 %v1668_v9  ;;  %v1601_v9 = vld [vmem:[%s4068_s3 + $0x10] sm:$0xff]  ;;  %s2709_s3 = smov 92   ;;  %vm1921_vm15 = vcmask 1041176  }
 0x277   :  { %637 = vst.msk [vmem:[#allocation3 + $0x78] sm:$0x3f] %vm588_vm3, %v635_v19  ;;  %v1651_v44 = vld [vmem:[#allocation3 + $0x180] sm:$0xff] }
 0x278   :  { %869 = vst.msk [vmem:[#allocation3 + $0x78] sm:$0x3f] %vm818_vm13, %v3517_v30  ;;  %1810 = vmatpush.msra.mxu3 %v1665_v58  ;;  %1722 = vmatpush.msra.mxu1 %v1651_v44 }
 0x279   :  { %2503 = vmatmul.msk.f32.vlgmr.msra.gmra.mxu1 %vm513_vm4, %v3645_v6 }
 0x27a   :  { %1776 = vmatpush.msrb.mxu1 %v1650_v52 }
 0x27b   :  { %v1523_v2 = vpop.permute.xlu2 %1522 }
 0x27c   :  { %1777 = vmatpush.msrb.mxu1 %v1647_v42  ;;  %v3617_v43 = vpop.permute.xlu0 %1349  ;;  %v1525_v30 = vsel %vm1524_vm9, %v3471_v63, %v1523_v2  ;;  %v1653_v42 = vld [vmem:[#allocation3 + $0x190] sm:$0xff]  ;;  %vm1918_vm9 = vcmask 809984  }
 0x27d   :  { %1357 = vst.msk [vmem:[#allocation3 + $0x50] sm:$0x3f] %vm1320_vm10, %v3617_v43  ;;  %v1104_v32 = vpop.permute.xlu1 %1103 }
 0x27e   :  { %1778 = vmatpush.msrb.mxu1 %v1644_v23  ;;  %v1108_v34 = vsel %vm1107_vm12, %v1104_v32, %v1106_v22  ;;  %1529 = vst.msk [vmem:[#allocation3 + $0x1d8] sm:$0x3f] %vm1322_vm6, %v1525_v30  ;;  %vm1922_vm12 = vcmask 26626  }
 0x27f   :  { %1110 = vst.msk [vmem:[#allocation3 + $0x38] sm:$0x3f] %vm1091_vm8, %v1108_v34  ;;  %v1618_v18 = vld [vmem:[#allocation3 + $0x78] sm:$0xff] }
 0x280   :  { %1779 = vmatpush.msrb.mxu1 %v1641_v48  ;;  %1694 = vmatpush.msra.mxu0 %v1618_v18 }
 0x281   :  { %2504 = vmatmul.msk.f32.gmra.mxu1 %vm513_vm4, %v3657_v13 }
 0x282   :  { %1780 = vmatpush.msrb.mxu1 %v1638_v49 }
 0x283   :  { %v813_v28 = vpop.permute.xlu2 %812 }
 0x284   :  { %1781 = vmatpush.msrb.mxu1 %v1635_v45  ;;  %v3624_v51 = vpop.permute.xlu0 %824  ;;  %v1613_v53 = vld [vmem:[#allocation3 + $0x50] sm:$0xff]  ;;  %821 = vst.msk [vmem:[#allocation3 + $0x8] sm:$0x3f] %vm820_vm5, %v813_v28 }
 0x285   :  { %828 = vst.msk [vmem:[#allocation3 + $0x20] sm:$0x3f] %vm820_vm5, %v3624_v51  ;;  %v1393_v63 = vpop.permute.xlu1 %1392  ;;  %1742 = vmatpush.msrb.mxu2 %v1613_v53  ;;  %v1662_v0 = vld [vmem:[#allocation3 + $0x1d8] sm:$0xff]  ;;  %vm616_vm5 = vcmask 236544  }
 0x286   :  { %1782 = vmatpush.msrb.mxu1 %v1632_v54  ;;  %v1394_v25 = vsel %vm900_vm7, %v3538_v40, %v1393_v63  ;;  %1811 = vmatpush.msra.mxu3 %v1662_v0  ;;  %vm4103_vm7 = vcmask 908288  }
 0x287   :  { %1398 = vst.msk [vmem:[#allocation3 + $0xb8] sm:$0x3f] %vm1322_vm6, %v1394_v25 }
 0x288   :  { %1783 = vmatpush.msrb.mxu1 %v1629_v55  ;;  %1812 = vmatpush.msra.mxu3 %v1659_v20 }
 0x28b   :  { %v3633_v47 = vpop.permute.xlu2 %1328 }
 0x28c   :  { %v855_v41 = vpop.permute.xlu0 %854 }
 0x28d   :  { %v859_v60 = vsel %vm858_vm14, %v855_v41, %v3578_v16  ;;  %v1341_v61 = vpop.permute.xlu1 %1340  ;;  %vm1911_vm14 = vcmask 803344  }
 0x28e   :  { %862 = vst.msk [vmem:[#allocation3 + $0x60] sm:$0x3f] %vm818_vm13, %v859_v60  ;;  %v1626_v40 = vld [vmem:[#allocation3 + $0xb8] sm:$0xff] }
 0x28f   :  { %1343 = vst.msk [vmem:[#allocation3 + $0x38] sm:$0x3f] %vm1320_vm10, %v1341_v61  ;;  %1784 = vmatpush.msrb.mxu1 %v1626_v40 }
 0x290   :  { %1344 = vst.msk [vmem:[#allocation3 + $0x40] sm:$0x3f] %vm1322_vm6, %v1341_v61 }
 0x291   :  { %1785 = vmatpush.msrb.mxu1 %v1623_v1 }
 0x293   :  { %v605_v4 = vpop.permute.xlu2 %604 }
 0x294   :  { %v613_v3 = vpop.permute.xlu0 %612  ;;  %607 = vst.msk [vmem:[#allocation3 + $0x30] sm:$0x3f] %vm588_vm3, %v605_v4 }
 0x295   :  { %v1096_v5 = vpop.permute.xlu1 %1095  ;;  %v1615_v46 = vld [vmem:[#allocation3 + $0x60] sm:$0xff] }
 0x296   :  { %1098 = vst.msk [vmem:[#allocation3 + $0x20] sm:$0x3f] %vm1091_vm8, %v1096_v5  ;;  %v1610_v35 = vld [vmem:[#allocation3 + $0x38] sm:$0xff]  ;;  %1695 = vmatpush.msra.mxu0 %v1615_v46 }
 0x297   :  { %1336 = vst.msk [vmem:[#allocation3 + $0x20] sm:$0x3f] %vm1320_vm10, %v3633_v47  ;;  %1743 = vmatpush.msrb.mxu2 %v1610_v35 }
 0x29b   :  { %v595_v12 = vpop.permute.xlu2 %594 }
 0x29c   :  { %v1086_v7 = vpop.permute.xlu0 %1085 }
 0x29d   :  { %v615_v8 = vpop.permute.xlu1 %614 }
 0x29e   :  { %v617_v16 = vsel %vm616_vm5, %v613_v3, %v615_v8  ;;  %v1607_v27 = vld [vmem:[#allocation3 + $0x20] sm:$0xff]  ;;  %vm1923_vm5 = vmor %vm1922_vm12, %vm1921_vm15  ;;  %vm1976_vm15 = vcmask 868944   ;;  %vm1986_vm12 = vcmask 1041240  }
 0x29f   :  { %619 = vst.msk [vmem:[#allocation3 + $0x48] sm:$0x3f] %vm588_vm3, %v617_v16  ;;  %1744 = vmatpush.msrb.mxu2 %v1607_v27 }
 0x2a0   :  { %848 = vst.msk [vmem:[#allocation3 + $0x48] sm:$0x3f] %vm818_vm13, %v3594_v24 }
 0x2a3   :  { %v811_v50 = vpop.permute.xlu2 %810 }
 0x2a4   :  { %v1373_v11 = vpop.permute.xlu0 %1372  ;;  %v815_v22 = vsel %vm814_vm2, %v811_v50, %v813_v28  ;;  %vm1353_vm2 = vcmask 392192  }
 0x2a5   :  { %v1088_v14 = vpop.permute.xlu1 %1087  ;;  %v1374_v17 = vsel %vm879_vm1, %v3588_v39, %v1373_v11  ;;  %819 = vst.msk [vmem:[#allocation3] sm:$0x3f] %vm818_vm13, %v815_v22  ;;  %v1617_v39 = vld [vmem:[#allocation3 + $0x70] sm:$0xff]  ;;  %vm1897_vm1 = vcmask 262144  }
 0x2a6   :  { %v1089_v21 = vsel %vm1075_vm0, %v1086_v7, %v1088_v14  ;;  %1378 = vst.msk [vmem:[#allocation3 + $0x88] sm:$0x3f] %vm1322_vm6, %v1374_v17  ;;  %vm4104_vm0 = vcmask 39936  }
 0x2a7   :  { %1092 = vst.msk [vmem:[#allocation3 + $0x8] sm:$0x3f] %vm1091_vm8, %v1089_v21  ;;  %v1612_v24 = vld [vmem:[#allocation3 + $0x48] sm:$0xff]  ;;  %vm598_vm8 = vcmask 244736  }
 0x2a8   :  { %1696 = vmatpush.msra.mxu0 %v1612_v24 }
 0x2ac   :  { %v834_v56 = vpop.permute.xlu0 %833  ;;  %v1603_v23 = vld [vmem:[#allocation3] sm:$0xff] }
 0x2ad   :  { %v1318_v29 = vpop.permute.xlu1 %1317  ;;  %v838_v26 = vsel %vm4103_vm7, %v834_v56, %v3609_v36  ;;  %v1620_v15 = vld [vmem:[#allocation3 + $0x88] sm:$0xff]  ;;  %vm1930_vm7 = vcmask 294944  }
 0x2ae   :  { %1321 = vst.msk [vmem:[#allocation3 + $0x8] sm:$0x3f] %vm1320_vm10, %v1318_v29  ;;  %1786 = vmatpush.msrb.mxu1 %v1620_v15  ;;  %vm1332_vm10 = vcmask 400384  }
 0x2af   :  { %1323 = vst.msk [vmem:[#allocation3 + $0x10] sm:$0x3f] %vm1322_vm6, %v1318_v29 }
 0x2b0   :  { %841 = vst.msk [vmem:[#allocation3 + $0x30] sm:$0x3f] %vm818_vm13, %v838_v26  ;;  %1787 = vmatpush.msrb.mxu1 %v1617_v39 }
 0x2b4   :  { %v597_v62 = vpop.permute.xlu0 %596 }
 0x2b5   :  { %v1503_v31 = vpop.permute.xlu1 %1502  ;;  %v599_v33 = vsel %vm598_vm8, %v595_v12, %v597_v62  ;;  %v1604_v38 = vld [vmem:[#allocation3 + $0x8] sm:$0xff]  ;;  %vm2045_vm8 = vcmask 408576  }
 0x2b6   :  { %v1504_v36 = vsel %vm4104_vm0, %v3506_v57, %v1503_v31  ;;  %601 = vst.msk [vmem:[#allocation3 + $0x18] sm:$0x3f] %vm588_vm3, %v599_v33  ;;  %1745 = vmatpush.msrb.mxu2 %v1604_v38  ;;  %v1605_v34 = vld [vmem:[#allocation3 + $0x10] sm:$0xff]  ;;  %vm1844_vm3 = vcmask 375808   ;;  %vm1937_vm0 = vcmask 565544  }
 0x2b7   :  { %1508 = vst.msk [vmem:[#allocation3 + $0x1a8] sm:$0x3f] %vm1322_vm6, %v1504_v36  ;;  %v1609_v59 = vld [vmem:[#allocation3 + $0x30] sm:$0xff]  ;;  %1746 = vmatmul.f32.vlgmr.msrb.gmra.mxu2 %v1599_v10 }
 0x2b8   :  { %827 = vst.msk [vmem:[#allocation3 + $0x18] sm:$0x3f] %vm818_vm13, %v3624_v51  ;;  %1697 = vmatpush.msra.mxu0 %v1609_v59 }
 0x2bc   :  { %v1331_v37 = vpop.permute.xlu0 %1330 }
 0x2bd   :  { %v1352_v19 = vpop.permute.xlu1 %1351  ;;  %v1333_v57 = vsel %vm1332_vm10, %v3633_v47, %v1331_v37  ;;  %vm1953_vm10 = vcmask 1041208  }
 0x2be   :  { %v1354_v58 = vsel %vm1353_vm2, %v3617_v43, %v1352_v19  ;;  %1337 = vst.msk [vmem:[#allocation3 + $0x28] sm:$0x3f] %vm1322_vm6, %v1333_v57  ;;  %v1656_v44 = vld [vmem:[#allocation3 + $0x1a8] sm:$0xff]  ;;  %v1611_v43 = vld [vmem:[#allocation3 + $0x40] sm:$0xff]  ;;  %vm1954_vm2 = vcmask 59394  }
 0x2bf   :  { %1358 = vst.msk [vmem:[#allocation3 + $0x58] sm:$0x3f] %vm1322_vm6, %v1354_v58  ;;  %1813 = vmatpush.msra.mxu3 %v1656_v44  ;;  %v1606_v52 = vld [vmem:[#allocation3 + $0x18] sm:$0xff]  ;;  %1749 = vmatmul.f32.gmra.mxu2 %v1601_v9  ;;  %vm1871_vm6 = vcmask 80896  }
 0x2c0   :  { %1698 = vmatpush.msra.mxu0 %v1606_v52 }
 0x2c1   :  { %1814 = vmatpush.msra.mxu3 %v1653_v42 }
 0x2c2   :  { %1699 = vmatpush.msra.mxu0 %v1603_v23  ;;  %2507 = vmatmul.msk.f32.vlgmr.msra.gmra.mxu3 %vm513_vm4, %v3645_v6 }
 0x2c3   :  { %1700 = vmatmul.f32.vlgmr.msra.gmra.mxu0 %v1599_v10 }
 0x2c4   :  { %v1883_v3 = vpop.permute.xlu0 %1882 }
 0x2c5   :  { %v1608_v2 = vld [vmem:[#allocation3 + $0x28] sm:$0xff] }
 0x2c6   :  { %v1614_v32 = vld [vmem:[#allocation3 + $0x58] sm:$0xff] }
 0x2c7   :  { %1788 = vmatpush.msrb.mxu1 %v1614_v32 }
 0x2c9   :  { %1789 = vmatpush.msrb.mxu1 %v1611_v43 }
 0x2ca   :  { %2508 = vmatmul.msk.f32.gmra.mxu3 %vm513_vm4, %v3657_v13 }
 0x2cb   :  { %1790 = vmatpush.msrb.mxu1 %v1608_v2  ;;  %1703 = vmatmul.f32.gmra.mxu0 %v1601_v9 }
 0x2cc   :  { %v1888_v4 = vpop.permute.xlu0 %1887 }
 0x2cd   :  { %1791 = vmatpush.msrb.mxu1 %v1605_v34 }
 0x2ce   :  { %1792 = vmatmul.f32.vlgmr.msrb.gmra.mxu1 %v1599_v10 }
 0x2d6   :  { %1795 = vmatmul.f32.gmra.mxu1 %v1601_v9  ;;  %v1770_v30 = vpop.f32.mrf.mxu3 }
 0x2de   :  { %v1773_v45 = vpop.f32.mrf.mxu3 }
 0x2f6   :  { %v1724_v48 = vpop.f32.mrf.mxu1 }
 0x2fe   :  { %v1727_v54 = vpop.f32.mrf.mxu1 }
 0x33a   :  { %v1747_v18 = vpop.f32.mrf.mxu2 }
 0x33b   :  { %v1771_v49 = vadd.f32 %v1770_v30, %v1747_v18 }
 0x33d   :  { %1851 = vrot.lane.b32.xlu0 %v1771_v49, %s2709_s3  ;;  %1838 = vrot.lane.b32.xlu2 %v1771_v49, %s2710_s20 }
 0x340   :  { %v1701_v51 = vpop.f32.mrf.mxu0 }
 0x341   :  { %v1725_v53 = vadd.f32 %v1724_v48, %v1701_v51 }
 0x342   :  { %v1750_v63 = vpop.f32.mrf.mxu2 }
 0x343   :  { %1836 = vrot.lane.b32.xlu1 %v1725_v53, %s2710_s20  ;;  %v1774_v28 = vadd.f32 %v1773_v45, %v1750_v63 }
 0x345   :  { %1853 = vrot.lane.b32.xlu0 %v1774_v28, %s2709_s3  ;;  %v1816_v0 = vpop.f32.mrf.mxu3  ;;  %s2723_s3 = smov 91  }
 0x348   :  { %v1704_v25 = vpop.f32.mrf.mxu0 }
 0x349   :  { %v1728_v55 = vadd.f32 %v1727_v54, %v1704_v25 }
 0x34b   :  { %v1793_v20 = vpop.f32.mrf.mxu1  ;;  %1863 = vrot.lane.b32.xlu1 %v1771_v49, %s2711_s30 }
 0x34c   :  { %v1817_v41 = vadd.f32 %v1816_v0, %v1793_v20 }
 0x34d   :  { %v1819_v60 = vpop.f32.mrf.mxu3 }
 0x34e   :  { %1824 = vst.msk [vmem:[#allocation4 + $0x10] sm:$0xff] %vm513_vm4, %v1817_v41 }
 0x353   :  { %1840 = vrot.lane.b32.xlu1 %v1728_v55, %s2710_s20  ;;  %v1796_v61 = vpop.f32.mrf.mxu1 }
 0x354   :  { %v1820_v47 = vadd.f32 %v1819_v60, %v1796_v61 }
 0x355   :  { %v1859_v40 = vld [vmem:[#allocation4 + $0x10] sm:$0xff] }
 0x356   :  { %1865 = vrot.lane.b32.xlu2 %v1859_v40, %s2711_s30  ;;  %1827 = vst.msk [vmem:[#allocation4 + $0x28] sm:$0xff] %vm513_vm4, %v1820_v47  ;;  %vm4105_vm4 = vcmask 670720  }
 0x357   :  { %vm4106_vm13 = vmmov %vm4105_vm4 }
 0x35b   :  { %1867 = vrot.lane.b32.xlu1 %v1774_v28, %s2711_s30 }
 0x35d   :  { %v1860_v1 = vld [vmem:[#allocation4 + $0x28] sm:$0xff] }
 0x35e   :  { %1842 = vrot.lane.b32.xlu2 %v1774_v28, %s2710_s20 }
 0x366   :  { %1869 = vrot.lane.b32.xlu2 %v1860_v1, %s2711_s30 }
 0x397   :  { %v1839_v5 = vpop.permute.xlu2 %1838 }
 0x3af   :  { %v1852_v8 = vpop.permute.xlu0 %1851 }
 0x3b0   :  { %v1866_v6 = vpop.permute.xlu2 %1865 }
 0x3b5   :  { %v1837_v46 = vpop.permute.xlu1 %1836 }
 0x3b6   :  { %v1845_v35 = vsel %vm1844_vm3, %v1837_v46, %v1839_v5 }
 0x3b7   :  { %v1849_v7 = vmax.f32 %v1725_v53, %v1845_v35  ;;  %v1854_v56 = vpop.permute.xlu0 %1853 }
 0x3b8   :  { %v1843_v14 = vpop.permute.xlu2 %1842 }
 0x3b9   :  { %v1857_v12 = vmax.f32 %v1849_v7, %v1852_v8 }
 0x3bd   :  { %v1864_v16 = vpop.permute.xlu1 %1863 }
 0x3be   :  { %v1872_v27 = vsel %vm1871_vm6, %v1864_v16, %v1866_v6 }
 0x3bf   :  { %v1876_v13 = vmax.f32 %v1857_v12, %v1872_v27 }
 0x3c0   :  { %v1870_v24 = vpop.permute.xlu2 %1869 }
 0x3c1   :  { %v1890_v11 = vadd.f32 %v1883_v3, %v1876_v13 }
 0x3c3   :  { %v1892_v17 = vmax.f32 %v1890_v11, 0.0 }
 0x3c5   :  { %1894 = vst.msk [vmem:[#allocation5] sm:$0xff] %vm4105_vm4, %v1892_v17  ;;  %v1841_v50 = vpop.permute.xlu1 %1840  ;;  %vm4111_vm4 = vcmask 842752  }
 0x3c6   :  { %v1846_v21 = vsel %vm1844_vm3, %v1841_v50, %v1843_v14  ;;  %vm1944_vm3 = vcmask 836144  }
 0x3c7   :  { %v1850_v22 = vmax.f32 %v1728_v55, %v1846_v21 }
 0x3c9   :  { %v1858_v39 = vmax.f32 %v1850_v22, %v1854_v56 }
 0x3cc   :  { %v2040_v29 = vld [vmem:[#allocation5 + $0x3] sm:$0x1]  ;;  %v2022_v26 = vld [vmem:[#allocation5] sm:$0x1]  ;;  %v2028_v36 = vld [vmem:[#allocation5 + $0x1] sm:$0x1] }
 0x3cd   :  { %v1913_v15 = vld [vmem:[#allocation5 + $0x3] sm:$0x1]  ;;  %2042 = vrot.lane.b32.xlu0 %v2040_v29, %s2712_s4  ;;  %2024 = vrot.lane.b32.xlu2 %v2022_v26, %s2704_s16  ;;  %v1868_v62 = vpop.permute.xlu1 %1867  ;;  %v1906_v59 = vld [vmem:[#allocation5 + $0x2] sm:$0x1]  ;;  %v1899_v37 = vld [vmem:[#allocation5 + $0x1] sm:$0x1] }
 0x3ce   :  { %1915 = vrot.lane.b32.xlu1 %v1913_v15, %s2713_s19  ;;  %v1873_v10 = vsel %vm1871_vm6, %v1868_v62, %v1870_v24  ;;  %v1925_v9 = vld [vmem:[#allocation5 + $0x4] sm:$0x1]  ;;  %v1946_v19 = vld [vmem:[#allocation5 + $0x7] sm:$0x1]  ;;  %v2034_v57 = vld [vmem:[#allocation5 + $0x2] sm:$0x1] }
 0x3cf   :  { %v1877_v31 = vmax.f32 %v1858_v39, %v1873_v10  ;;  %s2715_s16 = smov 17   ;;  %v2067_v58 = vld [vmem:[#allocation5 + $0x7] sm:$0x1]  ;;  %v1932_v44 = vld [vmem:[#allocation5 + $0x5] sm:$0x1]  ;;  %vm1955_vm6 = vmor %vm1954_vm2, %vm1953_vm10  ;;  %vm2018_vm10 = vcmask 1041272  }
 0x3d0   :  { %v2049_v52 = vld [vmem:[#allocation5 + $0x4] sm:$0x1]  ;;  %v1939_v42 = vld [vmem:[#allocation5 + $0x6] sm:$0x1]  ;;  %v2055_v32 = vld [vmem:[#allocation5 + $0x5] sm:$0x1] }
 0x3d1   :  { %v1891_v33 = vadd.f32 %v1888_v4, %v1877_v31  ;;  %v2061_v23 = vld [vmem:[#allocation5 + $0x6] sm:$0x1]  ;;  %v1896_v43 = vld [vmem:[#allocation5] sm:$0x1]  ;;  %v2146_v29 = vld [vmem:[%s4070_s5 + $0x78] sm:$0xff]  ;;  %vm2019_vm2 = vcmask 124930  }
 0x3d2   :  { %1898 = vst.msk [vmem:[#allocation6] sm:$0x1] %vm1897_vm1, %v1896_v43  ;;  %v2162_v26 = vld [vmem:[%s4070_s5 + $0xf8] sm:$0xff]  ;;  %2217 = vmatpush.msrb.mxu0 %v2146_v29  ;;  %v2145_v62 = vld [vmem:[%s4070_s5 + $0x70] sm:$0xff] }
 0x3d3   :  { %v1893_v38 = vmax.f32 %v1891_v33, 0.0  ;;  %v2178_v15 = vld [vmem:[%s4070_s5 + $0x178] sm:$0xff]  ;;  %2237 = vmatpush.msra.mxu2 %v2162_v26  ;;  %v2161_v10 = vld [vmem:[%s4070_s5 + $0xf0] sm:$0xff] }
 0x3d4   :  { %v2194_v39 = vld [vmem:[%s4070_s5 + $0x1f8] sm:$0xff]  ;;  %2257 = vmatpush.msrb.mxu3 %v2178_v15  ;;  %v2177_v31 = vld [vmem:[%s4070_s5 + $0x170] sm:$0xff]  ;;  %2218 = vmatpush.msrb.mxu0 %v2145_v62 }
 0x3d5   :  { %1895 = vst.msk [vmem:[#allocation5 + $0x8] sm:$0xff] %vm4106_vm13, %v1893_v38  ;;  %2030 = vrot.lane.b32.xlu2 %v2028_v36, %s2643_s2  ;;  %1908 = vrot.lane.b32.xlu0 %v1906_v59, %s2653_s23  ;;  %s2717_s2 = smov 70   ;;  %s2718_s23 = smov 116   ;;  %vm2072_vm13 = vcmask 441344   ;;  %v2193_v33 = vld [vmem:[%s4070_s5 + $0x1f0] sm:$0xff]  ;;  %v2144_v38 = vld [vmem:[%s4070_s5 + $0x68] sm:$0xff] }
 0x3d6   :  { %1901 = vrot.lane.b32.xlu1 %v1899_v37, %s2714_s21  ;;  %2277 = vmatpush.msra.mxu1 %v2194_v39  ;;  %v2160_v36 = vld [vmem:[%s4070_s5 + $0xe8] sm:$0xff]  ;;  %v2174_v43 = vld [vmem:[%s4070_s5 + $0x158] sm:$0xff]  ;;  %v2133_v39 = vld [vmem:[%s4070_s5 + $0x10] sm:$0xff] }
 0x3d7   :  { %2238 = vmatpush.msra.mxu2 %v2161_v10  ;;  %v2176_v59 = vld [vmem:[%s4070_s5 + $0x168] sm:$0xff]  ;;  %2258 = vmatpush.msrb.mxu3 %v2177_v31  ;;  %v2150_v29 = vld [vmem:[%s4070_s5 + $0x98] sm:$0xff]  ;;  %v2149_v62 = vld [vmem:[%s4070_s5 + $0x90] sm:$0xff] }
 0x3d8   :  { %v2192_v37 = vld [vmem:[%s4070_s5 + $0x1e8] sm:$0xff]  ;;  %2278 = vmatpush.msra.mxu1 %v2193_v33  ;;  %2219 = vmatpush.msrb.mxu0 %v2144_v38  ;;  %v2166_v26 = vld [vmem:[%s4070_s5 + $0x118] sm:$0xff]  ;;  %v2165_v10 = vld [vmem:[%s4070_s5 + $0x110] sm:$0xff] }
 0x3d9   :  { %2239 = vmatpush.msra.mxu2 %v2160_v36  ;;  %2259 = vmatpush.msrb.mxu3 %v2176_v59  ;;  %v2182_v15 = vld [vmem:[%s4070_s5 + $0x198] sm:$0xff]  ;;  %v2181_v31 = vld [vmem:[%s4070_s5 + $0x190] sm:$0xff]  ;;  %v2132_v38 = vld [vmem:[%s4070_s5 + $0x8] sm:$0xff] }
 0x3da   :  { %2279 = vmatpush.msra.mxu1 %v2192_v37  ;;  %v2148_v36 = vld [vmem:[%s4070_s5 + $0x88] sm:$0xff] }
 0x3db   :  { %v2164_v37 = vld [vmem:[%s4070_s5 + $0x108] sm:$0xff] }
 0x3dc   :  { %v2076_v2 = vld [vmem:[#allocation5 + $0x8] sm:$0x1]  ;;  %v1978_v34 = vld [vmem:[#allocation5 + $0xb] sm:$0x1]  ;;  %v2082_v48 = vld [vmem:[#allocation5 + $0x9] sm:$0x1] }
 0x3dd   :  { %1927 = vrot.lane.b32.xlu2 %v1925_v9, %s2682_s12  ;;  %1948 = vrot.lane.b32.xlu0 %v1946_v19, %s2655_s25  ;;  %s4108_s25 = smov 87   ;;  %s2719_s12 = smov 107   ;;  %v1957_v30 = vld [vmem:[#allocation5 + $0x8] sm:$0x1]  ;;  %v1964_v18 = vld [vmem:[#allocation5 + $0x9] sm:$0x1] }
 0x3de   :  { %2036 = vrot.lane.b32.xlu1 %v2034_v57, %s2715_s16  ;;  %v2094_v49 = vld [vmem:[#allocation5 + $0xb] sm:$0x1]  ;;  %v1990_v45 = vld [vmem:[#allocation5 + $0xc] sm:$0x1]  ;;  %v2088_v51 = vld [vmem:[#allocation5 + $0xa] sm:$0x1] }
 0x3df   :  { %v1971_v53 = vld [vmem:[#allocation5 + $0xa] sm:$0x1]  ;;  %v2120_v54 = vld [vmem:[#allocation5 + $0xf] sm:$0x1]  ;;  %v2102_v63 = vld [vmem:[#allocation5 + $0xc] sm:$0x1] }
 0x3e0   :  { %v2011_v28 = vld [vmem:[#allocation5 + $0xf] sm:$0x1]  ;;  %v2004_v25 = vld [vmem:[#allocation5 + $0xe] sm:$0x1]  ;;  %v2108_v55 = vld [vmem:[#allocation5 + $0xd] sm:$0x1] }
 0x3e1   :  { %v1997_v0 = vld [vmem:[#allocation5 + $0xd] sm:$0x1]  ;;  %v2114_v20 = vld [vmem:[#allocation5 + $0xe] sm:$0x1] }
 0x3e5   :  { %2069 = vrot.lane.b32.xlu2 %v2067_v58, %s2716_s24  ;;  %1934 = vrot.lane.b32.xlu0 %v1932_v44, %s4107_s17  ;;  %v2143_v58 = vld [vmem:[%s4070_s5 + $0x60] sm:$0xff] }
 0x3e6   :  { %2051 = vrot.lane.b32.xlu1 %v2049_v52, %s2700_s1  ;;  %s2720_s1 = smov 8   ;;  %v2159_v44 = vld [vmem:[%s4070_s5 + $0xe0] sm:$0xff]  ;;  %2220 = vmatpush.msrb.mxu0 %v2143_v58 }
 0x3e7   :  { %v2175_v52 = vld [vmem:[%s4070_s5 + $0x160] sm:$0xff]  ;;  %2240 = vmatpush.msra.mxu2 %v2159_v44 }
 0x3e8   :  { %2260 = vmatpush.msrb.mxu3 %v2175_v52  ;;  %v2131_v58 = vld [vmem:[%s4070_s5] sm:$0xff] }
 0x3e9   :  { %v2147_v44 = vld [vmem:[%s4070_s5 + $0x80] sm:$0xff] }
 0x3ea   :  { %2261 = vmatpush.msrb.mxu3 %v2174_v43  ;;  %v2163_v52 = vld [vmem:[%s4070_s5 + $0x100] sm:$0xff]  ;;  %v2332_v43 = vld [vmem:[%s4072_s7 + $0x70] sm:$0xff] }
 0x3ed   :  { %1941 = vrot.lane.b32.xlu2 %v1939_v42, %s2717_s2  ;;  %2063 = vrot.lane.b32.xlu0 %v2061_v23, %s2690_s0  ;;  %s4109_s0 = smov 41   ;;  %v2191_v42 = vld [vmem:[%s4070_s5 + $0x1e0] sm:$0xff]  ;;  %v2142_v23 = vld [vmem:[%s4070_s5 + $0x58] sm:$0xff] }
 0x3ee   :  { %2057 = vrot.lane.b32.xlu1 %v2055_v32, %s2718_s23  ;;  %v2158_v32 = vld [vmem:[%s4070_s5 + $0xd8] sm:$0xff]  ;;  %2280 = vmatpush.msra.mxu1 %v2191_v42  ;;  %v2179_v42 = vld [vmem:[%s4070_s5 + $0x180] sm:$0xff] }
 0x3ef   :  { %2221 = vmatpush.msrb.mxu0 %v2142_v23  ;;  %2241 = vmatpush.msra.mxu2 %v2158_v32  ;;  %v2196_v32 = vld [vmem:[%s4070_s5 + $0x208] sm:$0xff] }
 0x3f5   :  { %2078 = vrot.lane.b32.xlu0 %v2076_v2, %s4108_s25  ;;  %1980 = vrot.lane.b32.xlu2 %v1978_v34, %s2719_s12  ;;  %v2190_v2 = vld [vmem:[%s4070_s5 + $0x1d8] sm:$0xff]  ;;  %v2141_v34 = vld [vmem:[%s4070_s5 + $0x50] sm:$0xff] }
 0x3f6   :  { %1959 = vrot.lane.b32.xlu1 %v1957_v30, %s2720_s1  ;;  %v2157_v30 = vld [vmem:[%s4070_s5 + $0xd0] sm:$0xff]  ;;  %2281 = vmatpush.msra.mxu1 %v2190_v2  ;;  %v2195_v2 = vld [vmem:[%s4070_s5 + $0x200] sm:$0xff] }
 0x3f7   :  { %2222 = vmatpush.msrb.mxu0 %v2141_v34  ;;  %2242 = vmatpush.msra.mxu2 %v2157_v30  ;;  %v2331_v34 = vld [vmem:[%s4072_s7 + $0x68] sm:$0xff] }
 0x3fd   :  { %2084 = vrot.lane.b32.xlu0 %v2082_v48, %s2675_s29  ;;  %1966 = vrot.lane.b32.xlu2 %v1964_v18, %s4109_s0  ;;  %s2724_s29 = smov 124   ;;  %v2173_v48 = vld [vmem:[%s4070_s5 + $0x150] sm:$0xff] }
 0x3fe   :  { %2096 = vrot.lane.b32.xlu1 %v2094_v49, %s2678_s22  ;;  %v2189_v18 = vld [vmem:[%s4070_s5 + $0x1d0] sm:$0xff]  ;;  %2262 = vmatpush.msrb.mxu3 %v2173_v48  ;;  %v2330_v48 = vld [vmem:[%s4072_s7 + $0x60] sm:$0xff] }
 0x3ff   :  { %2282 = vmatpush.msra.mxu1 %v2189_v18 }
 0x405   :  { %1992 = vrot.lane.b32.xlu0 %v1990_v45, %s2656_s26  ;;  %2090 = vrot.lane.b32.xlu2 %v2088_v51, %s2721_s14  ;;  %s2725_s26 = smov 45   ;;  %v2140_v45 = vld [vmem:[%s4070_s5 + $0x48] sm:$0xff]  ;;  %s2726_s14 = smov [#allocation7]  }
 0x406   :  { %1973 = vrot.lane.b32.xlu1 %v1971_v53, %s4110_s28  ;;  %v2156_v51 = vld [vmem:[%s4070_s5 + $0xc8] sm:$0xff]  ;;  %2223 = vmatpush.msrb.mxu0 %v2140_v45  ;;  %s2412_s28 = sshll.u32 %s2726_s14, 4  ;;  %s2413_s28 = int_to_ptr.vmem [resolvable:$true] %s2412_s28 }
 0x407   :  { %2243 = vmatpush.msra.mxu2 %v2156_v51  ;;  %v2328_v51 = vld [vmem:[%s4072_s7 + $0x50] sm:$0xff] }
 0x40d   :  { %2122 = vrot.lane.b32.xlu0 %v2120_v54, %s2722_s15  ;;  %2104 = vrot.lane.b32.xlu2 %v2102_v63, %s2723_s3  ;;  %v2172_v54 = vld [vmem:[%s4070_s5 + $0x148] sm:$0xff] }
 0x40e   :  { %2013 = vrot.lane.b32.xlu1 %v2011_v28, %s4101_s18  ;;  %v2188_v63 = vld [vmem:[%s4070_s5 + $0x1c8] sm:$0xff]  ;;  %2263 = vmatpush.msrb.mxu3 %v2172_v54 }
 0x40f   :  { %2283 = vmatpush.msra.mxu1 %v2188_v63 }
 0x415   :  { %2006 = vrot.lane.b32.xlu0 %v2004_v25, %s2698_s27  ;;  %2110 = vrot.lane.b32.xlu2 %v2108_v55, %s2724_s29 }
 0x416   :  { %1999 = vrot.lane.b32.xlu1 %v1997_v0, %s2725_s26 }
 0x41e   :  { %2116 = vrot.lane.b32.xlu1 %v2114_v20, %s2695_s13 }
 0x427   :  { %v2025_v41 = vpop.permute.xlu2 %2024 }
 0x428   :  { %2027 = vst.msk [vmem:[#allocation6 + $0x1] sm:$0x1] %vm1897_vm1, %v2025_v41  ;;  %vm1962_vm1 = vcmask 327744  }
 0x42f   :  { %v2031_v60 = vpop.permute.xlu2 %2030 }
 0x430   :  { %2033 = vst.msk [vmem:[#allocation6 + $0x1] sm:$0x1] %vm1904_vm11, %v2031_v60 }
 0x437   :  { %v1928_v61 = vpop.permute.xlu2 %1927 }
 0x43f   :  { %v2043_v47 = vpop.permute.xlu0 %2042  ;;  %v2070_v40 = vpop.permute.xlu2 %2069 }
 0x440   :  { %v1916_v1 = vpop.permute.xlu1 %1915  ;;  %v2044_v6 = vrot.slane %v2043_v47, 6  ;;  %v2071_v50 = vrot.slane %v2070_v40, 6 }
 0x441   :  { %v1917_v3 = vrot.slane %v1916_v1, 6 }
 0x442   :  { %v2046_v16 = vsel %vm2045_vm8, %v2044_v6, %v2043_v47  ;;  %v2073_v56 = vsel %vm2072_vm13, %v2071_v50, %v2070_v40  ;;  %vm2002_vm8 = vcmask 631144   ;;  %v2139_v47 = vld [vmem:[%s4070_s5 + $0x40] sm:$0xff]  ;;  %v2137_v6 = vld [vmem:[%s4070_s5 + $0x30] sm:$0xff]  ;;  %vm2125_vm13 = vcmask 506880  }
 0x443   :  { %v1919_v35 = vsel %vm1918_vm9, %v1917_v3, %v1916_v1  ;;  %vm1987_vm9 = vcmask 92162   ;;  %v2155_v40 = vld [vmem:[%s4070_s5 + $0xc0] sm:$0xff]  ;;  %2224 = vmatpush.msrb.mxu0 %v2139_v47  ;;  %v2323_v47 = vld [vmem:[%s4072_s7 + $0x28] sm:$0xff] }
 0x444   :  { %v2171_v1 = vld [vmem:[%s4070_s5 + $0x140] sm:$0xff]  ;;  %2244 = vmatpush.msra.mxu2 %v2155_v40 }
 0x445   :  { %v2187_v3 = vld [vmem:[%s4070_s5 + $0x1c0] sm:$0xff]  ;;  %2264 = vmatpush.msrb.mxu3 %v2171_v1  ;;  %v2321_v1 = vld [vmem:[%s4072_s7 + $0x18] sm:$0xff] }
 0x446   :  { %2284 = vmatpush.msra.mxu1 %v2187_v3  ;;  %v2135_v50 = vld [vmem:[%s4070_s5 + $0x20] sm:$0xff]  ;;  %v2320_v3 = vld [vmem:[%s4072_s7 + $0x10] sm:$0xff] }
 0x447   :  { %v1942_v5 = vpop.permute.xlu2 %1941  ;;  %v1909_v4 = vpop.permute.xlu0 %1908  ;;  %v2322_v40 = vld [vmem:[%s4072_s7 + $0x20] sm:$0xff] }
 0x448   :  { %v1902_v46 = vpop.permute.xlu1 %1901 }
 0x449   :  { %1905 = vst.msk [vmem:[#allocation6] sm:$0x1] %vm1904_vm11, %v1902_v46  ;;  %vm1969_vm11 = vcmask 598344   ;;  %v2170_v46 = vld [vmem:[%s4070_s5 + $0x138] sm:$0xff] }
 0x44a   :  { %1912 = vst.msk [vmem:[#allocation6] sm:$0x1] %vm1911_vm14, %v1909_v4  ;;  %v2154_v4 = vld [vmem:[%s4070_s5 + $0xb8] sm:$0xff]  ;;  %2265 = vmatpush.msrb.mxu3 %v2170_v46  ;;  %v2319_v46 = vld [vmem:[%s4072_s7 + $0x8] sm:$0xff] }
 0x44b   :  { %1924 = vst.msk [vmem:[#allocation6] sm:$0x5] %vm1923_vm5, %v1919_v35  ;;  %v2186_v35 = vld [vmem:[%s4070_s5 + $0x1b8] sm:$0xff]  ;;  %2245 = vmatpush.msra.mxu2 %v2154_v4  ;;  %v2371_v4 = vld [vmem:[%s4074_s9 + $0x48] sm:$0xff] }
 0x44c   :  { %1931 = vst.msk [vmem:[#allocation6 + $0x2] sm:$0x1] %vm1930_vm7, %v1928_v61  ;;  %2285 = vmatpush.msra.mxu1 %v2186_v35  ;;  %v2370_v35 = vld [vmem:[%s4074_s9 + $0x40] sm:$0xff] }
 0x44f   :  { %v1949_v7 = vpop.permute.xlu0 %1948  ;;  %v3725_v8 = vpop.permute.xlu2 %1980 }
 0x450   :  { %v2037_v12 = vpop.permute.xlu1 %2036  ;;  %v1950_v27 = vrot.slane %v1949_v7, 6  ;;  %v1982_v0 = vrot.slane %v3725_v8, 6 }
 0x451   :  { %2039 = vst.msk [vmem:[#allocation6 + $0x1] sm:$0x1] %vm1911_vm14, %v2037_v12  ;;  %vm3827_vm14 = vmor %vm1987_vm9, %vm1986_vm12  ;;  %v2185_v12 = vld [vmem:[%s4070_s5 + $0x1b0] sm:$0xff]  ;;  %vm2377_vm12 = vcmask 687104   ;;  %vm2405_vm9 = vcmask 74752  }
 0x452   :  { %2048 = vst.msk [vmem:[#allocation6 + $0x1] sm:$0x5] %vm1923_vm5, %v2046_v16  ;;  %v1951_v17 = vsel %vm4111_vm4, %v1950_v27, %v1949_v7  ;;  %vm1995_vm5 = vcmask 360544   ;;  %v2153_v7 = vld [vmem:[%s4070_s5 + $0xb0] sm:$0xff]  ;;  %v2136_v16 = vld [vmem:[%s4070_s5 + $0x28] sm:$0xff]  ;;  %2286 = vmatpush.msra.mxu1 %v2185_v12  ;;  %vm4117_vm4 = vcmask 908288  }
 0x453   :  { %v2152_v27 = vld [vmem:[%s4070_s5 + $0xa8] sm:$0xff]  ;;  %2246 = vmatpush.msra.mxu2 %v2153_v7  ;;  %v2369_v7 = vld [vmem:[%s4074_s9 + $0x38] sm:$0xff] }
 0x454   :  { %v2367_v12 = vld [vmem:[%s4074_s9 + $0x28] sm:$0xff] }
 0x455   :  { %2247 = vmatpush.msra.mxu2 %v2152_v27  ;;  %v2365_v27 = vld [vmem:[%s4074_s9 + $0x18] sm:$0xff] }
 0x457   :  { %v1935_v13 = vpop.permute.xlu0 %1934  ;;  %v1967_v11 = vpop.permute.xlu2 %1966 }
 0x458   :  { %1938 = vst.msk [vmem:[#allocation6 + $0x2] sm:$0x1] %vm1937_vm0, %v1935_v13  ;;  %v2052_v14 = vpop.permute.xlu1 %2051 }
 0x459   :  { %1945 = vst.msk [vmem:[#allocation6 + $0x2] sm:$0x1] %vm1944_vm3, %v1942_v5  ;;  %v2138_v5 = vld [vmem:[%s4070_s5 + $0x38] sm:$0xff] }
 0x45a   :  { %2054 = vst.msk [vmem:[#allocation6 + $0x3] sm:$0x1] %vm1930_vm7, %v2052_v14  ;;  %vm4114_vm7 = vcmask 474112   ;;  %2225 = vmatpush.msrb.mxu0 %v2138_v5  ;;  %v2184_v14 = vld [vmem:[%s4070_s5 + $0x1a8] sm:$0xff]  ;;  %v2372_v5 = vld [vmem:[%s4074_s9 + $0x50] sm:$0xf] }
 0x45b   :  { %1956 = vst.msk [vmem:[#allocation6 + $0x2] sm:$0x5] %vm1955_vm6, %v1951_v17  ;;  %2287 = vmatpush.msra.mxu1 %v2184_v14 }
 0x45c   :  { %2226 = vmatpush.msrb.mxu0 %v2137_v6  ;;  %v2318_v6 = vld [vmem:[%s4072_s7] sm:$0xff] }
 0x45e   :  { %2227 = vmatpush.msrb.mxu0 %v2136_v16  ;;  %v2366_v16 = vld [vmem:[%s4074_s9 + $0x20] sm:$0xff] }
 0x45f   :  { %v2064_v21 = vpop.permute.xlu0 %2063  ;;  %v3731_v24 = vpop.permute.xlu2 %2090 }
 0x460   :  { %v2058_v22 = vpop.permute.xlu1 %2057  ;;  %2228 = vmatpush.msrb.mxu0 %v2135_v50 }
 0x461   :  { %2060 = vst.msk [vmem:[#allocation6 + $0x3] sm:$0x1] %vm1937_vm0, %v2058_v22  ;;  %vm1983_vm0 = vcmask 875520   ;;  %v2167_v22 = vld [vmem:[%s4070_s5 + $0x120] sm:$0xff] }
 0x462   :  { %2066 = vst.msk [vmem:[#allocation6 + $0x3] sm:$0x1] %vm1944_vm3, %v2064_v21  ;;  %v1984_v61 = vsel %vm1983_vm0, %v1982_v0, %v3725_v8  ;;  %v2169_v8 = vld [vmem:[%s4070_s5 + $0x130] sm:$0xff]  ;;  %v2151_v21 = vld [vmem:[%s4070_s5 + $0xa0] sm:$0xff]  ;;  %vm2009_vm3 = vcmask 901744  }
 0x463   :  { %2075 = vst.msk [vmem:[#allocation6 + $0x3] sm:$0x5] %vm1955_vm6, %v2073_v56  ;;  %2266 = vmatpush.msrb.mxu3 %v2169_v8  ;;  %v2134_v56 = vld [vmem:[%s4070_s5 + $0x18] sm:$0xff]  ;;  %2248 = vmatpush.msra.mxu2 %v2151_v21  ;;  %vm3942_vm6 = vmor %vm2019_vm2, %vm2018_vm10  ;;  %v2368_v8 = vld [vmem:[%s4074_s9 + $0x30] sm:$0xff] }
 0x464   :  { %2229 = vmatpush.msrb.mxu0 %v2134_v56 }
 0x465   :  { %2249 = vmatpush.msra.mxu2 %v2150_v29 }
 0x466   :  { %2230 = vmatpush.msrb.mxu0 %v2133_v39  ;;  %v2364_v39 = vld [vmem:[%s4074_s9 + $0x10] sm:$0xff] }
 0x467   :  { %v2079_v9 = vpop.permute.xlu0 %2078  ;;  %v2105_v57 = vpop.permute.xlu2 %2104  ;;  %2250 = vmatpush.msra.mxu2 %v2149_v62  ;;  %v2363_v62 = vld [vmem:[%s4074_s9 + $0x8] sm:$0xff] }
 0x468   :  { %2081 = vst.msk [vmem:[#allocation6 + $0x5] sm:$0x1] %vm1962_vm1, %v2079_v9  ;;  %v1960_v19 = vpop.permute.xlu1 %1959  ;;  %v2180_v9 = vld [vmem:[%s4070_s5 + $0x188] sm:$0xff]  ;;  %2231 = vmatpush.msrb.mxu0 %v2132_v38 }
 0x469   :  { %1963 = vst.msk [vmem:[#allocation6 + $0x4] sm:$0x1] %vm1962_vm1, %v1960_v19  ;;  %2251 = vmatpush.msra.mxu2 %v2148_v36  ;;  %vm4118_vm1 = vcmask 130048  }
 0x46a   :  { %1970 = vst.msk [vmem:[#allocation6 + $0x4] sm:$0x1] %vm1969_vm11, %v1967_v11  ;;  %v2168_v11 = vld [vmem:[%s4070_s5 + $0x128] sm:$0xff]  ;;  %2232 = vmatpush.msrb.mxu0 %v2131_v58 }
 0x46b   :  { %2267 = vmatpush.msrb.mxu3 %v2168_v11  ;;  %2252 = vmatpush.msra.mxu2 %v2147_v44 }
 0x46c   :  { %2311 = vmatpush.msra.mxu0 %v2196_v32 }
 0x46d   :  { %2268 = vmatpush.msrb.mxu3 %v2167_v22  ;;  %2342 = vmatpush.msrb.mxu2 %v2332_v43 }
 0x46e   :  { %2312 = vmatpush.msra.mxu0 %v2195_v2 }
 0x46f   :  { %v2085_v49 = vpop.permute.xlu0 %2084  ;;  %v2111_v20 = vpop.permute.xlu2 %2110  ;;  %2269 = vmatpush.msrb.mxu3 %v2166_v26  ;;  %2343 = vmatpush.msrb.mxu2 %v2331_v34 }
 0x470   :  { %2087 = vst.msk [vmem:[#allocation6 + $0x5] sm:$0x1] %vm1969_vm11, %v2085_v49  ;;  %v2097_v53 = vpop.permute.xlu1 %2096  ;;  %v2329_v49 = vld [vmem:[%s4072_s7 + $0x58] sm:$0xff]  ;;  %vm2381_vm11 = vcmask 1043456  }
 0x471   :  { %2093 = vst.msk [vmem:[#allocation6 + $0x5] sm:$0x1] %vm1976_vm15, %v3731_v24  ;;  %v2098_v25 = vrot.slane %v2097_v53, 6  ;;  %v2183_v24 = vld [vmem:[%s4070_s5 + $0x1a0] sm:$0xff]  ;;  %2270 = vmatpush.msrb.mxu3 %v2165_v10  ;;  %2344 = vmatpush.msrb.mxu2 %v2330_v48 }
 0x472   :  { %2288 = vmatpush.msra.mxu1 %v2183_v24  ;;  %v2362_v10 = vld [vmem:[%s4074_s9] sm:$0xff]  ;;  %s2414_s9 = sshll.u32 %s4076_s11, 4  ;;  %s2415_s9 = int_to_ptr.hbm [resolvable:$true] %s2414_s9 }
 0x473   :  { %v2099_v55 = vsel %vm4114_vm7, %v2098_v25, %v2097_v53  ;;  %2271 = vmatpush.msrb.mxu3 %v2164_v37  ;;  %2345 = vmatpush.msrb.mxu2 %v2329_v49  ;;  %v2327_v53 = vld [vmem:[%s4072_s7 + $0x48] sm:$0xff] }
 0x474   :  { %2101 = vst.msk [vmem:[#allocation6 + $0x5] sm:$0x5] %vm3827_vm14, %v2099_v55  ;;  %2289 = vmatpush.msra.mxu1 %v2182_v15 }
 0x475   :  { %2107 = vst.msk [vmem:[#allocation6 + $0x7] sm:$0x1] %vm1995_vm5, %v2105_v57  ;;  %2272 = vmatpush.msrb.mxu3 %v2163_v52  ;;  %2346 = vmatpush.msrb.mxu2 %v2328_v51 }
 0x476   :  { %2113 = vst.msk [vmem:[#allocation6 + $0x7] sm:$0x1] %vm2002_vm8, %v2111_v20  ;;  %2290 = vmatpush.msra.mxu1 %v2181_v31  ;;  %v2607_v31 = vld [vmem:[%s4073_s8] ss:$0 sm:$0xff] }
 0x477   :  { %v1993_v41 = vpop.permute.xlu0 %1992  ;;  %2347 = vmatpush.msrb.mxu2 %v2327_v53  ;;  %2511 = vmatpush.msk.msra.mxu3 %vm2381_vm11, %v2372_v5 }
 0x478   :  { %v1974_v60 = vpop.permute.xlu1 %1973  ;;  %2291 = vmatpush.msra.mxu1 %v2180_v9 }
 0x479   :  { %1977 = vst.msk [vmem:[#allocation6 + $0x4] sm:$0x1] %vm1976_vm15, %v1974_v60  ;;  %v2325_v60 = vld [vmem:[%s4072_s7 + $0x38] sm:$0xff]  ;;  %2391 = vmatpush.msra.mxu3 %v2371_v4  ;;  %vm2337_vm15 = vcmask 982016  }
 0x47a   :  { %1989 = vst.msk [vmem:[#allocation6 + $0x4] sm:$0x5] %vm3827_vm14, %v1984_v61  ;;  %2292 = vmatpush.msra.mxu1 %v2179_v42  ;;  %v2324_v61 = vld [vmem:[%s4072_s7 + $0x30] sm:$0xff] }
 0x47b   :  { %1996 = vst.msk [vmem:[#allocation6 + $0x6] sm:$0x1] %vm1995_vm5, %v1993_v41  ;;  %v2326_v41 = vld [vmem:[%s4072_s7 + $0x40] sm:$0xff]  ;;  %2392 = vmatpush.msra.mxu3 %v2370_v35 }
 0x47c   :  { %2348 = vmatpush.msrb.mxu2 %v2326_v41 }
 0x47d   :  { %2393 = vmatpush.msra.mxu3 %v2369_v7 }
 0x47e   :  { %2349 = vmatpush.msrb.mxu2 %v2325_v60 }
 0x47f   :  { %v3884_v13 = vpop.permute.xlu0 %2122  ;;  %2394 = vmatpush.msra.mxu3 %v2368_v8 }
 0x480   :  { %v2014_v17 = vpop.permute.xlu1 %2013  ;;  %v2124_v30 = vrot.slane %v3884_v13, 6  ;;  %2350 = vmatpush.msrb.mxu2 %v2324_v61 }
 0x481   :  { %v2015_v33 = vrot.slane %v2014_v17, 6  ;;  %2395 = vmatpush.msra.mxu3 %v2367_v12 }
 0x482   :  { %v2126_v45 = vsel %vm2125_vm13, %v2124_v30, %v3884_v13  ;;  %2351 = vmatpush.msrb.mxu2 %v2323_v47  ;;  %v2606_v13 = vld [vmem:[%s4071_s6] ss:$0 sm:$0xff] }
 0x483   :  { %v2016_v23 = vsel %vm4117_vm4, %v2015_v33, %v2014_v17  ;;  %2396 = vmatpush.msra.mxu3 %v2366_v16 }
 0x484   :  { %2352 = vmatpush.msrb.mxu2 %v2322_v40 }
 0x485   :  { %2397 = vmatpush.msra.mxu3 %v2365_v27 }
 0x486   :  { %2353 = vmatpush.msrb.mxu2 %v2321_v1 }
 0x487   :  { %v2007_v59 = vpop.permute.xlu0 %2006  ;;  %2398 = vmatpush.msra.mxu3 %v2364_v39 }
 0x488   :  { %v2000_v57 = vpop.permute.xlu1 %1999  ;;  %2354 = vmatpush.msrb.mxu2 %v2320_v3 }
 0x489   :  { %2003 = vst.msk [vmem:[#allocation6 + $0x6] sm:$0x1] %vm2002_vm8, %v2000_v57  ;;  %2399 = vmatpush.msra.mxu3 %v2363_v62 }
 0x48a   :  { %2010 = vst.msk [vmem:[#allocation6 + $0x6] sm:$0x1] %vm2009_vm3, %v2007_v59  ;;  %2355 = vmatpush.msrb.mxu2 %v2319_v46  ;;  %v2608_v59 = vld [vmem:[%s4075_s10] ss:$0 sm:$0xff] }
 0x48b   :  { %2021 = vst.msk [vmem:[#allocation6 + $0x6] sm:$0x5] %vm3942_vm6, %v2016_v23  ;;  %2400 = vmatpush.msra.mxu3 %v2362_v10 }
 0x48c   :  { %2356 = vmatpush.msrb.mxu2 %v2318_v6 }
 0x490   :  { %v2117_v18 = vpop.permute.xlu1 %2116 }
 0x491   :  { %2119 = vst.msk [vmem:[#allocation6 + $0x7] sm:$0x1] %vm2009_vm3, %v2117_v18 }
 0x492   :  { %2128 = vst.msk [vmem:[#allocation6 + $0x7] sm:$0x5] %vm3942_vm6, %v2126_v45 }
 0x499   :  { %v2130_v54 = vld [vmem:[#allocation6 + $0x8] sm:$0x3]  ;;  %v2129_v63 = vld [vmem:[#allocation6] sm:$0xff] }
 0x49a   :  { %2205 = vst [vmem:[#allocation1 + $0x20] ss:$4 sm:$0xff] %v2130_v54 }
 0x49b   :  { %2203 = vst [vmem:[#allocation1] ss:$4 sm:$0xff] %v2129_v63 }
 0x4a1   :  { %v2210_v20 = vld.sshfl [vmem:[#allocation1 + $0x20] sm:$0xff pattern:$0x73625140] }
 0x4a2   :  { %v2206_v28 = vld.sshfl [vmem:[#allocation1] sm:$0xff pattern:$0x73625140]  ;;  %v2207_v25 = vld.sshfl [vmem:[#allocation1 + $0x8] sm:$0xff pattern:$0x73625140] }
 0x4a3   :  { %2233 = vmatmul.f32.vlgmr.msrb.gmra.mxu0 %v2206_v28  ;;  %2253 = vmatmul.f32.vlgmr.msra.gmra.mxu2 %v2207_v25  ;;  %v2208_v55 = vld.sshfl [vmem:[#allocation1 + $0x10] sm:$0xff pattern:$0x73625140]  ;;  %v2209_v0 = vld.sshfl [vmem:[#allocation1 + $0x18] sm:$0xff pattern:$0x73625140] }
 0x4a4   :  { %2273 = vmatmul.f32.vlgmr.msrb.gmra.mxu3 %v2208_v55  ;;  %2293 = vmatmul.f32.vlgmr.msra.gmra.mxu1 %v2209_v0 }
 0x4ab   :  { %2509 = vmatmul.msk.f32.vlgmr.msra.gmra.mxu0 %vm4118_vm1, %v2210_v20 }
 0x520   :  { %v2234_v11 = vpop.f32.mrf.mxu0 }
 0x521   :  { %v2235_v14 = vadd.f32 %v2606_v13, %v2234_v11  ;;  %v2294_v24 = vpop.f32.mrf.mxu1 }
 0x526   :  { %v2254_v17 = vpop.f32.mrf.mxu2 }
 0x527   :  { %v2255_v50 = vadd.f32 %v2254_v17, %v2235_v14  ;;  %v2274_v21 = vpop.f32.mrf.mxu3 }
 0x528   :  { %v2314_v29 = vpop.f32.mrf.mxu0 }
 0x529   :  { %v2275_v22 = vadd.f32 %v2274_v21, %v2255_v50 }
 0x52b   :  { %v2295_v56 = vadd.f32 %v2294_v24, %v2275_v22 }
 0x52d   :  { %v2315_v26 = vadd.f32 %v2314_v29, %v2295_v56 }
 0x52f   :  { %v2317_v15 = vmax.f32 %v2315_v26, 0.0 }
 0x531   :  { %2510 = vmatmul.msk.f32.vlgmr.msrb.gmra.mxu2 %vm2337_vm15, %v2317_v15 }
 0x5b4   :  { %v2358_v33 = vpop.f32.mrf.mxu2 }
 0x5b5   :  { %v2359_v38 = vadd.f32 %v2607_v31, %v2358_v33 }
 0x5b7   :  { %v2361_v36 = vmax.f32 %v2359_v38, 0.0 }
 0x5b9   :  { %2512 = vmatmul.msk.f32.vlgmr.msra.gmra.mxu3 %vm2377_vm12, %v2361_v36 }
 0x63c   :  { %v2402_v37 = vpop.f32.mrf.mxu3 }
 0x63d   :  { %v2403_v9 = vadd.f32 %v2608_v59, %v2402_v37 }
 0x63f   :  { %2406 = vst.msk [vmem:[#allocation7] sm:$0x3] %vm2405_vm9, %v2403_v9 }
 0x640   :  { %2417 = dma.vmem_to_hbm [thread:$0]  %s2413_s28, 32, %s2415_s9, [#allocation8]  }
 0x641   :  { %2633 = dma.done.wait [#allocation8], 32  }
 0x642   :  { %2634 = vsyncadd [#allocation8], 4294967264 }
 0x643   :  { %2422 = vsyncpa [#allocation8], 1 }

</bundles_post_ra>
